<compile_context>
chip_gen: v6e
topology: v6e:2x2x1
jax: 0.10.0
libtpu: 0.0.40
codegen_flags: <defaults>
</compile_context>

<pallas_src>
import math

import jax
import jax.numpy as jnp
import numpy as np
from jax import lax
from jax.experimental import pallas as pl
from jax.experimental.pallas import tpu as pltpu

_BF16 = jnp.bfloat16


# ----------------------------------------------------------------------------
# The single fused Pallas kernel (one grid step == B_TILE images)
# ----------------------------------------------------------------------------
def _tutorial_net_kernel(
    x_ref,                      # (B*32, 480) bf16  kh-concatenated input rows
    w1_ref, b1_ref,             # conv1: (480, 168) bf16, (1, 168) f32
    sc1a_ref, sc1b_ref,         # pool1 column selectors: (168, 84) bf16
    sr1a_ref, sr1b_ref,         # pool1 row selectors: (B*16+8, B*32) bf16
    w2_ref, b2_ref,             # conv2: (5, 84, 160) bf16, (1, 160) f32
    sc2a_ref, sc2b_ref,         # pool2 column selectors: (160, 80) bf16
    sr2a_ref, sr2b_ref,         # pool2 row selectors: (B*8+8, B*16) bf16
    g1_ref, fb1_ref,            # fc1: (5, 80, 120) bf16, (1, 120) f32
    s3_ref,                     # fc1 valid-row gather: (B, B*8) bf16
    w2fc_ref, fb2_ref,          # fc2: (120, 84) bf16, (1, 84) f32
    w3fc_ref, fb3_ref,          # fc3 (lane-padded): (84, 128) bf16, (1, 128) f32
    out_ref,                    # (B, 128) f32
):
    f32, bf16 = jnp.float32, jnp.bfloat16

    def dot(a, b):
        # bf16 MXU operands, f32 accumulation.
        return jnp.dot(a.astype(bf16), b.astype(bf16), preferred_element_type=f32)

    rows1 = x_ref.shape[0]      # B*32
    rows2 = rows1 // 2          # B*16
    rows3 = rows1 // 4          # B*8

    # conv1 (+bias, +ReLU): ONE fused matmul (kh pre-concatenated along lanes).
    a1 = jnp.maximum(dot(x_ref[...], w1_ref[...]) + b1_ref[...], 0.0)   # (B*32,168)

    # 2x2 max-pool #1: width via even/odd column selectors, height via global
    # block-diagonal even/odd row selectors. The row selectors emit 8 trailing
    # zero rows of slack so the conv2 kh-shift slices below stay in bounds.
    h1 = jnp.maximum(dot(a1, sc1a_ref[...]), dot(a1, sc1b_ref[...]))    # (B*32,84)
    p1 = jnp.maximum(dot(sr1a_ref[...], h1), dot(sr1b_ref[...], h1))    # (B*16+8,84)

    # conv2 (+bias, +ReLU): 5 batched matmuls on kh-shifted row windows.
    z2 = b2_ref[...]
    for kh in range(5):
        z2 = z2 + dot(p1[kh:kh + rows2, :], w2_ref[kh])                 # (B*16,160)
    a2 = jnp.maximum(z2, 0.0)

    # 2x2 max-pool #2.
    h2 = jnp.maximum(dot(a2, sc2a_ref[...]), dot(a2, sc2b_ref[...]))    # (B*16,80)
    p2 = jnp.maximum(dot(sr2a_ref[...], h2), dot(sr2b_ref[...], h2))    # (B*8+8,80)

    # fc1: contract the 5 valid spatial rows per image with conv-style shifted
    # matmuls (M = B*8), then gather the single valid row per image.
    f = dot(p2[0:rows3, :], g1_ref[0])
    for h in range(1, 5):
        f = f + dot(p2[h:h + rows3, :], g1_ref[h])                      # (B*8,120)
    f1 = jnp.maximum(dot(s3_ref[...], f) + fb1_ref[...], 0.0)           # (B,120)

    # fc2 (+ReLU) and fc3 (output lanes zero-padded to 128 -> lane-dense store).
    f2 = jnp.maximum(dot(f1, w2fc_ref[...]) + fb2_ref[...], 0.0)        # (B,84)
    f3 = dot(f2, w3fc_ref[...]) + fb3_ref[...]                          # (B,128)

    out_ref[...] = f3.astype(out_ref.dtype)


# ----------------------------------------------------------------------------
# Wrapper-side weight rearrangement (plain JAX / numpy, done once)
# ----------------------------------------------------------------------------
def _conv_as_rowwise_matmuls(w, in_w, out_w):
    """PyTorch conv weight (OC, IC, K, K) -> (K, IC*in_w, OC*out_w) stack M with
    conv(x)[oh, oc*out_w + ow] = sum_kh (x2d[oh+kh, :] @ M[kh])[oc*out_w + ow]
    for activations laid out as (H, C*W) (channel-major, width-minor)."""
    oc_n, ic_n, k, _ = w.shape
    kh_i, oc_i, ic_i, kw_i, ow_i = np.ix_(
        np.arange(k), np.arange(oc_n), np.arange(ic_n),
        np.arange(k), np.arange(out_w))
    rows = ic_i * in_w + ow_i + kw_i                  # input column index
    cols = oc_i * out_w + ow_i                        # output column index
    full = (k, oc_n, ic_n, k, out_w)
    vals = jnp.broadcast_to(
        jnp.transpose(w, (2, 0, 1, 3))[:, :, :, :, None], full)
    m = jnp.zeros((k, ic_n * in_w, oc_n * out_w), jnp.float32)
    return m.at[np.broadcast_to(kh_i, full),
                np.broadcast_to(rows, full),
                np.broadcast_to(cols, full)].set(vals)


def _pool_col_selectors(channels, in_w):
    """0/1 matrices picking even / odd spatial columns (channel-major layout)."""
    out_w = in_w // 2
    c_i, j_i = np.ix_(np.arange(channels), np.arange(out_w))
    a = np.zeros((channels * in_w, channels * out_w), np.float32)
    b = np.zeros_like(a)
    a[c_i * in_w + 2 * j_i, c_i * out_w + j_i] = 1.0
    b[c_i * in_w + 2 * j_i + 1, c_i * out_w + j_i] = 1.0
    return jnp.asarray(a, _BF16), jnp.asarray(b, _BF16)


def _pool_row_selectors(b_tile, in_rows, out_rows):
    """Global even/odd row selectors for b_tile images stacked along rows.
    Output has b_tile*out_rows rows plus 8 trailing all-zero slack rows so the
    later in-kernel kh-shift slices of the pooled activation stay in bounds."""
    a = np.zeros((b_tile * out_rows + 8, b_tile * in_rows), np.float32)
    b = np.zeros_like(a)
    for img in range(b_tile):
        for r in range(out_rows):
            a[img * out_rows + r, img * in_rows + 2 * r] = 1.0
            b[img * out_rows + r, img * in_rows + 2 * r + 1] = 1.0
    return jnp.asarray(a, _BF16), jnp.asarray(b, _BF16)


def _fc1_row_gather(b_tile):
    """0/1 matrix picking row b*8 (the valid fc1 row) for each image b."""
    s = np.zeros((b_tile, b_tile * 8), np.float32)
    s[np.arange(b_tile), np.arange(b_tile) * 8] = 1.0
    return jnp.asarray(s, _BF16)


def _prepare_operands(params, b_tile):
    """Rearranged bf16 weights / selectors (+ f32 biases), kernel arg order."""
    w1 = _conv_as_rowwise_matmuls(params["conv1_w"], in_w=32, out_w=28)
    w1 = w1.reshape(5 * 96, 168).astype(_BF16)          # kh folded into K
    b1 = jnp.repeat(params["conv1_b"], 28).reshape(1, 168)
    w2 = _conv_as_rowwise_matmuls(params["conv2_w"], in_w=14, out_w=10).astype(_BF16)
    b2 = jnp.repeat(params["conv2_b"], 10).reshape(1, 160)

    sc1a, sc1b = _pool_col_selectors(6, 28)
    sr1a, sr1b = _pool_row_selectors(b_tile, in_rows=32, out_rows=16)
    sc2a, sc2b = _pool_col_selectors(16, 10)
    sr2a, sr2b = _pool_row_selectors(b_tile, in_rows=16, out_rows=8)

    # fc1 weight (120, 400) uses PyTorch's NCHW flatten order (c*25 + h*5 + w);
    # rearrange into per-spatial-row matrices [h, c*5 + w, out].
    g1 = jnp.transpose(params["fc1_w"].reshape(120, 16, 5, 5),
                       (2, 1, 3, 0)).reshape(5, 80, 120).astype(_BF16)
    fb1 = params["fc1_b"].reshape(1, 120)
    s3 = _fc1_row_gather(b_tile)

    w2fc = params["fc2_w"].T.astype(_BF16)               # (120, 84)
    fb2 = params["fc2_b"].reshape(1, 84)
    # fc3 zero-padded to 128 output lanes for a lane-dense final HBM store.
    w3fc = jnp.zeros((84, 128), jnp.float32).at[:, :10].set(
        params["fc3_w"].T).astype(_BF16)
    fb3 = jnp.zeros((1, 128), jnp.float32).at[0, :10].set(params["fc3_b"])

    return [w1, b1, sc1a, sc1b, sr1a, sr1b,
            w2, b2, sc2a, sc2b, sr2a, sr2b,
            g1, fb1, s3, w2fc, fb2, w3fc, fb3]


def _const_index_map(ndim):
    zeros = (0,) * ndim

    def idx(i):
        return zeros

    return idx


def tutorial_net_forward(x_nchw, params, *, b_tile=8):
    """Forward pass matching TutorialNet.forward. x_nchw: (N, 3, 32, 32) f32."""
    assert b_tile % 8 == 0, "b_tile must be a multiple of 8 (sublane tile)"
    n = x_nchw.shape[0]
    n_pad = -(-n // b_tile) * b_tile
    x = jnp.pad(x_nchw, ((0, n_pad - n), (0, 0), (0, 0), (0, 0)))

    # (N, C, H, W) -> (N, H, C*W) channel-major width-minor rows, then
    # pre-concatenate the 5 kh-shifted row windows along lanes so conv1 is a
    # single matmul in-kernel. The shift never leaks across image boundaries
    # into valid output rows (rows 28..31 are discarded by the pool selectors).
    x2d = jnp.transpose(x, (0, 2, 1, 3)).reshape(n_pad, 32, 96)
    xcat = jnp.concatenate(
        [jnp.pad(x2d[:, kh:, :], ((0, 0), (0, kh), (0, 0))) for kh in range(5)],
        axis=-1).reshape(n_pad * 32, 5 * 96).astype(_BF16)

    operands = _prepare_operands(params, b_tile)
    in_specs = [pl.BlockSpec((b_tile * 32, 5 * 96), lambda i: (i, 0))]
    in_specs += [pl.BlockSpec(a.shape, _const_index_map(a.ndim)) for a in operands]

    out = pl.pallas_call(
        _tutorial_net_kernel,
        out_shape=jax.ShapeDtypeStruct((n_pad, 128), jnp.float32),
        grid=(n_pad // b_tile,),
        in_specs=in_specs,
        out_specs=pl.BlockSpec((b_tile, 128), lambda i: (i, 0)),
        compiler_params=pltpu.CompilerParams(
            dimension_semantics=("parallel",),     # batch steps across TCs (v7x)
            vmem_limit_bytes=32 * 1024 * 1024),
    )(xcat, *operands)
    return out[:n, :10]


# ----------------------------------------------------------------------------
# Deterministic PyTorch-layout parameters
# ----------------------------------------------------------------------------
def init_params(key):
    """Deterministic parameters, PyTorch-default-style uniform(-1/sqrt(fan_in))."""
    def uni(key, shape, fan_in):
        bound = 1.0 / math.sqrt(fan_in)
        return jax.random.uniform(key, shape, jnp.float32, -bound, bound)

    ks = jax.random.split(key, 10)
    p = {}
    p["conv1_w"] = uni(ks[0], (6, 3, 5, 5), 3 * 5 * 5)
    p["conv1_b"] = uni(ks[1], (6,), 3 * 5 * 5)
    p["conv2_w"] = uni(ks[2], (16, 6, 5, 5), 6 * 5 * 5)
    p["conv2_b"] = uni(ks[3], (16,), 6 * 5 * 5)
    p["fc1_w"] = uni(ks[4], (120, 16 * 5 * 5), 400)
    p["fc1_b"] = uni(ks[5], (120,), 400)
    p["fc2_w"] = uni(ks[6], (84, 120), 120)
    p["fc2_b"] = uni(ks[7], (84,), 120)
    p["fc3_w"] = uni(ks[8], (10, 84), 84)
    p["fc3_b"] = uni(ks[9], (10,), 84)
    return p


# ----------------------------------------------------------------------------
# Pure-JAX reference (correctness sanity check only)
# ----------------------------------------------------------------------------
def reference_forward(x_nchw, params):
    dn = lax.conv_dimension_numbers(x_nchw.shape, params["conv1_w"].shape,
                                    ("NCHW", "OIHW", "NCHW"))

    def conv(x, w, b):
        y = lax.conv_general_dilated(x, w, (1, 1), "VALID", dimension_numbers=dn)
        return jnp.maximum(y + b[None, :, None, None], 0.0)

    def pool(x):
        return lax.reduce_window(x, -jnp.inf, lax.max,
                                 (1, 1, 2, 2), (1, 1, 2, 2), "VALID")

    x = pool(conv(x_nchw, params["conv1_w"], params["conv1_b"]))
    x = pool(conv(x, params["conv2_w"], params["conv2_b"]))
    x = x.reshape(x.shape[0], -1)
    x = jnp.maximum(x @ params["fc1_w"].T + params["fc1_b"], 0.0)
    x = jnp.maximum(x @ params["fc2_w"].T + params["fc2_b"], 0.0)
    return x @ params["fc3_w"].T + params["fc3_b"]


if __name__ == "__main__":
    key = jax.random.PRNGKey(0)
    k_x, k_p = jax.random.split(key)

    # fc1's 16*5*5 input size implies a 32x32 spatial input. batch=10 exercises
    # both the batch-padding path (10 -> 16) and a >1-step "parallel" grid.
    x = jax.random.normal(k_x, (10, 3, 32, 32), jnp.float32)
    params = init_params(k_p)

    out = jax.block_until_ready(tutorial_net_forward(x, params, b_tile=8))
    assert out.shape == (10, 10) and out.dtype == jnp.float32

    ref = jax.block_until_ready(reference_forward(x, params))
    # bf16-MXU-operand tolerance (reference also runs bf16-class matmuls on TPU).
    np.testing.assert_allclose(np.asarray(out), np.asarray(ref),
                               rtol=3e-2, atol=3e-2)
    print("KERNEL_OK")
</pallas_src>

<mosaic_0001>
module attributes {stable_mosaic.version = 11 : i64} {
  func.func @_tutorial_net_kernel(%arg0: i32, %arg1: memref<256x480xbf16, #tpu.memory_space<vmem>>, %arg2: memref<480x168xbf16, #tpu.memory_space<vmem>>, %arg3: memref<1x168xf32, #tpu.memory_space<vmem>>, %arg4: memref<168x84xbf16, #tpu.memory_space<vmem>>, %arg5: memref<168x84xbf16, #tpu.memory_space<vmem>>, %arg6: memref<136x256xbf16, #tpu.memory_space<vmem>>, %arg7: memref<136x256xbf16, #tpu.memory_space<vmem>>, %arg8: memref<5x84x160xbf16, #tpu.memory_space<vmem>>, %arg9: memref<1x160xf32, #tpu.memory_space<vmem>>, %arg10: memref<160x80xbf16, #tpu.memory_space<vmem>>, %arg11: memref<160x80xbf16, #tpu.memory_space<vmem>>, %arg12: memref<72x128xbf16, #tpu.memory_space<vmem>>, %arg13: memref<72x128xbf16, #tpu.memory_space<vmem>>, %arg14: memref<5x80x120xbf16, #tpu.memory_space<vmem>>, %arg15: memref<1x120xf32, #tpu.memory_space<vmem>>, %arg16: memref<8x64xbf16, #tpu.memory_space<vmem>>, %arg17: memref<120x84xbf16, #tpu.memory_space<vmem>>, %arg18: memref<1x84xf32, #tpu.memory_space<vmem>>, %arg19: memref<84x128xbf16, #tpu.memory_space<vmem>>, %arg20: memref<1x128xf32, #tpu.memory_space<vmem>>, %arg21: memref<8x128xf32, #tpu.memory_space<vmem>>) attributes {dimension_semantics = [#tpu.dimension_semantics<parallel>], iteration_bounds = array<i64: 2>, scalar_prefetch = 0 : i64, scratch_operands = 0 : i64, tpu.core_type = #tpu.core_type<tc>, window_params = [{transform_indices = @transform_0, window_bounds = array<i64: 256, 480>}, {pipeline_mode = #tpu.pipeline_mode<synchronous>, transform_indices = @transform_1, window_bounds = array<i64: 480, 168>}, {pipeline_mode = #tpu.pipeline_mode<synchronous>, transform_indices = @transform_2, window_bounds = array<i64: 1, 168>}, {pipeline_mode = #tpu.pipeline_mode<synchronous>, transform_indices = @transform_3, window_bounds = array<i64: 168, 84>}, {pipeline_mode = #tpu.pipeline_mode<synchronous>, transform_indices = @transform_4, window_bounds = array<i64: 168, 84>}, {pipeline_mode = #tpu.pipeline_mode<synchronous>, transform_indices = @transform_5, window_bounds = array<i64: 136, 256>}, {pipeline_mode = #tpu.pipeline_mode<synchronous>, transform_indices = @transform_6, window_bounds = array<i64: 136, 256>}, {pipeline_mode = #tpu.pipeline_mode<synchronous>, transform_indices = @transform_7, window_bounds = array<i64: 5, 84, 160>}, {pipeline_mode = #tpu.pipeline_mode<synchronous>, transform_indices = @transform_8, window_bounds = array<i64: 1, 160>}, {pipeline_mode = #tpu.pipeline_mode<synchronous>, transform_indices = @transform_9, window_bounds = array<i64: 160, 80>}, {pipeline_mode = #tpu.pipeline_mode<synchronous>, transform_indices = @transform_10, window_bounds = array<i64: 160, 80>}, {pipeline_mode = #tpu.pipeline_mode<synchronous>, transform_indices = @transform_11, window_bounds = array<i64: 72, 128>}, {pipeline_mode = #tpu.pipeline_mode<synchronous>, transform_indices = @transform_12, window_bounds = array<i64: 72, 128>}, {pipeline_mode = #tpu.pipeline_mode<synchronous>, transform_indices = @transform_13, window_bounds = array<i64: 5, 80, 120>}, {pipeline_mode = #tpu.pipeline_mode<synchronous>, transform_indices = @transform_14, window_bounds = array<i64: 1, 120>}, {pipeline_mode = #tpu.pipeline_mode<synchronous>, transform_indices = @transform_15, window_bounds = array<i64: 8, 64>}, {pipeline_mode = #tpu.pipeline_mode<synchronous>, transform_indices = @transform_16, window_bounds = array<i64: 120, 84>}, {pipeline_mode = #tpu.pipeline_mode<synchronous>, transform_indices = @transform_17, window_bounds = array<i64: 1, 84>}, {pipeline_mode = #tpu.pipeline_mode<synchronous>, transform_indices = @transform_18, window_bounds = array<i64: 84, 128>}, {pipeline_mode = #tpu.pipeline_mode<synchronous>, transform_indices = @transform_19, window_bounds = array<i64: 1, 128>}, {transform_indices = @transform_20, window_bounds = array<i64: 8, 128>}]} {
    %c0 = arith.constant 0 : index
    %c0_0 = arith.constant 0 : index
    %0 = vector.load %arg1[%c0, %c0_0] : memref<256x480xbf16, #tpu.memory_space<vmem>>, vector<256x480xbf16>
    %c0_1 = arith.constant 0 : index
    %c0_2 = arith.constant 0 : index
    %1 = vector.load %arg2[%c0_1, %c0_2] : memref<480x168xbf16, #tpu.memory_space<vmem>>, vector<480x168xbf16>
    %cst = arith.constant dense<0.000000e+00> : vector<256x168xf32>
    %2 = tpu.matmul %0, %1, %cst {dimension_numbers = #tpu.dot_dimension_numbers<[1], [0], [0], [1], [0, 0, 1, 1], [], []>} : vector<256x480xbf16>, vector<480x168xbf16>, vector<256x168xf32> -> vector<256x168xf32>
    %c0_3 = arith.constant 0 : index
    %c0_4 = arith.constant 0 : index
    %3 = vector.load %arg3[%c0_3, %c0_4] : memref<1x168xf32, #tpu.memory_space<vmem>>, vector<1x168xf32>
    %4 = vector.broadcast %3 : vector<1x168xf32> to vector<256x168xf32>
    %5 = arith.addf %2, %4 : vector<256x168xf32>
    %cst_5 = arith.constant 0.000000e+00 : f32
    %6 = vector.broadcast %cst_5 : f32 to vector<256x168xf32>
    %7 = arith.maximumf %5, %6 : vector<256x168xf32>
    %c0_6 = arith.constant 0 : index
    %c0_7 = arith.constant 0 : index
    %8 = vector.load %arg4[%c0_6, %c0_7] : memref<168x84xbf16, #tpu.memory_space<vmem>>, vector<168x84xbf16>
    %9 = arith.truncf %7 : vector<256x168xf32> to vector<256x168xbf16>
    %cst_8 = arith.constant dense<0.000000e+00> : vector<256x84xf32>
    %10 = tpu.matmul %9, %8, %cst_8 {dimension_numbers = #tpu.dot_dimension_numbers<[1], [0], [0], [1], [0, 0, 1, 1], [], []>} : vector<256x168xbf16>, vector<168x84xbf16>, vector<256x84xf32> -> vector<256x84xf32>
    %c0_9 = arith.constant 0 : index
    %c0_10 = arith.constant 0 : index
    %11 = vector.load %arg5[%c0_9, %c0_10] : memref<168x84xbf16, #tpu.memory_space<vmem>>, vector<168x84xbf16>
    %12 = arith.truncf %7 : vector<256x168xf32> to vector<256x168xbf16>
    %cst_11 = arith.constant dense<0.000000e+00> : vector<256x84xf32>
    %13 = tpu.matmul %12, %11, %cst_11 {dimension_numbers = #tpu.dot_dimension_numbers<[1], [0], [0], [1], [0, 0, 1, 1], [], []>} : vector<256x168xbf16>, vector<168x84xbf16>, vector<256x84xf32> -> vector<256x84xf32>
    %14 = arith.maximumf %10, %13 : vector<256x84xf32>
    %c0_12 = arith.constant 0 : index
    %c0_13 = arith.constant 0 : index
    %15 = vector.load %arg6[%c0_12, %c0_13] : memref<136x256xbf16, #tpu.memory_space<vmem>>, vector<136x256xbf16>
    %16 = arith.truncf %14 : vector<256x84xf32> to vector<256x84xbf16>
    %cst_14 = arith.constant dense<0.000000e+00> : vector<136x84xf32>
    %17 = tpu.matmul %15, %16, %cst_14 {dimension_numbers = #tpu.dot_dimension_numbers<[1], [0], [0], [1], [0, 0, 1, 1], [], []>} : vector<136x256xbf16>, vector<256x84xbf16>, vector<136x84xf32> -> vector<136x84xf32>
    %c0_15 = arith.constant 0 : index
    %c0_16 = arith.constant 0 : index
    %18 = vector.load %arg7[%c0_15, %c0_16] : memref<136x256xbf16, #tpu.memory_space<vmem>>, vector<136x256xbf16>
    %19 = arith.truncf %14 : vector<256x84xf32> to vector<256x84xbf16>
    %cst_17 = arith.constant dense<0.000000e+00> : vector<136x84xf32>
    %20 = tpu.matmul %18, %19, %cst_17 {dimension_numbers = #tpu.dot_dimension_numbers<[1], [0], [0], [1], [0, 0, 1, 1], [], []>} : vector<136x256xbf16>, vector<256x84xbf16>, vector<136x84xf32> -> vector<136x84xf32>
    %21 = arith.maximumf %17, %20 : vector<136x84xf32>
    %c0_18 = arith.constant 0 : index
    %c0_19 = arith.constant 0 : index
    %22 = vector.load %arg9[%c0_18, %c0_19] : memref<1x160xf32, #tpu.memory_space<vmem>>, vector<1x160xf32>
    %23 = vector.extract_strided_slice %21 {offsets = [0, 0], sizes = [128, 84], strides = [1, 1]} : vector<136x84xf32> to vector<128x84xf32>
    %c0_20 = arith.constant 0 : index
    %c0_21 = arith.constant 0 : index
    %c0_22 = arith.constant 0 : index
    %24 = vector.load %arg8[%c0_20, %c0_21, %c0_22] : memref<5x84x160xbf16, #tpu.memory_space<vmem>>, vector<1x84x160xbf16>
    %25 = vector.shape_cast %24 : vector<1x84x160xbf16> to vector<84x160xbf16>
    %26 = arith.truncf %23 : vector<128x84xf32> to vector<128x84xbf16>
    %cst_23 = arith.constant dense<0.000000e+00> : vector<128x160xf32>
    %27 = tpu.matmul %26, %25, %cst_23 {dimension_numbers = #tpu.dot_dimension_numbers<[1], [0], [0], [1], [0, 0, 1, 1], [], []>} : vector<128x84xbf16>, vector<84x160xbf16>, vector<128x160xf32> -> vector<128x160xf32>
    %28 = vector.broadcast %22 : vector<1x160xf32> to vector<128x160xf32>
    %29 = arith.addf %28, %27 : vector<128x160xf32>
    %30 = vector.extract_strided_slice %21 {offsets = [1, 0], sizes = [128, 84], strides = [1, 1]} : vector<136x84xf32> to vector<128x84xf32>
    %c1 = arith.constant 1 : index
    %c0_24 = arith.constant 0 : index
    %c0_25 = arith.constant 0 : index
    %31 = vector.load %arg8[%c1, %c0_24, %c0_25] : memref<5x84x160xbf16, #tpu.memory_space<vmem>>, vector<1x84x160xbf16>
    %32 = vector.shape_cast %31 : vector<1x84x160xbf16> to vector<84x160xbf16>
    %33 = arith.truncf %30 : vector<128x84xf32> to vector<128x84xbf16>
    %cst_26 = arith.constant dense<0.000000e+00> : vector<128x160xf32>
    %34 = tpu.matmul %33, %32, %cst_26 {dimension_numbers = #tpu.dot_dimension_numbers<[1], [0], [0], [1], [0, 0, 1, 1], [], []>} : vector<128x84xbf16>, vector<84x160xbf16>, vector<128x160xf32> -> vector<128x160xf32>
    %35 = arith.addf %29, %34 : vector<128x160xf32>
    %36 = vector.extract_strided_slice %21 {offsets = [2, 0], sizes = [128, 84], strides = [1, 1]} : vector<136x84xf32> to vector<128x84xf32>
    %c2 = arith.constant 2 : index
    %c0_27 = arith.constant 0 : index
    %c0_28 = arith.constant 0 : index
    %37 = vector.load %arg8[%c2, %c0_27, %c0_28] : memref<5x84x160xbf16, #tpu.memory_space<vmem>>, vector<1x84x160xbf16>
    %38 = vector.shape_cast %37 : vector<1x84x160xbf16> to vector<84x160xbf16>
    %39 = arith.truncf %36 : vector<128x84xf32> to vector<128x84xbf16>
    %cst_29 = arith.constant dense<0.000000e+00> : vector<128x160xf32>
    %40 = tpu.matmul %39, %38, %cst_29 {dimension_numbers = #tpu.dot_dimension_numbers<[1], [0], [0], [1], [0, 0, 1, 1], [], []>} : vector<128x84xbf16>, vector<84x160xbf16>, vector<128x160xf32> -> vector<128x160xf32>
    %41 = arith.addf %35, %40 : vector<128x160xf32>
    %42 = vector.extract_strided_slice %21 {offsets = [3, 0], sizes = [128, 84], strides = [1, 1]} : vector<136x84xf32> to vector<128x84xf32>
    %c3 = arith.constant 3 : index
    %c0_30 = arith.constant 0 : index
    %c0_31 = arith.constant 0 : index
    %43 = vector.load %arg8[%c3, %c0_30, %c0_31] : memref<5x84x160xbf16, #tpu.memory_space<vmem>>, vector<1x84x160xbf16>
    %44 = vector.shape_cast %43 : vector<1x84x160xbf16> to vector<84x160xbf16>
    %45 = arith.truncf %42 : vector<128x84xf32> to vector<128x84xbf16>
    %cst_32 = arith.constant dense<0.000000e+00> : vector<128x160xf32>
    %46 = tpu.matmul %45, %44, %cst_32 {dimension_numbers = #tpu.dot_dimension_numbers<[1], [0], [0], [1], [0, 0, 1, 1], [], []>} : vector<128x84xbf16>, vector<84x160xbf16>, vector<128x160xf32> -> vector<128x160xf32>
    %47 = arith.addf %41, %46 : vector<128x160xf32>
    %48 = vector.extract_strided_slice %21 {offsets = [4, 0], sizes = [128, 84], strides = [1, 1]} : vector<136x84xf32> to vector<128x84xf32>
    %c4 = arith.constant 4 : index
    %c0_33 = arith.constant 0 : index
    %c0_34 = arith.constant 0 : index
    %49 = vector.load %arg8[%c4, %c0_33, %c0_34] : memref<5x84x160xbf16, #tpu.memory_space<vmem>>, vector<1x84x160xbf16>
    %50 = vector.shape_cast %49 : vector<1x84x160xbf16> to vector<84x160xbf16>
    %51 = arith.truncf %48 : vector<128x84xf32> to vector<128x84xbf16>
    %cst_35 = arith.constant dense<0.000000e+00> : vector<128x160xf32>
    %52 = tpu.matmul %51, %50, %cst_35 {dimension_numbers = #tpu.dot_dimension_numbers<[1], [0], [0], [1], [0, 0, 1, 1], [], []>} : vector<128x84xbf16>, vector<84x160xbf16>, vector<128x160xf32> -> vector<128x160xf32>
    %53 = arith.addf %47, %52 : vector<128x160xf32>
    %cst_36 = arith.constant 0.000000e+00 : f32
    %54 = vector.broadcast %cst_36 : f32 to vector<128x160xf32>
    %55 = arith.maximumf %53, %54 : vector<128x160xf32>
    %c0_37 = arith.constant 0 : index
    %c0_38 = arith.constant 0 : index
    %56 = vector.load %arg10[%c0_37, %c0_38] : memref<160x80xbf16, #tpu.memory_space<vmem>>, vector<160x80xbf16>
    %57 = arith.truncf %55 : vector<128x160xf32> to vector<128x160xbf16>
    %cst_39 = arith.constant dense<0.000000e+00> : vector<128x80xf32>
    %58 = tpu.matmul %57, %56, %cst_39 {dimension_numbers = #tpu.dot_dimension_numbers<[1], [0], [0], [1], [0, 0, 1, 1], [], []>} : vector<128x160xbf16>, vector<160x80xbf16>, vector<128x80xf32> -> vector<128x80xf32>
    %c0_40 = arith.constant 0 : index
    %c0_41 = arith.constant 0 : index
    %59 = vector.load %arg11[%c0_40, %c0_41] : memref<160x80xbf16, #tpu.memory_space<vmem>>, vector<160x80xbf16>
    %60 = arith.truncf %55 : vector<128x160xf32> to vector<128x160xbf16>
    %cst_42 = arith.constant dense<0.000000e+00> : vector<128x80xf32>
    %61 = tpu.matmul %60, %59, %cst_42 {dimension_numbers = #tpu.dot_dimension_numbers<[1], [0], [0], [1], [0, 0, 1, 1], [], []>} : vector<128x160xbf16>, vector<160x80xbf16>, vector<128x80xf32> -> vector<128x80xf32>
    %62 = arith.maximumf %58, %61 : vector<128x80xf32>
    %c0_43 = arith.constant 0 : index
    %c0_44 = arith.constant 0 : index
    %63 = vector.load %arg12[%c0_43, %c0_44] : memref<72x128xbf16, #tpu.memory_space<vmem>>, vector<72x128xbf16>
    %64 = arith.truncf %62 : vector<128x80xf32> to vector<128x80xbf16>
    %cst_45 = arith.constant dense<0.000000e+00> : vector<72x80xf32>
    %65 = tpu.matmul %63, %64, %cst_45 {dimension_numbers = #tpu.dot_dimension_numbers<[1], [0], [0], [1], [0, 0, 1, 1], [], []>} : vector<72x128xbf16>, vector<128x80xbf16>, vector<72x80xf32> -> vector<72x80xf32>
    %c0_46 = arith.constant 0 : index
    %c0_47 = arith.constant 0 : index
    %66 = vector.load %arg13[%c0_46, %c0_47] : memref<72x128xbf16, #tpu.memory_space<vmem>>, vector<72x128xbf16>
    %67 = arith.truncf %62 : vector<128x80xf32> to vector<128x80xbf16>
    %cst_48 = arith.constant dense<0.000000e+00> : vector<72x80xf32>
    %68 = tpu.matmul %66, %67, %cst_48 {dimension_numbers = #tpu.dot_dimension_numbers<[1], [0], [0], [1], [0, 0, 1, 1], [], []>} : vector<72x128xbf16>, vector<128x80xbf16>, vector<72x80xf32> -> vector<72x80xf32>
    %69 = arith.maximumf %65, %68 : vector<72x80xf32>
    %70 = vector.extract_strided_slice %69 {offsets = [0, 0], sizes = [64, 80], strides = [1, 1]} : vector<72x80xf32> to vector<64x80xf32>
    %c0_49 = arith.constant 0 : index
    %c0_50 = arith.constant 0 : index
    %c0_51 = arith.constant 0 : index
    %71 = vector.load %arg14[%c0_49, %c0_50, %c0_51] : memref<5x80x120xbf16, #tpu.memory_space<vmem>>, vector<1x80x120xbf16>
    %72 = vector.shape_cast %71 : vector<1x80x120xbf16> to vector<80x120xbf16>
    %73 = arith.truncf %70 : vector<64x80xf32> to vector<64x80xbf16>
    %cst_52 = arith.constant dense<0.000000e+00> : vector<64x120xf32>
    %74 = tpu.matmul %73, %72, %cst_52 {dimension_numbers = #tpu.dot_dimension_numbers<[1], [0], [0], [1], [0, 0, 1, 1], [], []>} : vector<64x80xbf16>, vector<80x120xbf16>, vector<64x120xf32> -> vector<64x120xf32>
    %75 = vector.extract_strided_slice %69 {offsets = [1, 0], sizes = [64, 80], strides = [1, 1]} : vector<72x80xf32> to vector<64x80xf32>
    %c1_53 = arith.constant 1 : index
    %c0_54 = arith.constant 0 : index
    %c0_55 = arith.constant 0 : index
    %76 = vector.load %arg14[%c1_53, %c0_54, %c0_55] : memref<5x80x120xbf16, #tpu.memory_space<vmem>>, vector<1x80x120xbf16>
    %77 = vector.shape_cast %76 : vector<1x80x120xbf16> to vector<80x120xbf16>
    %78 = arith.truncf %75 : vector<64x80xf32> to vector<64x80xbf16>
    %cst_56 = arith.constant dense<0.000000e+00> : vector<64x120xf32>
    %79 = tpu.matmul %78, %77, %cst_56 {dimension_numbers = #tpu.dot_dimension_numbers<[1], [0], [0], [1], [0, 0, 1, 1], [], []>} : vector<64x80xbf16>, vector<80x120xbf16>, vector<64x120xf32> -> vector<64x120xf32>
    %80 = arith.addf %74, %79 : vector<64x120xf32>
    %81 = vector.extract_strided_slice %69 {offsets = [2, 0], sizes = [64, 80], strides = [1, 1]} : vector<72x80xf32> to vector<64x80xf32>
    %c2_57 = arith.constant 2 : index
    %c0_58 = arith.constant 0 : index
    %c0_59 = arith.constant 0 : index
    %82 = vector.load %arg14[%c2_57, %c0_58, %c0_59] : memref<5x80x120xbf16, #tpu.memory_space<vmem>>, vector<1x80x120xbf16>
    %83 = vector.shape_cast %82 : vector<1x80x120xbf16> to vector<80x120xbf16>
    %84 = arith.truncf %81 : vector<64x80xf32> to vector<64x80xbf16>
    %cst_60 = arith.constant dense<0.000000e+00> : vector<64x120xf32>
    %85 = tpu.matmul %84, %83, %cst_60 {dimension_numbers = #tpu.dot_dimension_numbers<[1], [0], [0], [1], [0, 0, 1, 1], [], []>} : vector<64x80xbf16>, vector<80x120xbf16>, vector<64x120xf32> -> vector<64x120xf32>
    %86 = arith.addf %80, %85 : vector<64x120xf32>
    %87 = vector.extract_strided_slice %69 {offsets = [3, 0], sizes = [64, 80], strides = [1, 1]} : vector<72x80xf32> to vector<64x80xf32>
    %c3_61 = arith.constant 3 : index
    %c0_62 = arith.constant 0 : index
    %c0_63 = arith.constant 0 : index
    %88 = vector.load %arg14[%c3_61, %c0_62, %c0_63] : memref<5x80x120xbf16, #tpu.memory_space<vmem>>, vector<1x80x120xbf16>
    %89 = vector.shape_cast %88 : vector<1x80x120xbf16> to vector<80x120xbf16>
    %90 = arith.truncf %87 : vector<64x80xf32> to vector<64x80xbf16>
    %cst_64 = arith.constant dense<0.000000e+00> : vector<64x120xf32>
    %91 = tpu.matmul %90, %89, %cst_64 {dimension_numbers = #tpu.dot_dimension_numbers<[1], [0], [0], [1], [0, 0, 1, 1], [], []>} : vector<64x80xbf16>, vector<80x120xbf16>, vector<64x120xf32> -> vector<64x120xf32>
    %92 = arith.addf %86, %91 : vector<64x120xf32>
    %93 = vector.extract_strided_slice %69 {offsets = [4, 0], sizes = [64, 80], strides = [1, 1]} : vector<72x80xf32> to vector<64x80xf32>
    %c4_65 = arith.constant 4 : index
    %c0_66 = arith.constant 0 : index
    %c0_67 = arith.constant 0 : index
    %94 = vector.load %arg14[%c4_65, %c0_66, %c0_67] : memref<5x80x120xbf16, #tpu.memory_space<vmem>>, vector<1x80x120xbf16>
    %95 = vector.shape_cast %94 : vector<1x80x120xbf16> to vector<80x120xbf16>
    %96 = arith.truncf %93 : vector<64x80xf32> to vector<64x80xbf16>
    %cst_68 = arith.constant dense<0.000000e+00> : vector<64x120xf32>
    %97 = tpu.matmul %96, %95, %cst_68 {dimension_numbers = #tpu.dot_dimension_numbers<[1], [0], [0], [1], [0, 0, 1, 1], [], []>} : vector<64x80xbf16>, vector<80x120xbf16>, vector<64x120xf32> -> vector<64x120xf32>
    %98 = arith.addf %92, %97 : vector<64x120xf32>
    %c0_69 = arith.constant 0 : index
    %c0_70 = arith.constant 0 : index
    %99 = vector.load %arg16[%c0_69, %c0_70] : memref<8x64xbf16, #tpu.memory_space<vmem>>, vector<8x64xbf16>
    %100 = arith.truncf %98 : vector<64x120xf32> to vector<64x120xbf16>
    %cst_71 = arith.constant dense<0.000000e+00> : vector<8x120xf32>
    %101 = tpu.matmul %99, %100, %cst_71 {dimension_numbers = #tpu.dot_dimension_numbers<[1], [0], [0], [1], [0, 0, 1, 1], [], []>} : vector<8x64xbf16>, vector<64x120xbf16>, vector<8x120xf32> -> vector<8x120xf32>
    %c0_72 = arith.constant 0 : index
    %c0_73 = arith.constant 0 : index
    %102 = vector.load %arg15[%c0_72, %c0_73] : memref<1x120xf32, #tpu.memory_space<vmem>>, vector<1x120xf32>
    %103 = vector.broadcast %102 : vector<1x120xf32> to vector<8x120xf32>
    %104 = arith.addf %101, %103 : vector<8x120xf32>
    %cst_74 = arith.constant 0.000000e+00 : f32
    %105 = vector.broadcast %cst_74 : f32 to vector<8x120xf32>
    %106 = arith.maximumf %104, %105 : vector<8x120xf32>
    %c0_75 = arith.constant 0 : index
    %c0_76 = arith.constant 0 : index
    %107 = vector.load %arg17[%c0_75, %c0_76] : memref<120x84xbf16, #tpu.memory_space<vmem>>, vector<120x84xbf16>
    %108 = arith.truncf %106 : vector<8x120xf32> to vector<8x120xbf16>
    %cst_77 = arith.constant dense<0.000000e+00> : vector<8x84xf32>
    %109 = tpu.matmul %108, %107, %cst_77 {dimension_numbers = #tpu.dot_dimension_numbers<[1], [0], [0], [1], [0, 0, 1, 1], [], []>} : vector<8x120xbf16>, vector<120x84xbf16>, vector<8x84xf32> -> vector<8x84xf32>
    %c0_78 = arith.constant 0 : index
    %c0_79 = arith.constant 0 : index
    %110 = vector.load %arg18[%c0_78, %c0_79] : memref<1x84xf32, #tpu.memory_space<vmem>>, vector<1x84xf32>
    %111 = vector.broadcast %110 : vector<1x84xf32> to vector<8x84xf32>
    %112 = arith.addf %109, %111 : vector<8x84xf32>
    %cst_80 = arith.constant 0.000000e+00 : f32
    %113 = vector.broadcast %cst_80 : f32 to vector<8x84xf32>
    %114 = arith.maximumf %112, %113 : vector<8x84xf32>
    %c0_81 = arith.constant 0 : index
    %c0_82 = arith.constant 0 : index
    %115 = vector.load %arg19[%c0_81, %c0_82] : memref<84x128xbf16, #tpu.memory_space<vmem>>, vector<84x128xbf16>
    %116 = arith.truncf %114 : vector<8x84xf32> to vector<8x84xbf16>
    %cst_83 = arith.constant dense<0.000000e+00> : vector<8x128xf32>
    %117 = tpu.matmul %116, %115, %cst_83 {dimension_numbers = #tpu.dot_dimension_numbers<[1], [0], [0], [1], [0, 0, 1, 1], [], []>} : vector<8x84xbf16>, vector<84x128xbf16>, vector<8x128xf32> -> vector<8x128xf32>
    %c0_84 = arith.constant 0 : index
    %c0_85 = arith.constant 0 : index
    %118 = vector.load %arg20[%c0_84, %c0_85] : memref<1x128xf32, #tpu.memory_space<vmem>>, vector<1x128xf32>
    %119 = vector.broadcast %118 : vector<1x128xf32> to vector<8x128xf32>
    %120 = arith.addf %117, %119 : vector<8x128xf32>
    %c0_86 = arith.constant 0 : index
    %c0_87 = arith.constant 0 : index
    %121 = vector.load %arg21[%c0_86, %c0_87] : memref<8x128xf32, #tpu.memory_space<vmem>>, vector<8x128xf32>
    tpu.vector_store %arg21[%c0_86, %c0_87], %120 {strides = array<i32>} : memref<8x128xf32, #tpu.memory_space<vmem>>, vector<8x128xf32>,
    return
  }
  func.func @transform_0(%arg0: i32) -> (i32, i32) {
    %c0_i32 = arith.constant 0 : i32
    %c0_i32_0 = arith.constant 0 : i32
    return %arg0, %c0_i32 : i32, i32
  }
  func.func @transform_1(%arg0: i32) -> (i32, i32) {
    %c0_i32 = arith.constant 0 : i32
    %c0_i32_0 = arith.constant 0 : i32
    %c0_i32_1 = arith.constant 0 : i32
    return %c0_i32, %c0_i32_0 : i32, i32
  }
  func.func @transform_2(%arg0: i32) -> (i32, i32) {
    %c0_i32 = arith.constant 0 : i32
    %c0_i32_0 = arith.constant 0 : i32
    %c0_i32_1 = arith.constant 0 : i32
    return %c0_i32, %c0_i32_0 : i32, i32
  }
  func.func @transform_3(%arg0: i32) -> (i32, i32) {
    %c0_i32 = arith.constant 0 : i32
    %c0_i32_0 = arith.constant 0 : i32
    %c0_i32_1 = arith.constant 0 : i32
    return %c0_i32, %c0_i32_0 : i32, i32
  }
  func.func @transform_4(%arg0: i32) -> (i32, i32) {
    %c0_i32 = arith.constant 0 : i32
    %c0_i32_0 = arith.constant 0 : i32
    %c0_i32_1 = arith.constant 0 : i32
    return %c0_i32, %c0_i32_0 : i32, i32
  }
  func.func @transform_5(%arg0: i32) -> (i32, i32) {
    %c0_i32 = arith.constant 0 : i32
    %c0_i32_0 = arith.constant 0 : i32
    %c0_i32_1 = arith.constant 0 : i32
    return %c0_i32, %c0_i32_0 : i32, i32
  }
  func.func @transform_6(%arg0: i32) -> (i32, i32) {
    %c0_i32 = arith.constant 0 : i32
    %c0_i32_0 = arith.constant 0 : i32
    %c0_i32_1 = arith.constant 0 : i32
    return %c0_i32, %c0_i32_0 : i32, i32
  }
  func.func @transform_7(%arg0: i32) -> (i32, i32, i32) {
    %c0_i32 = arith.constant 0 : i32
    %c0_i32_0 = arith.constant 0 : i32
    %c0_i32_1 = arith.constant 0 : i32
    %c0_i32_2 = arith.constant 0 : i32
    return %c0_i32, %c0_i32_0, %c0_i32_1 : i32, i32, i32
  }
  func.func @transform_8(%arg0: i32) -> (i32, i32) {
    %c0_i32 = arith.constant 0 : i32
    %c0_i32_0 = arith.constant 0 : i32
    %c0_i32_1 = arith.constant 0 : i32
    return %c0_i32, %c0_i32_0 : i32, i32
  }
  func.func @transform_9(%arg0: i32) -> (i32, i32) {
    %c0_i32 = arith.constant 0 : i32
    %c0_i32_0 = arith.constant 0 : i32
    %c0_i32_1 = arith.constant 0 : i32
    return %c0_i32, %c0_i32_0 : i32, i32
  }
  func.func @transform_10(%arg0: i32) -> (i32, i32) {
    %c0_i32 = arith.constant 0 : i32
    %c0_i32_0 = arith.constant 0 : i32
    %c0_i32_1 = arith.constant 0 : i32
    return %c0_i32, %c0_i32_0 : i32, i32
  }
  func.func @transform_11(%arg0: i32) -> (i32, i32) {
    %c0_i32 = arith.constant 0 : i32
    %c0_i32_0 = arith.constant 0 : i32
    %c0_i32_1 = arith.constant 0 : i32
    return %c0_i32, %c0_i32_0 : i32, i32
  }
  func.func @transform_12(%arg0: i32) -> (i32, i32) {
    %c0_i32 = arith.constant 0 : i32
    %c0_i32_0 = arith.constant 0 : i32
    %c0_i32_1 = arith.constant 0 : i32
    return %c0_i32, %c0_i32_0 : i32, i32
  }
  func.func @transform_13(%arg0: i32) -> (i32, i32, i32) {
    %c0_i32 = arith.constant 0 : i32
    %c0_i32_0 = arith.constant 0 : i32
    %c0_i32_1 = arith.constant 0 : i32
    %c0_i32_2 = arith.constant 0 : i32
    return %c0_i32, %c0_i32_0, %c0_i32_1 : i32, i32, i32
  }
  func.func @transform_14(%arg0: i32) -> (i32, i32) {
    %c0_i32 = arith.constant 0 : i32
    %c0_i32_0 = arith.constant 0 : i32
    %c0_i32_1 = arith.constant 0 : i32
    return %c0_i32, %c0_i32_0 : i32, i32
  }
  func.func @transform_15(%arg0: i32) -> (i32, i32) {
    %c0_i32 = arith.constant 0 : i32
    %c0_i32_0 = arith.constant 0 : i32
    %c0_i32_1 = arith.constant 0 : i32
    return %c0_i32, %c0_i32_0 : i32, i32
  }
  func.func @transform_16(%arg0: i32) -> (i32, i32) {
    %c0_i32 = arith.constant 0 : i32
    %c0_i32_0 = arith.constant 0 : i32
    %c0_i32_1 = arith.constant 0 : i32
    return %c0_i32, %c0_i32_0 : i32, i32
  }
  func.func @transform_17(%arg0: i32) -> (i32, i32) {
    %c0_i32 = arith.constant 0 : i32
    %c0_i32_0 = arith.constant 0 : i32
    %c0_i32_1 = arith.constant 0 : i32
    return %c0_i32, %c0_i32_0 : i32, i32
  }
  func.func @transform_18(%arg0: i32) -> (i32, i32) {
    %c0_i32 = arith.constant 0 : i32
    %c0_i32_0 = arith.constant 0 : i32
    %c0_i32_1 = arith.constant 0 : i32
    return %c0_i32, %c0_i32_0 : i32, i32
  }
  func.func @transform_19(%arg0: i32) -> (i32, i32) {
    %c0_i32 = arith.constant 0 : i32
    %c0_i32_0 = arith.constant 0 : i32
    %c0_i32_1 = arith.constant 0 : i32
    return %c0_i32, %c0_i32_0 : i32, i32
  }
  func.func @transform_20(%arg0: i32) -> (i32, i32) {
    %c0_i32 = arith.constant 0 : i32
    %c0_i32_0 = arith.constant 0 : i32
    return %arg0, %c0_i32 : i32, i32
  }
}

</mosaic_0001>

<bundles_post_ra>
// kernel: tpu_custom_call.1
= control target key start
LH: loop header
LB: loop body
LE: loop exit
PB: predicated region body
PF: predicated region fallthrough
CT: control target
= control target key end

     0   :  { %s9624_s0 = inlined_call_operand.vmem [shape: bf16[512,480], index: 0, kind: input, shape index: {}]   ;;  %s9625_s1 = inlined_call_operand.vmem [shape: bf16[480,168], index: 1, kind: input, shape index: {}]   ;;  %s9626_s2 = inlined_call_operand.vmem [shape: f32[1,168], index: 2, kind: input, shape index: {}]   ;;  %s9627_s3 = inlined_call_operand.vmem [shape: bf16[168,84], index: 3, kind: input, shape index: {}]   ;;  %s9628_s4 = inlined_call_operand.vmem [shape: bf16[168,84], index: 4, kind: input, shape index: {}]   ;;  %s9629_s5 = inlined_call_operand.vmem [shape: bf16[136,256], index: 5, kind: input, shape index: {}]   ;;  %s9630_s6 = inlined_call_operand.vmem [shape: bf16[136,256], index: 6, kind: input, shape index: {}]   ;;  %s9631_s7 = inlined_call_operand.vmem [shape: bf16[5,84,160], index: 7, kind: input, shape index: {}]   ;;  %s9632_s8 = inlined_call_operand.vmem [shape: f32[1,160], index: 8, kind: input, shape index: {}]   ;;  %s9633_s9 = inlined_call_operand.vmem [shape: bf16[160,80], index: 9, kind: input, shape index: {}]   ;;  %s9634_s10 = inlined_call_operand.vmem [shape: bf16[160,80], index: 10, kind: input, shape index: {}]   ;;  %s9635_s11 = inlined_call_operand.vmem [shape: bf16[72,128], index: 11, kind: input, shape index: {}]   ;;  %s9636_s12 = inlined_call_operand.vmem [shape: bf16[72,128], index: 12, kind: input, shape index: {}]   ;;  %s9637_s13 = inlined_call_operand.vmem [shape: bf16[5,80,120], index: 13, kind: input, shape index: {}]   ;;  %s9638_s14 = inlined_call_operand.vmem [shape: f32[1,120], index: 14, kind: input, shape index: {}]   ;;  %s9639_s15 = inlined_call_operand.vmem [shape: bf16[8,64], index: 15, kind: input, shape index: {}]   ;;  %s9640_s16 = inlined_call_operand.vmem [shape: bf16[120,84], index: 16, kind: input, shape index: {}]   ;;  %s9641_s17 = inlined_call_operand.vmem [shape: f32[1,84], index: 17, kind: input, shape index: {}]   ;;  %s9642_s18 = inlined_call_operand.vmem [shape: bf16[84,128], index: 18, kind: input, shape index: {}]   ;;  %s9643_s19 = inlined_call_operand.vmem [shape: f32[1,128], index: 19, kind: input, shape index: {}]   ;;  %s9644_s20 = inlined_call_operand.hbm [shape: f32[16,128], index: 20, kind: output, shape index: {}]  }
   0x1   :  { %9656 = sst [smem:[#allocation43_spill]] %s9624_s0 }
   0x2   :  { %9657 = sst [smem:[#allocation44_spill]] %s9625_s1 }
   0x3   :  { %9658 = sst [smem:[#allocation45_spill]] %s9626_s2 }
   0x4   :  { %9659 = sst [smem:[#allocation46_spill]] %s9627_s3 }
   0x5   :  { %9660 = sst [smem:[#allocation47_spill]] %s9628_s4 }
   0x6   :  { %9661 = sst [smem:[#allocation48_spill]] %s9629_s5 }
   0x7   :  { %9662 = sst [smem:[#allocation49_spill]] %s9644_s20 }
   0x8   :  { %25 = vsyncpa [#allocation3], 0 }
   0x9   :  { %27 = vsyncpa [#allocation3 + $0x1], 0  ;;  %s7638_s1 = smov 0   ;;  %s7640_s22 = smov 0  }
   0xa   :  { %s7642_s23 = smov 0   ;;  %s7644_s24 = smov 0  }
   0xb LB: > { %9663 = sst [smem:[#allocation5_spill]] %s7515_s1  ;;  %s7659_s2 = sadd.s32 4294967295, %s7527_s24   ;;  %s7527_s24 = sphi %s7644_s24, %s9746_s24   ;;  %s7523_s23 = sphi %s7642_s23, %s9748_s23   ;;  %s7519_s22 = sphi %s7640_s22, %s9750_s22   ;;  %s7515_s1 = sphi %s7638_s1, %s9749_s1  }
   0xc   : > { %9664 = sst [smem:[#allocation6_spill]] %s7523_s23  ;;  %s6026_s25 = sadd.s32 4294967294, %s7527_s24  }
   0xd   : > { %9665 = sst [smem:[#allocation7_spill]] %s7527_s24  ;;  %s7663_s3 = sadd.s32 1, %s7527_s24  }
   0xe   : > { %9666 = sst [smem:[#allocation8_spill]] %s7663_s3  ;;  %s465_s26 = sadd.s32 1, %s7523_s23 }
   0xf   : > { %s462_s27 = ssub.s32 %s7527_s24, %s7663_s3  ;;  %p475_p0 = scmp.ne.s32.totalorder %s7523_s23, %s7519_s22 }
  0x10   : > { %p463_p1 = scmp.eq.s32.totalorder %s462_s27, 0  ;;  %p476_p2 = scmp.eq.s32.totalorder %s7659_s2, 1 }
  0x11   : > { %p481_p3 = scmp.ne.s32.totalorder %s7519_s22, %s7515_s1  ;;  %p482_p4 = scmp.eq.s32.totalorder %s6026_s25, 1 }
  0x12   : > { %s7674_s28 = scalar_select %p463_p1, %s7523_s23, %s465_s26  }
  0x13   : > { %p7676_p5 = por %p476_p2, %p475_p0  ;;  %p7680_p6 = por %p482_p4, %p481_p3 }
  0x14   : > { %9667 = sst [smem:[#allocation9_spill]] %s7674_s28  ;;  %p6029_p7 = scmp.ge.s32.totalorder %s7527_s24, 1 }
  0x15   : > { %s9669_s29 = scalar_select %p7680_p6, 1, 0 }
  0x16   : > { %p567_p8 = scmp.lt.s32.totalorder %s7527_s24, 3 }
  0x17   : > { %9670 = sst [smem:[#allocation10_spill]] %s9669_s29 }
  0x18   : > { %p568_p9 = pnand %p6029_p7, %p567_p8 }
  0x1a   : > { %571 = sbr.rel (%p568_p9) target bundleno = 2625 (0xa41), region = 100 }
  0x1f   : > { %s9671_s21 = sld [smem:[#allocation44_spill]]  ;;  %s6031_s27 = sshll.u32 %s7659_s2, 5  ;;  %vm1374_vm0 = vcmask 785408   ;;  %vm2038_vm1 = vcmask 1043456   ;;  %vm1989_vm2 = vcmask 326656   ;;  %vm3032_vm3 = vcmask 1041408  }
  0x20   : > { %p627_p10 = scmp.lt.s32.totalorder %s6031_s27, 63  ;;  %s9672_s20 = sld [smem:[#allocation43_spill]]  ;;  %vm3007_vm4 = vcmask 687104   ;;  %vm4060_vm5 = vcmask 1045504   ;;  %vm3208_vm6 = vsmask.f32 7424 }
  0x21   : > { %s9674_s24 = sld [smem:[#allocation47_spill]]  ;;  %vm3520_vm7 = vcmask 1046528   ;;  %vm3780_vm8 = vsmask.f32 6400  ;;  %vm4436_vm9 = vcmask 261120   ;;  %vm7531_vm10 = vmmov 0  }
  0x22   : > { %s9752_s27 = smov (!%p627_p10, %s6031_s27), 63  ;;  %s9676_s25 = sld [smem:[#allocation45_spill]]  ;;  %vm5078_vm11 = vcmask 654336   ;;  %vm5693_vm12 = vcmask 523264   ;;  %vm5806_vm13 = vcmask 982016  }
  0x23   : > { %s6568_s28 = sshll.u32 %s9752_s27, 4  ;;  %s9673_s27 = sld [smem:[#allocation46_spill]] }
  0x24   : > { %s9677_s5 = sld [smem:[#allocation48_spill]] }
  0x25   : > { %v7053_v0 = vld [vmem:[%s9671_s21 + $0x74] ss:$8 sps:$4 sm:$0xff]   ;;  %v7055_v1 = vld [vmem:[%s9671_s21 + $0x70] ss:$8 sps:$4 sm:$0xff]   ;;  %v7056_v2 = vld [vmem:[%s9671_s21 + $0x64] ss:$8 sps:$4 sm:$0xff]  }
  0x26   : > { %1423 = vmatprep.subr.bf16.mxu0 %v7053_v0  ;;  %v7058_v3 = vld [vmem:[%s9671_s21 + $0x174] ss:$8 sps:$4 sm:$0xff]   ;;  %v7060_v4 = vld [vmem:[%s9671_s21 + $0x60] ss:$8 sps:$4 sm:$0xff]   ;;  %v7061_v5 = vld [vmem:[%s9671_s21 + $0x170] ss:$8 sps:$4 sm:$0xff]   ;;  %s7810_s26 = scalar_lea.vmem %s9672_s20, %s6568_s28 }
  0x27   : > { %1424 = vmatpush1.bf16.msra.mxu0 %v7055_v1  ;;  %v7062_v6 = vld [vmem:[%s9671_s21 + $0x54] ss:$8 sps:$4 sm:$0xff]   ;;  %1616 = vmatprep.subr.bf16.mxu1 %v7058_v3  ;;  %v7064_v7 = vld [vmem:[%s9671_s21 + $0x164] ss:$8 sps:$4 sm:$0xff]   ;;  %v7067_v8 = vld [vmem:[%s9671_s21 + $0x160] ss:$8 sps:$4 sm:$0xff]   ;;  %s9675_s3 = smov %s9674_s24 }
  0x28   : > { %1425 = vmatprep.subr.bf16.mxu0 %v7056_v2  ;;  %1617 = vmatpush1.bf16.msra.mxu1 %v7061_v5  ;;  %v7066_v9 = vld [vmem:[%s9671_s21 + $0x50] ss:$8 sps:$4 sm:$0xff]   ;;  %v7068_v10 = vld [vmem:[%s9671_s21 + $0x44] ss:$8 sps:$4 sm:$0xff]   ;;  %v7070_v11 = vld [vmem:[%s9671_s21 + $0x154] ss:$8 sps:$4 sm:$0xff]  }
  0x29   : > { %1618 = vmatprep.subr.bf16.mxu1 %v7064_v7  ;;  %v7073_v12 = vld [vmem:[%s9671_s21 + $0x150] ss:$8 sps:$4 sm:$0xff]   ;;  %v7072_v13 = vld [vmem:[%s9671_s21 + $0x40] ss:$8 sps:$4 sm:$0xff]   ;;  %v7076_v14 = vld [vmem:[%s9671_s21 + $0x144] ss:$8 sps:$4 sm:$0xff]  }
  0x2a   : > { %v7074_v15 = vld [vmem:[%s9671_s21 + $0x34] ss:$8 sps:$4 sm:$0xff]   ;;  %v7078_v16 = vld [vmem:[%s9671_s21 + $0x30] ss:$8 sps:$4 sm:$0xff]   ;;  %v7079_v17 = vld [vmem:[%s9671_s21 + $0x140] ss:$8 sps:$4 sm:$0xff]  }
  0x2b   : > { %1426 = vmatpush1.bf16.msra.mxu0 %v7060_v4  ;;  %v7082_v18 = vld [vmem:[%s9671_s21 + $0x134] ss:$8 sps:$4 sm:$0xff]   ;;  %v7080_v19 = vld [vmem:[%s9671_s21 + $0x24] ss:$8 sps:$4 sm:$0xff]   ;;  %v7085_v20 = vld [vmem:[%s9671_s21 + $0x130] ss:$8 sps:$4 sm:$0xff]  }
  0x2c   : > { %1427 = vmatprep.subr.bf16.mxu0 %v7062_v6  ;;  %1619 = vmatpush1.bf16.msra.mxu1 %v7067_v8  ;;  %v7084_v21 = vld [vmem:[%s9671_s21 + $0x20] ss:$8 sps:$4 sm:$0xff]   ;;  %v7088_v22 = vld [vmem:[%s9671_s21 + $0x124] ss:$8 sps:$4 sm:$0xff]   ;;  %v7086_v23 = vld [vmem:[%s9671_s21 + $0x14] ss:$8 sps:$4 sm:$0xff]  }
  0x2d   : > { %1620 = vmatprep.subr.bf16.mxu1 %v7070_v11  ;;  %v7090_v24 = vld [vmem:[%s9671_s21 + $0x10] ss:$8 sps:$4 sm:$0xff]   ;;  %v7091_v25 = vld [vmem:[%s9671_s21 + $0x120] ss:$8 sps:$4 sm:$0xff]   ;;  %v7094_v26 = vld [vmem:[%s9671_s21 + $0x114] ss:$8 sps:$4 sm:$0xff]  }
  0x2e   : > { %v7092_v27 = vld [vmem:[%s9671_s21 + $0x4] ss:$8 sps:$4 sm:$0xff]   ;;  %v7097_v28 = vld [vmem:[%s9671_s21 + $0x110] ss:$8 sps:$4 sm:$0xff]   ;;  %v7096_v29 = vld [vmem:[%s9671_s21] ss:$8 sps:$4 sm:$0xff]  }
  0x2f   : > { %1428 = vmatpush1.bf16.msra.mxu0 %v7066_v9  ;;  %v7100_v30 = vld [vmem:[%s9671_s21 + $0x104] ss:$8 sps:$4 sm:$0xff]   ;;  %v7098_v31 = vld [vmem:[%s9671_s21 + $0xf4] ss:$8 sps:$4 sm:$0xff]   ;;  %v7102_v32 = vld [vmem:[%s9671_s21 + $0xf0] ss:$8 sps:$4 sm:$0xff]  }
  0x30   : > { %1429 = vmatprep.subr.bf16.mxu0 %v7068_v10  ;;  %1621 = vmatpush1.bf16.msra.mxu1 %v7073_v12  ;;  %v7103_v33 = vld [vmem:[%s9671_s21 + $0x100] ss:$8 sps:$4 sm:$0xff]   ;;  %v7106_v34 = vld [vmem:[%s9671_s21 + $0x1d4] ss:$8 sps:$4 sm:$0xff]   ;;  %v7104_v35 = vld [vmem:[%s9671_s21 + $0xe4] ss:$8 sps:$4 sm:$0xff]  }
  0x31   : > { %1622 = vmatprep.subr.bf16.mxu1 %v7076_v14  ;;  %v7109_v36 = vld [vmem:[%s9671_s21 + $0x1d0] ss:$8 sps:$4 sm:$0xff]   ;;  %v7108_v37 = vld [vmem:[%s9671_s21 + $0xe0] ss:$8 sps:$4 sm:$0xff]   ;;  %v7112_v38 = vld [vmem:[%s9671_s21 + $0x1c4] ss:$8 sps:$4 sm:$0xff]  }
  0x32   : > { %v7110_v39 = vld [vmem:[%s9671_s21 + $0xd4] ss:$8 sps:$4 sm:$0xff]   ;;  %v7114_v40 = vld [vmem:[%s9671_s21 + $0xd0] ss:$8 sps:$4 sm:$0xff]   ;;  %v7115_v41 = vld [vmem:[%s9671_s21 + $0x1c0] ss:$8 sps:$4 sm:$0xff]  }
  0x33   : > { %1430 = vmatpush1.bf16.msra.mxu0 %v7072_v13  ;;  %v7118_v42 = vld [vmem:[%s9671_s21 + $0x1b4] ss:$8 sps:$4 sm:$0xff]   ;;  %v7116_v44 = vld [vmem:[%s9671_s21 + $0xc4] ss:$8 sps:$4 sm:$0xff]   ;;  %v7121_v45 = vld [vmem:[%s9671_s21 + $0x1b0] ss:$8 sps:$4 sm:$0xff]  }
  0x34   : > { %1431 = vmatprep.subr.bf16.mxu0 %v7074_v15  ;;  %1623 = vmatpush1.bf16.msra.mxu1 %v7079_v17  ;;  %v7142_v43 = vld [vmem:[%s7810_s26 + $0xc] ss:$16 sps:$4 sm:$0xff]   ;;  %v7148_v46 = vld [vmem:[%s7810_s26 + $0x4] ss:$16 sps:$4 sm:$0xff]   ;;  %v7120_v47 = vld [vmem:[%s9671_s21 + $0xc0] ss:$8 sps:$4 sm:$0xff]  }
  0x35   : > { %1624 = vmatprep.subr.bf16.mxu1 %v7082_v18  ;;  %6158 = vmatprep.mubr.msk.bf16.mxu1 %vm1374_vm0, %v7142_v43  ;;  %v7124_v48 = vld [vmem:[%s9671_s21 + $0x1a4] ss:$8 sps:$4 sm:$0xff]   ;;  %v7122_v49 = vld [vmem:[%s9671_s21 + $0xb4] ss:$8 sps:$4 sm:$0xff]   ;;  %v7127_v50 = vld [vmem:[%s9671_s21 + $0x1a0] ss:$8 sps:$4 sm:$0xff]  }
  0x36   : > { %1455 = vmatprep.mubr.bf16.mxu0 %v7148_v46  ;;  %v7126_v51 = vld [vmem:[%s9671_s21 + $0xb0] ss:$8 sps:$4 sm:$0xff]   ;;  %v7130_v52 = vld [vmem:[%s9671_s21 + $0x194] ss:$8 sps:$4 sm:$0xff]   ;;  %v7128_v53 = vld [vmem:[%s9671_s21 + $0xa4] ss:$8 sps:$4 sm:$0xff]  }
  0x37   : > { %1432 = vmatpush1.bf16.msra.mxu0 %v7078_v16  ;;  %v7133_v54 = vld [vmem:[%s9671_s21 + $0x190] ss:$8 sps:$4 sm:$0xff]   ;;  %v7132_v55 = vld [vmem:[%s9671_s21 + $0xa0] ss:$8 sps:$4 sm:$0xff]   ;;  %v7136_v56 = vld [vmem:[%s9671_s21 + $0x184] ss:$8 sps:$4 sm:$0xff]  }
  0x38   : > { %1433 = vmatprep.subr.bf16.mxu0 %v7080_v19  ;;  %1625 = vmatpush1.bf16.msra.mxu1 %v7085_v20  ;;  %v7134_v57 = vld [vmem:[%s9671_s21 + $0x94] ss:$8 sps:$4 sm:$0xff]   ;;  %v7139_v58 = vld [vmem:[%s9671_s21 + $0x180] ss:$8 sps:$4 sm:$0xff]   ;;  %v7138_v59 = vld [vmem:[%s9671_s21 + $0x90] ss:$8 sps:$4 sm:$0xff]  }
  0x39   : > { %1626 = vmatprep.subr.bf16.mxu1 %v7088_v22  ;;  %v7143_v60 = vld [vmem:[%s9671_s21 + $0x84] ss:$8 sps:$4 sm:$0xff]   ;;  %v7140_v61 = vld [vmem:[%s7810_s26 + $0x8] ss:$16 sps:$4 sm:$0xff]   ;;  %v7529_v0 = vmov 0   ;;  %v7241_v17 = vld [vmem:[%s9673_s27 + $0x30] sm:$0xff]  }
  0x3a   : > { %v7149_v62 = vld [vmem:[%s7810_s26 + $0x2c] ss:$16 sps:$4 sm:$0xff]   ;;  %v7145_v63 = vld [vmem:[%s9671_s21 + $0x80] ss:$8 sps:$4 sm:$0xff]   ;;  %v7152_v2 = vld [vmem:[%s7810_s26 + $0x24] ss:$16 sps:$4 sm:$0xff]  }
  0x3b   : > { %1434 = vmatpush1.bf16.msra.mxu0 %v7084_v21  ;;  %v7146_v1 = vld [vmem:[%s7810_s26] ss:$16 sps:$4 sm:$0xff]   ;;  %v7151_v3 = vld [vmem:[%s7810_s26 + $0x28] ss:$16 sps:$4 sm:$0xff]   ;;  %v7155_v4 = vld [vmem:[%s7810_s26 + $0x4c] ss:$16 sps:$4 sm:$0xff]  }
  0x3c   : > { %1435 = vmatprep.subr.bf16.mxu0 %v7086_v23  ;;  %1627 = vmatpush1.bf16.msra.mxu1 %v7091_v25  ;;  %v7154_v5 = vld [vmem:[%s7810_s26 + $0x20] ss:$16 sps:$4 sm:$0xff]   ;;  %v7158_v6 = vld [vmem:[%s7810_s26 + $0x44] ss:$16 sps:$4 sm:$0xff]   ;;  %v7157_v7 = vld [vmem:[%s7810_s26 + $0x48] ss:$16 sps:$4 sm:$0xff]  }
  0x3d   : > { %1628 = vmatprep.subr.bf16.mxu1 %v7094_v26  ;;  %v7161_v8 = vld [vmem:[%s7810_s26 + $0x6c] ss:$16 sps:$4 sm:$0xff]   ;;  %v7160_v9 = vld [vmem:[%s7810_s26 + $0x40] ss:$16 sps:$4 sm:$0xff]   ;;  %v7164_v10 = vld [vmem:[%s7810_s26 + $0x64] ss:$16 sps:$4 sm:$0xff]  }
  0x3e   : > { %v7163_v11 = vld [vmem:[%s7810_s26 + $0x68] ss:$16 sps:$4 sm:$0xff]   ;;  %v7167_v12 = vld [vmem:[%s7810_s26 + $0x8c] ss:$16 sps:$4 sm:$0xff]   ;;  %v7166_v14 = vld [vmem:[%s7810_s26 + $0x60] ss:$16 sps:$4 sm:$0xff]  }
  0x3f   : > { %1436 = vmatpush1.bf16.msra.mxu0 %v7090_v24  ;;  %v7239_v13 = vld [vmem:[%s9673_s27 + $0x38] sm:$0xff]   ;;  %v7170_v16 = vld [vmem:[%s7810_s26 + $0x84] ss:$16 sps:$4 sm:$0xff]   ;;  %v7243_v21 = vld [vmem:[%s9673_s27 + $0x28] sm:$0xff]   ;;  %s623_s20 = sand.u32 1, %s7519_s22   ;;  %s9742_s29 = sld [smem:[#allocation49_spill]] }
  0x40   : > { %1437 = vmatprep.subr.bf16.mxu0 %v7092_v27  ;;  %1629 = vmatpush1.bf16.msra.mxu1 %v7097_v28  ;;  %v7240_v15 = vld [vmem:[%s9674_s24 + $0x38] sm:$0xff]   ;;  %v7242_v18 = vld [vmem:[%s9675_s3 + $0x30] sm:$0xff]   ;;  %v7244_v22 = vld [vmem:[%s9675_s3 + $0x28] sm:$0xff]   ;;  %s6030_s28 = sshll.u32 %s623_s20, 3  ;;  %s5954_s0 = scalar_lea.sflag [#allocation3], %s623_s20 }
  0x41   : > { %1630 = vmatprep.subr.bf16.mxu1 %v7100_v30  ;;  %v7169_v19 = vld [vmem:[%s7810_s26 + $0x88] ss:$16 sps:$4 sm:$0xff]   ;;  %v7173_v20 = vld [vmem:[%s7810_s26 + $0xac] ss:$16 sps:$4 sm:$0xff]   ;;  %v7172_v23 = vld [vmem:[%s7810_s26 + $0x80] ss:$16 sps:$4 sm:$0xff]  }
  0x42   : > { %v7176_v24 = vld [vmem:[%s7810_s26 + $0xa4] ss:$16 sps:$4 sm:$0xff]   ;;  %v7175_v27 = vld [vmem:[%s7810_s26 + $0xa8] ss:$16 sps:$4 sm:$0xff]   ;;  %v7179_v28 = vld [vmem:[%s7810_s26 + $0xcc] ss:$16 sps:$4 sm:$0xff]  }
  0x43   : > { %1438 = vmatpush1.bf16.msra.mxu0 %v7096_v29  ;;  %v7245_v25 = vld [vmem:[%s9673_s27 + $0x20] sm:$0xff]   ;;  %v7247_v29 = vld [vmem:[%s9673_s27 + $0x18] sm:$0xff]   ;;  %v7251_v46 = vld [vmem:[%s9673_s27 + $0x8] sm:$0xff]   ;;  %s625_s23 = scalar_lea.vmem [#allocation2], %s6030_s28 }
  0x44   : > { %1439 = vmatprep.subr.bf16.mxu0 %v7098_v31  ;;  %1631 = vmatpush1.bf16.msra.mxu1 %v7103_v33  ;;  %v7246_v26 = vld [vmem:[%s9675_s3 + $0x20] sm:$0xff]   ;;  %v7248_v30 = vld [vmem:[%s9675_s3 + $0x18] sm:$0xff]   ;;  %s5967_s24 = sshll.u32 %s625_s23, 4  ;;  %s9585_s24 = int_to_ptr.vmem [resolvable:$true] %s5967_s24 }
  0x45   : > { %1636 = vmatprep.subr.bf16.mxu1 %v7106_v34  ;;  %v7178_v31 = vld [vmem:[%s7810_s26 + $0xa0] ss:$16 sps:$4 sm:$0xff]   ;;  %v7182_v33 = vld [vmem:[%s7810_s26 + $0xc4] ss:$16 sps:$4 sm:$0xff]   ;;  %v7193_v43 = vld [vmem:[%s7810_s26 + $0x108] ss:$16 sps:$4 sm:$0xff]  }
  0x46   : > { %v7250_v34 = vld [vmem:[%s9675_s3 + $0x10] sm:$0xff]  }
  0x47   : > { %1440 = vmatpush2.bf16.msra.mxu0 %v7102_v32  ;;  %v7249_v32 = vld [vmem:[%s9673_s27 + $0x10] sm:$0xff]  }
  0x48   : > { %1441 = vmatprep.subr.bf16.mxu0 %v7104_v35  ;;  %1637 = vmatpush2.bf16.msra.mxu1 %v7109_v36  ;;  %v7181_v35 = vld [vmem:[%s7810_s26 + $0xc8] ss:$16 sps:$4 sm:$0xff]   ;;  %v7185_v36 = vld [vmem:[%s7810_s26 + $0xec] ss:$16 sps:$4 sm:$0xff]  }
  0x49   : > { %1638 = vmatprep.subr.bf16.mxu1 %v7112_v38  ;;  %v7188_v38 = vld [vmem:[%s7810_s26 + $0xe4] ss:$16 sps:$4 sm:$0xff]  }
  0x4b   : > { %1442 = vmatpush2.bf16.msra.mxu0 %v7108_v37  ;;  %v7184_v37 = vld [vmem:[%s7810_s26 + $0xc0] ss:$16 sps:$4 sm:$0xff]  }
  0x4c   : > { %1443 = vmatprep.subr.bf16.mxu0 %v7110_v39  ;;  %1639 = vmatpush2.bf16.msra.mxu1 %v7115_v41  ;;  %v7187_v39 = vld [vmem:[%s7810_s26 + $0xe8] ss:$16 sps:$4 sm:$0xff]   ;;  %v7190_v41 = vld [vmem:[%s7810_s26 + $0xe0] ss:$16 sps:$4 sm:$0xff]  }
  0x4d   : > { %1640 = vmatprep.subr.bf16.mxu1 %v7118_v42  ;;  %v7194_v42 = vld [vmem:[%s7810_s26 + $0x104] ss:$16 sps:$4 sm:$0xff]  }
  0x4f   : > { %1444 = vmatpush2.bf16.msra.mxu0 %v7114_v40  ;;  %v7191_v40 = vld [vmem:[%s7810_s26 + $0x10c] ss:$16 sps:$4 sm:$0xff]  }
  0x50   : > { %1445 = vmatprep.subr.bf16.mxu0 %v7116_v44  ;;  %1641 = vmatpush2.bf16.msra.mxu1 %v7121_v45  ;;  %v7197_v44 = vld [vmem:[%s7810_s26 + $0x12c] ss:$16 sps:$4 sm:$0xff]   ;;  %v7196_v45 = vld [vmem:[%s7810_s26 + $0x100] ss:$16 sps:$4 sm:$0xff]  }
  0x51   : > { %1642 = vmatprep.subr.bf16.mxu1 %v7124_v48  ;;  %v7199_v48 = vld [vmem:[%s7810_s26 + $0x128] ss:$16 sps:$4 sm:$0xff]  }
  0x53   : > { %1446 = vmatpush2.bf16.msra.mxu0 %v7120_v47  ;;  %v7252_v47 = vld [vmem:[%s9675_s3 + $0x8] sm:$0xff]  }
  0x54   : > { %1447 = vmatprep.subr.bf16.mxu0 %v7122_v49  ;;  %1643 = vmatpush2.bf16.msra.mxu1 %v7127_v50  ;;  %v7200_v49 = vld [vmem:[%s7810_s26 + $0x124] ss:$16 sps:$4 sm:$0xff]   ;;  %v7203_v50 = vld [vmem:[%s7810_s26 + $0x14c] ss:$16 sps:$4 sm:$0xff]  }
  0x55   : > { %1644 = vmatprep.subr.bf16.mxu1 %v7130_v52  ;;  %v7254_v52 = vld [vmem:[%s9675_s3] sm:$0xff]  }
  0x57   : > { %1448 = vmatpush2.bf16.msra.mxu0 %v7126_v51  ;;  %v7253_v51 = vld [vmem:[%s9673_s27] sm:$0xff]  }
  0x58   : > { %1449 = vmatprep.subr.bf16.mxu0 %v7128_v53  ;;  %1645 = vmatpush2.bf16.msra.mxu1 %v7133_v54  ;;  %v7202_v53 = vld [vmem:[%s7810_s26 + $0x120] ss:$16 sps:$4 sm:$0xff]  }
  0x59   : > { %1646 = vmatprep.subr.bf16.mxu1 %v7136_v56  ;;  %v7255_v54 = vld [vmem:[%s9673_s27 + $0x50] ss:$0 sps:$4 sm:$0xff]   ;;  %v7206_v56 = vld [vmem:[%s7810_s26 + $0x144] ss:$16 sps:$4 sm:$0xff]  }
  0x5b   : > { %1450 = vmatpush2.bf16.msra.mxu0 %v7132_v55  ;;  %v7256_v55 = vld [vmem:[%s9675_s3 + $0x50] ss:$0 sps:$4 sm:$0xff]  }
  0x5c   : > { %1451 = vmatprep.subr.bf16.mxu0 %v7134_v57  ;;  %1647 = vmatpush2.bf16.msra.mxu1 %v7139_v58  ;;  %v2040_v57 = vsel %vm2038_vm1, %v7255_v54, 0  ;;  %v2288_v58 = vsel %vm2038_vm1, %v7256_v55, 0 }
  0x5d   : > { %2042 = vmatprep.subr.bf16.mxu1 %v7529_v0 }
  0x5f   : > { %1452 = vmatpush2.bf16.msra.mxu0 %v7138_v59  ;;  %1649 = vmatmul.mubr.bf16.vlgmr.msra.gmra.mxu1 %v7140_v61  ;;  %v7205_v59 = vld [vmem:[%s7810_s26 + $0x148] ss:$16 sps:$4 sm:$0xff]  }
  0x60   : > { %1453 = vmatprep.subr.bf16.mxu0 %v7143_v60  ;;  %6159 = vmatprep.mubr.msk.bf16.mxu1 %vm1374_vm0, %v7149_v62  ;;  %v7209_v60 = vld [vmem:[%s7810_s26 + $0x16c] ss:$16 sps:$4 sm:$0xff]  }
  0x61   : > { %2043 = vmatpush1.bf16.msra.mxu1 %v7239_v13  ;;  %v7257_v61 = vld [vmem:[%s9673_s27 + $0x48] sm:$0xff]  }
  0x62   : > { %2044 = vmatprep.subr.bf16.mxu1 %v7529_v0  ;;  %v7258_v62 = vld [vmem:[%s9675_s3 + $0x48] sm:$0xff]  }
  0x63   : > { %1454 = vmatpush2.bf16.msra.mxu0 %v7145_v63  ;;  %v7208_v63 = vld [vmem:[%s7810_s26 + $0x140] ss:$16 sps:$4 sm:$0xff]   ;;  %v7227_v13 = vld [vmem:[%s7810_s26 + $0x1cc] ss:$16 sps:$4 sm:$0xff]  }
  0x64   : > { %2290 = vmatprep.subr.bf16.mxu0 %v7529_v0 }
  0x65   : > { %2045 = vmatpush1.bf16.msra.mxu1 %v7241_v17  ;;  %v7233_v17 = vld [vmem:[%s7810_s26 + $0x1ec] ss:$16 sps:$4 sm:$0xff]  }
  0x66   : > { %1456 = vmatmul.mubr.bf16.vlgmr.msra.gmra.mxu0 %v7146_v1  ;;  %2046 = vmatprep.subr.bf16.mxu1 %v7529_v0  ;;  %v7212_v1 = vld [vmem:[%s7810_s26 + $0x164] ss:$16 sps:$4 sm:$0xff]  }
  0x67   : > { %1465 = vmatprep.mubr.bf16.mxu0 %v7152_v2  ;;  %1659 = vmatmul.mubr.bf16.gmra.mxu1 %v7151_v3  ;;  %v7259_v2 = vld [vmem:[%s9673_s27 + $0x40] sm:$0xff]  }
  0x68   : > { %6160 = vmatprep.mubr.msk.bf16.mxu1 %vm1374_vm0, %v7155_v4  ;;  %2291 = vmatpush1.bf16.msra.mxu0 %v7240_v15  ;;  %v7260_v3 = vld [vmem:[%s9675_s3 + $0x40] sm:$0xff]   ;;  %v7211_v4 = vld [vmem:[%s7810_s26 + $0x168] ss:$16 sps:$4 sm:$0xff]  }
  0x69   : > { %2292 = vmatprep.subr.bf16.mxu0 %v7529_v0  ;;  %2047 = vmatpush1.bf16.msra.mxu1 %v7243_v21  ;;  %v7230_v15 = vld [vmem:[%s7810_s26 + $0x1c4] ss:$16 sps:$4 sm:$0xff]   ;;  %v7238_v21 = vld [vmem:[%s7810_s26 + $0x1e0] ss:$16 sps:$4 sm:$0xff]  }
  0x6a   : > { %2048 = vmatprep.subr.bf16.mxu1 %v7529_v0 }
  0x6c   : > { %2293 = vmatpush1.bf16.msra.mxu0 %v7242_v18  ;;  %v7232_v18 = vld [vmem:[%s7810_s26 + $0x1c0] ss:$16 sps:$4 sm:$0xff]  }
  0x6d   : > { %2294 = vmatprep.subr.bf16.mxu0 %v7529_v0  ;;  %2049 = vmatpush1.bf16.msra.mxu1 %v7245_v25 }
  0x6e   : > { %1466 = vmatmul.mubr.bf16.gmra.mxu0 %v7154_v5  ;;  %2050 = vmatprep.subr.bf16.mxu1 %v7529_v0  ;;  %v7215_v5 = vld [vmem:[%s7810_s26 + $0x18c] ss:$16 sps:$4 sm:$0xff]  }
  0x6f   : > { %1475 = vmatprep.mubr.bf16.mxu0 %v7158_v6  ;;  %1669 = vmatmul.mubr.bf16.gmra.mxu1 %v7157_v7  ;;  %v7214_v6 = vld [vmem:[%s7810_s26 + $0x160] ss:$16 sps:$4 sm:$0xff]   ;;  %v7218_v7 = vld [vmem:[%s7810_s26 + $0x184] ss:$16 sps:$4 sm:$0xff]  }
  0x70   : > { %6161 = vmatprep.mubr.msk.bf16.mxu1 %vm1374_vm0, %v7161_v8  ;;  %2295 = vmatpush1.bf16.msra.mxu0 %v7244_v22  ;;  %v7217_v8 = vld [vmem:[%s7810_s26 + $0x188] ss:$16 sps:$4 sm:$0xff]   ;;  %v760_v22 = vlaneseq }
  0x71   : > { %2296 = vmatprep.subr.bf16.mxu0 %v7529_v0  ;;  %2051 = vmatpush1.bf16.msra.mxu1 %v7247_v29 }
  0x72   : > { %2052 = vmatprep.subr.bf16.mxu1 %v7529_v0 }
  0x74   : > { %2297 = vmatpush1.bf16.msra.mxu0 %v7246_v26 }
  0x75   : > { %2298 = vmatprep.subr.bf16.mxu0 %v7529_v0  ;;  %2053 = vmatpush1.bf16.msra.mxu1 %v7249_v32 }
  0x76   : > { %1476 = vmatmul.mubr.bf16.gmra.mxu0 %v7160_v9  ;;  %2054 = vmatprep.subr.bf16.mxu1 %v7529_v0  ;;  %v7221_v9 = vld [vmem:[%s7810_s26 + $0x1ac] ss:$16 sps:$4 sm:$0xff]  }
  0x77   : > { %1485 = vmatprep.mubr.bf16.mxu0 %v7164_v10  ;;  %1679 = vmatmul.mubr.bf16.gmra.mxu1 %v7163_v11  ;;  %v7220_v10 = vld [vmem:[%s7810_s26 + $0x180] ss:$16 sps:$4 sm:$0xff]   ;;  %v7224_v11 = vld [vmem:[%s7810_s26 + $0x1a4] ss:$16 sps:$4 sm:$0xff]  }
  0x78   : > { %6162 = vmatprep.mubr.msk.bf16.mxu1 %vm1374_vm0, %v7167_v12  ;;  %2299 = vmatpush1.bf16.msra.mxu0 %v7248_v30  ;;  %v7223_v12 = vld [vmem:[%s7810_s26 + $0x1a8] ss:$16 sps:$4 sm:$0xff]  }
  0x79   : > { %2300 = vmatprep.subr.bf16.mxu0 %v7529_v0  ;;  %2055 = vmatpush1.bf16.msra.mxu1 %v7251_v46 }
  0x7a   : > { %2056 = vmatprep.subr.bf16.mxu1 %v7529_v0 }
  0x7c   : > { %2301 = vmatpush1.bf16.msra.mxu0 %v7250_v34 }
  0x7d   : > { %2302 = vmatprep.subr.bf16.mxu0 %v7529_v0  ;;  %2057 = vmatpush1.bf16.msra.mxu1 %v7253_v51 }
  0x7e   : > { %1486 = vmatmul.mubr.bf16.gmra.mxu0 %v7166_v14  ;;  %2068 = vmatprep.subr.bf16.mxu1 %v7529_v0  ;;  %v7226_v14 = vld [vmem:[%s7810_s26 + $0x1a0] ss:$16 sps:$4 sm:$0xff]  }
  0x7f   : > { %1495 = vmatprep.mubr.bf16.mxu0 %v7170_v16  ;;  %1689 = vmatmul.mubr.bf16.gmra.mxu1 %v7169_v19  ;;  %v7229_v16 = vld [vmem:[%s7810_s26 + $0x1c8] ss:$16 sps:$4 sm:$0xff]   ;;  %v7236_v19 = vld [vmem:[%s7810_s26 + $0x1e4] ss:$16 sps:$4 sm:$0xff]  }
  0x80   : > { %6163 = vmatprep.mubr.msk.bf16.mxu1 %vm1374_vm0, %v7173_v20  ;;  %2303 = vmatpush1.bf16.msra.mxu0 %v7252_v47  ;;  %v7235_v20 = vld [vmem:[%s7810_s26 + $0x1e8] ss:$16 sps:$4 sm:$0xff]   ;;  %s6565_s26 = sshll.u32 %s7659_s2, 7  ;;  %s7532_s2 = smov [#allocation2]  }
  0x81   : > { %2304 = vmatprep.subr.bf16.mxu0 %v7529_v0  ;;  %2069 = vmatpush2.bf16.msra.mxu1 %v2040_v57  ;;  %s9583_s30 = scalar_lea.hbm %s9742_s29, %s6565_s26  ;;  %s7471_s28 = sshll.u32 %s7532_s2, 4  ;;  %s7472_s28 = int_to_ptr.vmem [resolvable:$false] %s7471_s28 }
  0x82   : > { %2070 = vmatprep.subr.bf16.mxu1 %v7529_v0  ;;  %s7473_s3 = scalar_lea.vmem %s7472_s28, 256  ;;  %p7474_p0 = scmp.lt.s32.totalorder %s9585_s24, %s7472_s28 }
  0x84   : > { %2305 = vmatpush1.bf16.msra.mxu0 %v7254_v52 }
  0x85   : > { %2316 = vmatprep.subr.bf16.mxu0 %v7529_v0  ;;  %2071 = vmatpush2.bf16.msra.mxu1 %v7257_v61 }
  0x86   : > { %1496 = vmatmul.mubr.bf16.gmra.mxu0 %v7172_v23  ;;  %2072 = vmatprep.subr.bf16.mxu1 %v7529_v0  ;;  %v8042_v23 = vshrl.u32 %v760_v22, 7 }
  0x87   : > { %1505 = vmatprep.mubr.bf16.mxu0 %v7176_v24  ;;  %1699 = vmatmul.mubr.bf16.gmra.mxu1 %v7175_v27 }
  0x88   : > { %6164 = vmatprep.mubr.msk.bf16.mxu1 %vm1374_vm0, %v7179_v28  ;;  %2317 = vmatpush2.bf16.msra.mxu0 %v2288_v58  ;;  %v766_v25 = vsub.s32 1, %v8042_v23  ;;  %v762_v26 = vsub.s32 0, %v8042_v23  ;;  %v758_v28 = vld [vmem:[%s9676_s25] sm:$0x3]  ;;  %s7467_s25 = scalar_lea.vmem %s9585_s24, 128 }
  0x89   : > { %2318 = vmatprep.subr.bf16.mxu0 %v7529_v0  ;;  %2073 = vmatpush2.bf16.msra.mxu1 %v7259_v2  ;;  %p7468_p11 = scmp.ne.s32.totalorder %s9585_s24, %s7467_s25  ;;  %p7475_p1 = scmp.lt.s32.totalorder %s7473_s3, %s7467_s25 }
  0x8a   : > { %v8051_v30 = vrot.slane %v758_v28, %v766_v25 }
  0x8b   : > { %p7469_p12 = pnand %p7468_p11, %p7676_p5  ;;  %p7476_p2 = por %p7475_p1, %p7474_p0 }
  0x8c   : > { %2319 = vmatpush2.bf16.msra.mxu0 %v7258_v62 }
  0x8d   : > { %2320 = vmatprep.subr.bf16.mxu0 %v7529_v0  ;;  %p7470_p13 = pneg %p7469_p12 }
  0x8e   : > { %1506 = vmatmul.mubr.bf16.gmra.mxu0 %v7178_v31  ;;  %v8055_v31 = vrot.slane %v758_v28, %v762_v26 }
  0x8f   : > { %1515 = vmatprep.mubr.bf16.mxu0 %v7182_v33  ;;  %1709 = vmatmul.mubr.bf16.gmra.mxu1 %v7181_v35  ;;  %p7477_p3 = pnand %p7476_p2, %p7470_p13 }
  0x90   : > { %6165 = vmatprep.mubr.msk.bf16.mxu1 %vm1374_vm0, %v7185_v36  ;;  %2321 = vmatpush2.bf16.msra.mxu0 %v7260_v3 }
  0x96   : > { %1516 = vmatmul.mubr.bf16.gmra.mxu0 %v7184_v37 }
  0x97   : > { %1525 = vmatprep.mubr.bf16.mxu0 %v7188_v38  ;;  %1719 = vmatmul.mubr.bf16.gmra.mxu1 %v7187_v39 }
  0x98   : > { %6166 = vmatprep.mubr.msk.bf16.mxu1 %vm1374_vm0, %v7191_v40 }
  0x9e   : > { %1526 = vmatmul.mubr.bf16.gmra.mxu0 %v7190_v41 }
  0x9f   : > { %1535 = vmatprep.mubr.bf16.mxu0 %v7194_v42  ;;  %1729 = vmatmul.mubr.bf16.gmra.mxu1 %v7193_v43 }
  0xa0   : > { %6167 = vmatprep.mubr.msk.bf16.mxu1 %vm1374_vm0, %v7197_v44 }
  0xa6   : > { %1536 = vmatmul.mubr.bf16.gmra.mxu0 %v7196_v45 }
  0xa7   : > { %1545 = vmatprep.mubr.bf16.mxu0 %v7200_v49  ;;  %1739 = vmatmul.mubr.bf16.gmra.mxu1 %v7199_v48 }
  0xa8   : > { %6168 = vmatprep.mubr.msk.bf16.mxu1 %vm1374_vm0, %v7203_v50 }
  0xae   : > { %1546 = vmatmul.mubr.bf16.gmra.mxu0 %v7202_v53 }
  0xaf   : > { %1555 = vmatprep.mubr.bf16.mxu0 %v7206_v56  ;;  %1749 = vmatmul.mubr.bf16.gmra.mxu1 %v7205_v59 }
  0xb0   : > { %6169 = vmatprep.mubr.msk.bf16.mxu1 %vm1374_vm0, %v7209_v60 }
  0xb6   : > { %1556 = vmatmul.mubr.bf16.gmra.mxu0 %v7208_v63 }
  0xb7   : > { %1565 = vmatprep.mubr.bf16.mxu0 %v7212_v1  ;;  %1759 = vmatmul.mubr.bf16.gmra.mxu1 %v7211_v4 }
  0xb8   : > { %6170 = vmatprep.mubr.msk.bf16.mxu1 %vm1374_vm0, %v7215_v5 }
  0xbe   : > { %1566 = vmatmul.mubr.bf16.gmra.mxu0 %v7214_v6 }
  0xbf   : > { %1575 = vmatprep.mubr.bf16.mxu0 %v7218_v7  ;;  %1769 = vmatmul.mubr.bf16.gmra.mxu1 %v7217_v8 }
  0xc0   : > { %6171 = vmatprep.mubr.msk.bf16.mxu1 %vm1374_vm0, %v7221_v9 }
  0xc6   : > { %1576 = vmatmul.mubr.bf16.gmra.mxu0 %v7220_v10 }
  0xc7   : > { %1585 = vmatprep.mubr.bf16.mxu0 %v7224_v11  ;;  %1779 = vmatmul.mubr.bf16.gmra.mxu1 %v7223_v12 }
  0xc8   : > { %6172 = vmatprep.mubr.msk.bf16.mxu1 %vm1374_vm0, %v7227_v13 }
  0xce   : > { %1586 = vmatmul.mubr.bf16.gmra.mxu0 %v7226_v14 }
  0xcf   : > { %1595 = vmatprep.mubr.bf16.mxu0 %v7230_v15  ;;  %1789 = vmatmul.mubr.bf16.gmra.mxu1 %v7229_v16 }
  0xd0   : > { %6173 = vmatprep.mubr.msk.bf16.mxu1 %vm1374_vm0, %v7233_v17 }
  0xd6   : > { %1596 = vmatmul.mubr.bf16.gmra.mxu0 %v7232_v18 }
  0xd7   : > { %1605 = vmatprep.mubr.bf16.mxu0 %v7236_v19  ;;  %1799 = vmatmul.mubr.bf16.gmra.mxu1 %v7235_v20 }
  0xde   : > { %1606 = vmatmul.mubr.bf16.gmra.mxu0 %v7238_v21 }
 0x11f   : > { %v1650_v24 = vpop.f32.mrf.mxu1 }
 0x121   : > { %v1652_v27 = vpop.f32.mrf.mxu1 }
 0x123   : > { %v1654_v29 = vpop.f32.mrf.mxu1 }
 0x125   : > { %v1656_v33 = vpop.f32.mrf.mxu1 }
 0x126   : > { %v1457_v32 = vpop.f32.mrf.mxu0 }
 0x127   : > { %v1660_v36 = vpop.f32.mrf.mxu1  ;;  %v1458_v37 = vadd.f32 %v1457_v32, %v8055_v31 }
 0x128   : > { %v1459_v34 = vpop.f32.mrf.mxu0 }
 0x129   : > { %v1460_v35 = vadd.f32 %v1459_v34, %v8051_v30  ;;  %v1662_v40 = vpop.f32.mrf.mxu1  ;;  %v1651_v46 = vadd.f32 %v1650_v24, %v1458_v37 }
 0x12a   : > { %v1461_v38 = vpop.f32.mrf.mxu0 }
 0x12b   : > { %v1462_v39 = vadd.f32 %v1461_v38, %v8055_v31  ;;  %v1653_v42 = vadd.f32 %v1652_v27, %v1460_v35  ;;  %v1664_v45 = vpop.f32.mrf.mxu1  ;;  %v1809_v56 = vmax.f32 %v1651_v46, 0.0 }
 0x12c   : > { %v1463_v41 = vpop.f32.mrf.mxu0 }
 0x12d   : > { %v1655_v43 = vadd.f32 %v1654_v29, %v1462_v39  ;;  %v1464_v44 = vadd.f32 %v1463_v41, %v8051_v30  ;;  %v1666_v49 = vpop.f32.mrf.mxu1  ;;  %v1810_v52 = vmax.f32 %v1653_v42, 0.0 }
 0x12e   : > { %v1467_v47 = vpop.f32.mrf.mxu0 }
 0x12f   : > { %v1657_v48 = vadd.f32 %v1656_v33, %v1464_v44  ;;  %v1811_v50 = vmax.f32 %v1655_v43, 0.0  ;;  %v1670_v55 = vpop.f32.mrf.mxu1  ;;  %v1468_v57 = vadd.f32 %v1467_v47, %v8055_v31 }
 0x130   : > { %v1469_v51 = vpop.f32.mrf.mxu0 }
 0x131   : > { %v1812_v53 = vmax.f32 %v1657_v48, 0.0  ;;  %v1470_v54 = vadd.f32 %v1469_v51, %v8051_v30  ;;  %v1672_v61 = vpop.f32.mrf.mxu1  ;;  %v1894_v62 = vpack.c.bf16 %v1811_v50, %v1809_v56  ;;  %v1661_v5 = vadd.f32 %v1660_v36, %v1468_v57 }
 0x132   : > { %v1471_v58 = vpop.f32.mrf.mxu0 }
 0x133   : > { %v1895_v59 = vpack.c.bf16 %v1812_v53, %v1810_v52  ;;  %v1472_v60 = vadd.f32 %v1471_v58, %v8055_v31  ;;  %v1663_v1 = vadd.f32 %v1662_v40, %v1470_v54  ;;  %v1674_v4 = vpop.f32.mrf.mxu1  ;;  %v1813_v15 = vmax.f32 %v1661_v5, 0.0 }
 0x134   : > { %v1473_v63 = vpop.f32.mrf.mxu0 }
 0x135   : > { %v1665_v2 = vadd.f32 %v1664_v45, %v1472_v60  ;;  %v1474_v3 = vadd.f32 %v1473_v63, %v8051_v30  ;;  %6185 = vmatprep.mubr.msk.bf16.mxu1 %vm1989_vm2, %v1895_v59  ;;  %6212 = vmatprep.mubr.msk.bf16.mxu0 %vm1989_vm2, %v1895_v59  ;;  %v1676_v8 = vpop.f32.mrf.mxu1  ;;  %v1814_v11 = vmax.f32 %v1663_v1, 0.0 }
 0x136   : > { %v1477_v6 = vpop.f32.mrf.mxu0  ;;  %2075 = vmatmul.mubr.bf16.vlgmr.msra.gmra.mxu1 %v1894_v62  ;;  %2323 = vmatmul.mubr.bf16.vlgmr.msra.gmra.mxu0 %v1894_v62 }
 0x137   : > { %v1667_v7 = vadd.f32 %v1666_v49, %v1474_v3  ;;  %v1815_v9 = vmax.f32 %v1665_v2, 0.0  ;;  %v1680_v14 = vpop.f32.mrf.mxu1  ;;  %v1478_v16 = vadd.f32 %v1477_v6, %v8055_v31 }
 0x138   : > { %v1479_v10 = vpop.f32.mrf.mxu0 }
 0x139   : > { %v1816_v12 = vmax.f32 %v1667_v7, 0.0  ;;  %v1480_v13 = vadd.f32 %v1479_v10, %v8051_v30  ;;  %v1682_v20 = vpop.f32.mrf.mxu1  ;;  %v1896_v22 = vpack.c.bf16 %v1815_v9, %v1813_v15  ;;  %v1671_v32 = vadd.f32 %v1670_v55, %v1478_v16 }
 0x13a   : > { %v1481_v17 = vpop.f32.mrf.mxu0 }
 0x13b   : > { %v1897_v18 = vpack.c.bf16 %v1816_v12, %v1814_v11  ;;  %v1482_v19 = vadd.f32 %v1481_v17, %v8055_v31  ;;  %v1673_v24 = vadd.f32 %v1672_v61, %v1480_v13  ;;  %v1684_v29 = vpop.f32.mrf.mxu1  ;;  %v1817_v42 = vmax.f32 %v1671_v32, 0.0 }
 0x13c   : > { %v1483_v21 = vpop.f32.mrf.mxu0 }
 0x13d   : > { %v1675_v27 = vadd.f32 %v1674_v4, %v1482_v19  ;;  %v1484_v28 = vadd.f32 %v1483_v21, %v8051_v30  ;;  %6186 = vmatprep.mubr.msk.bf16.mxu1 %vm1989_vm2, %v1897_v18  ;;  %6213 = vmatprep.mubr.msk.bf16.mxu0 %vm1989_vm2, %v1897_v18  ;;  %v1686_v35 = vpop.f32.mrf.mxu1  ;;  %v1818_v38 = vmax.f32 %v1673_v24, 0.0 }
 0x13e   : > { %v1487_v33 = vpop.f32.mrf.mxu0  ;;  %2083 = vmatmul.mubr.bf16.gmra.mxu1 %v1896_v22  ;;  %2331 = vmatmul.mubr.bf16.gmra.mxu0 %v1896_v22 }
 0x13f   : > { %v1677_v34 = vadd.f32 %v1676_v8, %v1484_v28  ;;  %v1819_v36 = vmax.f32 %v1675_v27, 0.0  ;;  %v1690_v41 = vpop.f32.mrf.mxu1  ;;  %v1488_v43 = vadd.f32 %v1487_v33, %v8055_v31 }
 0x140   : > { %v1489_v37 = vpop.f32.mrf.mxu0 }
 0x141   : > { %v1820_v39 = vmax.f32 %v1677_v34, 0.0  ;;  %v1490_v40 = vadd.f32 %v1489_v37, %v8051_v30  ;;  %v1692_v47 = vpop.f32.mrf.mxu1  ;;  %v1898_v49 = vpack.c.bf16 %v1819_v36, %v1817_v42  ;;  %v1681_v54 = vadd.f32 %v1680_v14, %v1488_v43 }
 0x142   : > { %v1491_v44 = vpop.f32.mrf.mxu0 }
 0x143   : > { %v1899_v45 = vpack.c.bf16 %v1820_v39, %v1818_v38  ;;  %v1492_v46 = vadd.f32 %v1491_v44, %v8055_v31  ;;  %v1683_v50 = vadd.f32 %v1682_v20, %v1490_v40  ;;  %v1694_v53 = vpop.f32.mrf.mxu1  ;;  %v1821_v1 = vmax.f32 %v1681_v54, 0.0 }
 0x144   : > { %v1493_v48 = vpop.f32.mrf.mxu0 }
 0x145   : > { %v1685_v51 = vadd.f32 %v1684_v29, %v1492_v46  ;;  %v1494_v52 = vadd.f32 %v1493_v48, %v8051_v30  ;;  %6187 = vmatprep.mubr.msk.bf16.mxu1 %vm1989_vm2, %v1899_v45  ;;  %6214 = vmatprep.mubr.msk.bf16.mxu0 %vm1989_vm2, %v1899_v45  ;;  %v1696_v57 = vpop.f32.mrf.mxu1  ;;  %v1822_v60 = vmax.f32 %v1683_v50, 0.0 }
 0x146   : > { %v1497_v55 = vpop.f32.mrf.mxu0  ;;  %2091 = vmatmul.mubr.bf16.gmra.mxu1 %v1898_v49  ;;  %2339 = vmatmul.mubr.bf16.gmra.mxu0 %v1898_v49 }
 0x147   : > { %v1687_v56 = vadd.f32 %v1686_v35, %v1494_v52  ;;  %v1823_v58 = vmax.f32 %v1685_v51, 0.0  ;;  %v1700_v63 = vpop.f32.mrf.mxu1  ;;  %v1498_v2 = vadd.f32 %v1497_v55, %v8055_v31 }
 0x148   : > { %v1499_v59 = vpop.f32.mrf.mxu0 }
 0x149   : > { %v1824_v61 = vmax.f32 %v1687_v56, 0.0  ;;  %v1500_v62 = vadd.f32 %v1499_v59, %v8051_v30  ;;  %v1702_v6 = vpop.f32.mrf.mxu1  ;;  %v1900_v8 = vpack.c.bf16 %v1823_v58, %v1821_v1  ;;  %v1691_v13 = vadd.f32 %v1690_v41, %v1498_v2 }
 0x14a   : > { %v1501_v3 = vpop.f32.mrf.mxu0 }
 0x14b   : > { %v1901_v4 = vpack.c.bf16 %v1824_v61, %v1822_v60  ;;  %v1502_v5 = vadd.f32 %v1501_v3, %v8055_v31  ;;  %v1693_v9 = vadd.f32 %v1692_v47, %v1500_v62  ;;  %v1704_v12 = vpop.f32.mrf.mxu1  ;;  %v1825_v24 = vmax.f32 %v1691_v13, 0.0 }
 0x14c   : > { %v1503_v7 = vpop.f32.mrf.mxu0 }
 0x14d   : > { %v1695_v10 = vadd.f32 %v1694_v53, %v1502_v5  ;;  %v1504_v11 = vadd.f32 %v1503_v7, %v8051_v30  ;;  %6188 = vmatprep.mubr.msk.bf16.mxu1 %vm1989_vm2, %v1901_v4  ;;  %6215 = vmatprep.mubr.msk.bf16.mxu0 %vm1989_vm2, %v1901_v4  ;;  %v1706_v16 = vpop.f32.mrf.mxu1  ;;  %v1826_v19 = vmax.f32 %v1693_v9, 0.0 }
 0x14e   : > { %v1507_v14 = vpop.f32.mrf.mxu0  ;;  %2099 = vmatmul.mubr.bf16.gmra.mxu1 %v1900_v8  ;;  %2347 = vmatmul.mubr.bf16.gmra.mxu0 %v1900_v8 }
 0x14f   : > { %v1697_v15 = vadd.f32 %v1696_v57, %v1504_v11  ;;  %v1827_v17 = vmax.f32 %v1695_v10, 0.0  ;;  %v1710_v22 = vpop.f32.mrf.mxu1  ;;  %v1508_v27 = vadd.f32 %v1507_v14, %v8055_v31 }
 0x150   : > { %v1509_v18 = vpop.f32.mrf.mxu0 }
 0x151   : > { %v1828_v20 = vmax.f32 %v1697_v15, 0.0  ;;  %v1510_v21 = vadd.f32 %v1509_v18, %v8051_v30  ;;  %v1712_v33 = vpop.f32.mrf.mxu1  ;;  %v1902_v35 = vpack.c.bf16 %v1827_v17, %v1825_v24  ;;  %v1701_v40 = vadd.f32 %v1700_v63, %v1508_v27 }
 0x152   : > { %v1511_v28 = vpop.f32.mrf.mxu0 }
 0x153   : > { %v1903_v29 = vpack.c.bf16 %v1828_v20, %v1826_v19  ;;  %v1512_v32 = vadd.f32 %v1511_v28, %v8055_v31  ;;  %v1703_v36 = vadd.f32 %v1702_v6, %v1510_v21  ;;  %v1714_v39 = vpop.f32.mrf.mxu1  ;;  %v1829_v50 = vmax.f32 %v1701_v40, 0.0 }
 0x154   : > { %v1513_v34 = vpop.f32.mrf.mxu0 }
 0x155   : > { %v1705_v37 = vadd.f32 %v1704_v12, %v1512_v32  ;;  %v1514_v38 = vadd.f32 %v1513_v34, %v8051_v30  ;;  %6189 = vmatprep.mubr.msk.bf16.mxu1 %vm1989_vm2, %v1903_v29  ;;  %6216 = vmatprep.mubr.msk.bf16.mxu0 %vm1989_vm2, %v1903_v29  ;;  %v1716_v43 = vpop.f32.mrf.mxu1  ;;  %v1830_v46 = vmax.f32 %v1703_v36, 0.0 }
 0x156   : > { %v1517_v41 = vpop.f32.mrf.mxu0  ;;  %2107 = vmatmul.mubr.bf16.gmra.mxu1 %v1902_v35  ;;  %2355 = vmatmul.mubr.bf16.gmra.mxu0 %v1902_v35 }
 0x157   : > { %v1707_v42 = vadd.f32 %v1706_v16, %v1514_v38  ;;  %v1831_v44 = vmax.f32 %v1705_v37, 0.0  ;;  %v1720_v49 = vpop.f32.mrf.mxu1  ;;  %v1518_v51 = vadd.f32 %v1517_v41, %v8055_v31 }
 0x158   : > { %v1519_v45 = vpop.f32.mrf.mxu0 }
 0x159   : > { %v1832_v47 = vmax.f32 %v1707_v42, 0.0  ;;  %v1520_v48 = vadd.f32 %v1519_v45, %v8051_v30  ;;  %v1722_v55 = vpop.f32.mrf.mxu1  ;;  %v1904_v57 = vpack.c.bf16 %v1831_v44, %v1829_v50  ;;  %v1711_v62 = vadd.f32 %v1710_v22, %v1518_v51 }
 0x15a   : > { %v1521_v52 = vpop.f32.mrf.mxu0 }
 0x15b   : > { %v1905_v53 = vpack.c.bf16 %v1832_v47, %v1830_v46  ;;  %v1522_v54 = vadd.f32 %v1521_v52, %v8055_v31  ;;  %v1713_v58 = vadd.f32 %v1712_v33, %v1520_v48  ;;  %v1724_v61 = vpop.f32.mrf.mxu1  ;;  %v1833_v9 = vmax.f32 %v1711_v62, 0.0 }
 0x15c   : > { %v1523_v56 = vpop.f32.mrf.mxu0 }
 0x15d   : > { %v1715_v59 = vadd.f32 %v1714_v39, %v1522_v54  ;;  %v1524_v60 = vadd.f32 %v1523_v56, %v8051_v30  ;;  %6190 = vmatprep.mubr.msk.bf16.mxu1 %vm1989_vm2, %v1905_v53  ;;  %6217 = vmatprep.mubr.msk.bf16.mxu0 %vm1989_vm2, %v1905_v53  ;;  %v1726_v2 = vpop.f32.mrf.mxu1  ;;  %v1834_v5 = vmax.f32 %v1713_v58, 0.0 }
 0x15e   : > { %v1527_v63 = vpop.f32.mrf.mxu0  ;;  %2115 = vmatmul.mubr.bf16.gmra.mxu1 %v1904_v57  ;;  %2363 = vmatmul.mubr.bf16.gmra.mxu0 %v1904_v57 }
 0x15f   : > { %v1717_v1 = vadd.f32 %v1716_v43, %v1524_v60  ;;  %v1835_v3 = vmax.f32 %v1715_v59, 0.0  ;;  %v1730_v8 = vpop.f32.mrf.mxu1  ;;  %v1528_v10 = vadd.f32 %v1527_v63, %v8055_v31 }
 0x160   : > { %v1529_v4 = vpop.f32.mrf.mxu0 }
 0x161   : > { %v1836_v6 = vmax.f32 %v1717_v1, 0.0  ;;  %v1530_v7 = vadd.f32 %v1529_v4, %v8051_v30  ;;  %v1732_v14 = vpop.f32.mrf.mxu1  ;;  %v1906_v16 = vpack.c.bf16 %v1835_v3, %v1833_v9  ;;  %v1721_v21 = vadd.f32 %v1720_v49, %v1528_v10 }
 0x162   : > { %v1531_v11 = vpop.f32.mrf.mxu0 }
 0x163   : > { %v1907_v12 = vpack.c.bf16 %v1836_v6, %v1834_v5  ;;  %v1532_v13 = vadd.f32 %v1531_v11, %v8055_v31  ;;  %v1723_v17 = vadd.f32 %v1722_v55, %v1530_v7  ;;  %v1734_v20 = vpop.f32.mrf.mxu1  ;;  %v1837_v36 = vmax.f32 %v1721_v21, 0.0 }
 0x164   : > { %v1533_v15 = vpop.f32.mrf.mxu0 }
 0x165   : > { %v1725_v18 = vadd.f32 %v1724_v61, %v1532_v13  ;;  %v1534_v19 = vadd.f32 %v1533_v15, %v8051_v30  ;;  %6191 = vmatprep.mubr.msk.bf16.mxu1 %vm1989_vm2, %v1907_v12  ;;  %6218 = vmatprep.mubr.msk.bf16.mxu0 %vm1989_vm2, %v1907_v12  ;;  %v1736_v27 = vpop.f32.mrf.mxu1  ;;  %v1838_v32 = vmax.f32 %v1723_v17, 0.0 }
 0x166   : > { %v1537_v22 = vpop.f32.mrf.mxu0  ;;  %2123 = vmatmul.mubr.bf16.gmra.mxu1 %v1906_v16  ;;  %2371 = vmatmul.mubr.bf16.gmra.mxu0 %v1906_v16 }
 0x167   : > { %v1727_v24 = vadd.f32 %v1726_v2, %v1534_v19  ;;  %v1839_v28 = vmax.f32 %v1725_v18, 0.0  ;;  %v1740_v35 = vpop.f32.mrf.mxu1  ;;  %v1538_v37 = vadd.f32 %v1537_v22, %v8055_v31 }
 0x168   : > { %v1539_v29 = vpop.f32.mrf.mxu0 }
 0x169   : > { %v1840_v33 = vmax.f32 %v1727_v24, 0.0  ;;  %v1540_v34 = vadd.f32 %v1539_v29, %v8051_v30  ;;  %v1742_v41 = vpop.f32.mrf.mxu1  ;;  %v1908_v43 = vpack.c.bf16 %v1839_v28, %v1837_v36  ;;  %v1731_v48 = vadd.f32 %v1730_v8, %v1538_v37 }
 0x16a   : > { %v1541_v38 = vpop.f32.mrf.mxu0 }
 0x16b   : > { %v1909_v39 = vpack.c.bf16 %v1840_v33, %v1838_v32  ;;  %v1542_v40 = vadd.f32 %v1541_v38, %v8055_v31  ;;  %v1733_v44 = vadd.f32 %v1732_v14, %v1540_v34  ;;  %v1744_v47 = vpop.f32.mrf.mxu1  ;;  %v1841_v58 = vmax.f32 %v1731_v48, 0.0 }
 0x16c   : > { %v1543_v42 = vpop.f32.mrf.mxu0 }
 0x16d   : > { %v1735_v45 = vadd.f32 %v1734_v20, %v1542_v40  ;;  %v1544_v46 = vadd.f32 %v1543_v42, %v8051_v30  ;;  %6192 = vmatprep.mubr.msk.bf16.mxu1 %vm1989_vm2, %v1909_v39  ;;  %6219 = vmatprep.mubr.msk.bf16.mxu0 %vm1989_vm2, %v1909_v39  ;;  %v1746_v51 = vpop.f32.mrf.mxu1  ;;  %v1842_v54 = vmax.f32 %v1733_v44, 0.0 }
 0x16e   : > { %v1547_v49 = vpop.f32.mrf.mxu0  ;;  %2131 = vmatmul.mubr.bf16.gmra.mxu1 %v1908_v43  ;;  %2379 = vmatmul.mubr.bf16.gmra.mxu0 %v1908_v43 }
 0x16f   : > { %v1737_v50 = vadd.f32 %v1736_v27, %v1544_v46  ;;  %v1843_v52 = vmax.f32 %v1735_v45, 0.0  ;;  %v1750_v57 = vpop.f32.mrf.mxu1  ;;  %v1548_v59 = vadd.f32 %v1547_v49, %v8055_v31 }
 0x170   : > { %v1549_v53 = vpop.f32.mrf.mxu0 }
 0x171   : > { %v1844_v55 = vmax.f32 %v1737_v50, 0.0  ;;  %v1550_v56 = vadd.f32 %v1549_v53, %v8051_v30  ;;  %v1752_v63 = vpop.f32.mrf.mxu1  ;;  %v1910_v2 = vpack.c.bf16 %v1843_v52, %v1841_v58  ;;  %v1741_v7 = vadd.f32 %v1740_v35, %v1548_v59 }
 0x172   : > { %v1551_v60 = vpop.f32.mrf.mxu0 }
 0x173   : > { %v1911_v61 = vpack.c.bf16 %v1844_v55, %v1842_v54  ;;  %v1552_v62 = vadd.f32 %v1551_v60, %v8055_v31  ;;  %v1743_v3 = vadd.f32 %v1742_v41, %v1550_v56  ;;  %v1754_v6 = vpop.f32.mrf.mxu1  ;;  %v1845_v17 = vmax.f32 %v1741_v7, 0.0 }
 0x174   : > { %v1553_v1 = vpop.f32.mrf.mxu0 }
 0x175   : > { %v1745_v4 = vadd.f32 %v1744_v47, %v1552_v62  ;;  %v1554_v5 = vadd.f32 %v1553_v1, %v8051_v30  ;;  %6193 = vmatprep.mubr.msk.bf16.mxu1 %vm1989_vm2, %v1911_v61  ;;  %6220 = vmatprep.mubr.msk.bf16.mxu0 %vm1989_vm2, %v1911_v61  ;;  %v1756_v10 = vpop.f32.mrf.mxu1  ;;  %v1846_v13 = vmax.f32 %v1743_v3, 0.0 }
 0x176   : > { %v1557_v8 = vpop.f32.mrf.mxu0  ;;  %2139 = vmatmul.mubr.bf16.gmra.mxu1 %v1910_v2  ;;  %2387 = vmatmul.mubr.bf16.gmra.mxu0 %v1910_v2 }
 0x177   : > { %v1747_v9 = vadd.f32 %v1746_v51, %v1554_v5  ;;  %v1847_v11 = vmax.f32 %v1745_v4, 0.0  ;;  %v1760_v16 = vpop.f32.mrf.mxu1  ;;  %v1558_v18 = vadd.f32 %v1557_v8, %v8055_v31 }
 0x178   : > { %v1559_v12 = vpop.f32.mrf.mxu0 }
 0x179   : > { %v1848_v14 = vmax.f32 %v1747_v9, 0.0  ;;  %v1560_v15 = vadd.f32 %v1559_v12, %v8051_v30  ;;  %v1762_v22 = vpop.f32.mrf.mxu1  ;;  %v1912_v27 = vpack.c.bf16 %v1847_v11, %v1845_v17  ;;  %v1751_v34 = vadd.f32 %v1750_v57, %v1558_v18 }
 0x17a   : > { %v1561_v19 = vpop.f32.mrf.mxu0 }
 0x17b   : > { %v1913_v20 = vpack.c.bf16 %v1848_v14, %v1846_v13  ;;  %v1562_v21 = vadd.f32 %v1561_v19, %v8055_v31  ;;  %v1753_v28 = vadd.f32 %v1752_v63, %v1560_v15  ;;  %v1764_v33 = vpop.f32.mrf.mxu1  ;;  %v1849_v44 = vmax.f32 %v1751_v34, 0.0 }
 0x17c   : > { %v1563_v24 = vpop.f32.mrf.mxu0 }
 0x17d   : > { %v1755_v29 = vadd.f32 %v1754_v6, %v1562_v21  ;;  %v1564_v32 = vadd.f32 %v1563_v24, %v8051_v30  ;;  %6194 = vmatprep.mubr.msk.bf16.mxu1 %vm1989_vm2, %v1913_v20  ;;  %6221 = vmatprep.mubr.msk.bf16.mxu0 %vm1989_vm2, %v1913_v20  ;;  %v1766_v37 = vpop.f32.mrf.mxu1  ;;  %v1850_v40 = vmax.f32 %v1753_v28, 0.0 }
 0x17e   : > { %v1567_v35 = vpop.f32.mrf.mxu0  ;;  %2147 = vmatmul.mubr.bf16.gmra.mxu1 %v1912_v27  ;;  %2395 = vmatmul.mubr.bf16.gmra.mxu0 %v1912_v27 }
 0x17f   : > { %v1757_v36 = vadd.f32 %v1756_v10, %v1564_v32  ;;  %v1851_v38 = vmax.f32 %v1755_v29, 0.0  ;;  %v1770_v43 = vpop.f32.mrf.mxu1  ;;  %v1568_v45 = vadd.f32 %v1567_v35, %v8055_v31 }
 0x180   : > { %v1569_v39 = vpop.f32.mrf.mxu0 }
 0x181   : > { %v1852_v41 = vmax.f32 %v1757_v36, 0.0  ;;  %v1570_v42 = vadd.f32 %v1569_v39, %v8051_v30  ;;  %v1772_v49 = vpop.f32.mrf.mxu1  ;;  %v1914_v51 = vpack.c.bf16 %v1851_v38, %v1849_v44  ;;  %v1761_v56 = vadd.f32 %v1760_v16, %v1568_v45 }
 0x182   : > { %v1571_v46 = vpop.f32.mrf.mxu0 }
 0x183   : > { %v1915_v47 = vpack.c.bf16 %v1852_v41, %v1850_v40  ;;  %v1572_v48 = vadd.f32 %v1571_v46, %v8055_v31  ;;  %v1763_v52 = vadd.f32 %v1762_v22, %v1570_v42  ;;  %v1774_v55 = vpop.f32.mrf.mxu1  ;;  %v1853_v3 = vmax.f32 %v1761_v56, 0.0 }
 0x184   : > { %v1573_v50 = vpop.f32.mrf.mxu0 }
 0x185   : > { %v1765_v53 = vadd.f32 %v1764_v33, %v1572_v48  ;;  %v1574_v54 = vadd.f32 %v1573_v50, %v8051_v30  ;;  %6195 = vmatprep.mubr.msk.bf16.mxu1 %vm1989_vm2, %v1915_v47  ;;  %6222 = vmatprep.mubr.msk.bf16.mxu0 %vm1989_vm2, %v1915_v47  ;;  %v1776_v59 = vpop.f32.mrf.mxu1  ;;  %v1854_v62 = vmax.f32 %v1763_v52, 0.0 }
 0x186   : > { %v1577_v57 = vpop.f32.mrf.mxu0  ;;  %2155 = vmatmul.mubr.bf16.gmra.mxu1 %v1914_v51  ;;  %2403 = vmatmul.mubr.bf16.gmra.mxu0 %v1914_v51 }
 0x187   : > { %v1767_v58 = vadd.f32 %v1766_v37, %v1574_v54  ;;  %v1855_v60 = vmax.f32 %v1765_v53, 0.0  ;;  %v1780_v2 = vpop.f32.mrf.mxu1  ;;  %v1578_v4 = vadd.f32 %v1577_v57, %v8055_v31 }
 0x188   : > { %v1579_v61 = vpop.f32.mrf.mxu0 }
 0x189   : > { %v1856_v63 = vmax.f32 %v1767_v58, 0.0  ;;  %v1580_v1 = vadd.f32 %v1579_v61, %v8051_v30  ;;  %v1782_v8 = vpop.f32.mrf.mxu1  ;;  %v1916_v10 = vpack.c.bf16 %v1855_v60, %v1853_v3  ;;  %v1771_v15 = vadd.f32 %v1770_v43, %v1578_v4 }
 0x18a   : > { %v1581_v5 = vpop.f32.mrf.mxu0 }
 0x18b   : > { %v1917_v6 = vpack.c.bf16 %v1856_v63, %v1854_v62  ;;  %v1582_v7 = vadd.f32 %v1581_v5, %v8055_v31  ;;  %v1773_v11 = vadd.f32 %v1772_v49, %v1580_v1  ;;  %v1784_v14 = vpop.f32.mrf.mxu1  ;;  %v1857_v28 = vmax.f32 %v1771_v15, 0.0 }
 0x18c   : > { %v1583_v9 = vpop.f32.mrf.mxu0 }
 0x18d   : > { %v1775_v12 = vadd.f32 %v1774_v55, %v1582_v7  ;;  %v1584_v13 = vadd.f32 %v1583_v9, %v8051_v30  ;;  %6196 = vmatprep.mubr.msk.bf16.mxu1 %vm1989_vm2, %v1917_v6  ;;  %6223 = vmatprep.mubr.msk.bf16.mxu0 %vm1989_vm2, %v1917_v6  ;;  %v1786_v18 = vpop.f32.mrf.mxu1  ;;  %v1858_v21 = vmax.f32 %v1773_v11, 0.0 }
 0x18e   : > { %v1587_v16 = vpop.f32.mrf.mxu0  ;;  %2163 = vmatmul.mubr.bf16.gmra.mxu1 %v1916_v10  ;;  %2411 = vmatmul.mubr.bf16.gmra.mxu0 %v1916_v10 }
 0x18f   : > { %v1777_v17 = vadd.f32 %v1776_v59, %v1584_v13  ;;  %v1859_v19 = vmax.f32 %v1775_v12, 0.0  ;;  %v1790_v27 = vpop.f32.mrf.mxu1  ;;  %v1588_v29 = vadd.f32 %v1587_v16, %v8055_v31 }
 0x190   : > { %v1589_v20 = vpop.f32.mrf.mxu0 }
 0x191   : > { %v1860_v22 = vmax.f32 %v1777_v17, 0.0  ;;  %v1590_v24 = vadd.f32 %v1589_v20, %v8051_v30  ;;  %v1792_v35 = vpop.f32.mrf.mxu1  ;;  %v1918_v36 = vpack.c.bf16 %v1859_v19, %v1857_v28  ;;  %v1781_v42 = vadd.f32 %v1780_v2, %v1588_v29 }
 0x192   : > { %v1591_v32 = vpop.f32.mrf.mxu0 }
 0x193   : > { %v1919_v33 = vpack.c.bf16 %v1860_v22, %v1858_v21  ;;  %v1592_v34 = vadd.f32 %v1591_v32, %v8055_v31  ;;  %v1783_v38 = vadd.f32 %v1782_v8, %v1590_v24  ;;  %v1794_v41 = vpop.f32.mrf.mxu1  ;;  %v1861_v51 = vmax.f32 %v1781_v42, 0.0 }
 0x194   : > { %v1593_v37 = vpop.f32.mrf.mxu0 }
 0x195   : > { %v1785_v39 = vadd.f32 %v1784_v14, %v1592_v34  ;;  %v1594_v40 = vadd.f32 %v1593_v37, %v8051_v30  ;;  %6197 = vmatprep.mubr.msk.bf16.mxu1 %vm1989_vm2, %v1919_v33  ;;  %6224 = vmatprep.mubr.msk.bf16.mxu0 %vm1989_vm2, %v1919_v33  ;;  %v1796_v45 = vpop.f32.mrf.mxu1  ;;  %v1862_v48 = vmax.f32 %v1783_v38, 0.0 }
 0x196   : > { %v1597_v43 = vpop.f32.mrf.mxu0  ;;  %2171 = vmatmul.mubr.bf16.gmra.mxu1 %v1918_v36  ;;  %2419 = vmatmul.mubr.bf16.gmra.mxu0 %v1918_v36 }
 0x197   : > { %v1787_v44 = vadd.f32 %v1786_v18, %v1594_v40  ;;  %v1863_v46 = vmax.f32 %v1785_v39, 0.0  ;;  %v1598_v52 = vadd.f32 %v1597_v43, %v8055_v31  ;;  %v1800_v54 = vpop.f32.mrf.mxu1 }
 0x198   : > { %v1599_v47 = vpop.f32.mrf.mxu0 }
 0x199   : > { %v1864_v49 = vmax.f32 %v1787_v44, 0.0  ;;  %v1600_v50 = vadd.f32 %v1599_v47, %v8051_v30  ;;  %v1920_v57 = vpack.c.bf16 %v1863_v46, %v1861_v51  ;;  %v1791_v62 = vadd.f32 %v1790_v27, %v1598_v52  ;;  %v1802_v63 = vpop.f32.mrf.mxu1 }
 0x19a   : > { %v1601_v53 = vpop.f32.mrf.mxu0 }
 0x19b   : > { %v1921_v55 = vpack.c.bf16 %v1864_v49, %v1862_v48  ;;  %v1602_v56 = vadd.f32 %v1601_v53, %v8055_v31  ;;  %v1793_v59 = vadd.f32 %v1792_v35, %v1600_v50  ;;  %v1865_v8 = vmax.f32 %v1791_v62, 0.0  ;;  %v1804_v10 = vpop.f32.mrf.mxu1 }
 0x19c   : > { %v1603_v58 = vpop.f32.mrf.mxu0 }
 0x19d   : > { %v1795_v60 = vadd.f32 %v1794_v41, %v1602_v56  ;;  %v1604_v61 = vadd.f32 %v1603_v58, %v8051_v30  ;;  %6198 = vmatprep.mubr.msk.bf16.mxu1 %vm1989_vm2, %v1921_v55  ;;  %6225 = vmatprep.mubr.msk.bf16.mxu0 %vm1989_vm2, %v1921_v55  ;;  %v1866_v5 = vmax.f32 %v1793_v59, 0.0  ;;  %v1806_v20 = vpop.f32.mrf.mxu1 }
 0x19e   : > { %v1607_v1 = vpop.f32.mrf.mxu0  ;;  %2179 = vmatmul.mubr.bf16.gmra.mxu1 %v1920_v57  ;;  %2427 = vmatmul.mubr.bf16.gmra.mxu0 %v1920_v57 }
 0x19f   : > { %v1797_v2 = vadd.f32 %v1796_v45, %v1604_v61  ;;  %v1867_v3 = vmax.f32 %v1795_v60, 0.0  ;;  %v1608_v9 = vadd.f32 %v1607_v1, %v8055_v31 }
 0x1a0   : > { %v1609_v4 = vpop.f32.mrf.mxu0 }
 0x1a1   : > { %v1868_v6 = vmax.f32 %v1797_v2, 0.0  ;;  %v1610_v7 = vadd.f32 %v1609_v4, %v8051_v30  ;;  %v1922_v14 = vpack.c.bf16 %v1867_v3, %v1865_v8  ;;  %v1801_v19 = vadd.f32 %v1800_v54, %v1608_v9 }
 0x1a2   : > { %v1611_v11 = vpop.f32.mrf.mxu0 }
 0x1a3   : > { %v1923_v12 = vpack.c.bf16 %v1868_v6, %v1866_v5  ;;  %v1612_v13 = vadd.f32 %v1611_v11, %v8055_v31  ;;  %v1803_v16 = vadd.f32 %v1802_v63, %v1610_v7  ;;  %v1869_v28 = vmax.f32 %v1801_v19, 0.0  ;;  %v7263_v11 = vld [vmem:[%s9677_s5 + $0x4] ss:$8 sps:$4 sm:$0xff]  }
 0x1a4   : > { %v1613_v15 = vpop.f32.mrf.mxu0 }
 0x1a5   : > { %v1805_v17 = vadd.f32 %v1804_v10, %v1612_v13  ;;  %v1614_v18 = vadd.f32 %v1613_v15, %v8051_v30  ;;  %6199 = vmatprep.mubr.msk.bf16.mxu1 %vm1989_vm2, %v1923_v12  ;;  %6226 = vmatprep.mubr.msk.bf16.mxu0 %vm1989_vm2, %v1923_v12  ;;  %v1870_v24 = vmax.f32 %v1803_v16, 0.0  ;;  %v7266_v13 = vld [vmem:[%s9630_s6 + $0x4] ss:$8 sps:$4 sm:$0xff]  }
 0x1a6   : > { %2187 = vmatmul.mubr.bf16.gmra.mxu1 %v1922_v14  ;;  %2435 = vmatmul.mubr.bf16.gmra.mxu0 %v1922_v14 }
 0x1a7   : > { %v1807_v21 = vadd.f32 %v1806_v20, %v1614_v18  ;;  %v1871_v22 = vmax.f32 %v1805_v17, 0.0 }
 0x1a9   : > { %v1872_v27 = vmax.f32 %v1807_v21, 0.0  ;;  %v1924_v29 = vpack.c.bf16 %v1871_v22, %v1869_v28 }
 0x1ab   : > { %v1925_v31 = vpack.c.bf16 %v1872_v27, %v1870_v24 }
 0x1ad   : > { %6200 = vmatprep.mubr.msk.bf16.mxu1 %vm1989_vm2, %v1925_v31  ;;  %6227 = vmatprep.mubr.msk.bf16.mxu0 %vm1989_vm2, %v1925_v31 }
 0x1ae   : > { %2195 = vmatmul.mubr.bf16.gmra.mxu1 %v1924_v29  ;;  %2443 = vmatmul.mubr.bf16.gmra.mxu0 %v1924_v29 }
 0x1af   : > { %2635 = vmatprep.mubr.bf16.mxu1 %v7263_v11  ;;  %2843 = vmatprep.mubr.bf16.mxu0 %v7266_v13 }
 0x1f6   : > { %v2076_v30 = vpop.f32.mrf.mxu1  ;;  %v2324_v32 = vpop.f32.mrf.mxu0 }
 0x1f7   : > { %v2451_v33 = vmax.f32 %v2076_v30, %v2324_v32 }
 0x1f8   : > { %v2078_v34 = vpop.f32.mrf.mxu1  ;;  %v2326_v35 = vpop.f32.mrf.mxu0 }
 0x1fa   : > { %v2079_v36 = vpop.f32.mrf.mxu1  ;;  %v2327_v37 = vpop.f32.mrf.mxu0 }
 0x1fb   : > { %v2452_v38 = vmax.f32 %v2079_v36, %v2327_v37 }
 0x1fc   : > { %v2081_v39 = vpop.f32.mrf.mxu1  ;;  %v2329_v40 = vpop.f32.mrf.mxu0 }
 0x1fd   : > { %v8153_v41 = vpack.c.bf16 %v2452_v38, %v2451_v33 }
 0x1fe   : > { %v2084_v42 = vpop.f32.mrf.mxu1  ;;  %v2332_v43 = vpop.f32.mrf.mxu0 }
 0x1ff   : > { %v2453_v44 = vmax.f32 %v2084_v42, %v2332_v43 }
 0x200   : > { %v2086_v45 = vpop.f32.mrf.mxu1  ;;  %v2334_v46 = vpop.f32.mrf.mxu0 }
 0x202   : > { %v2087_v47 = vpop.f32.mrf.mxu1  ;;  %v2335_v48 = vpop.f32.mrf.mxu0 }
 0x203   : > { %v2454_v49 = vmax.f32 %v2087_v47, %v2335_v48 }
 0x204   : > { %v2089_v50 = vpop.f32.mrf.mxu1  ;;  %v2337_v51 = vpop.f32.mrf.mxu0 }
 0x205   : > { %v8155_v52 = vpack.c.bf16 %v2454_v49, %v2453_v44 }
 0x206   : > { %v2092_v53 = vpop.f32.mrf.mxu1  ;;  %v2340_v54 = vpop.f32.mrf.mxu0 }
 0x207   : > { %v2455_v55 = vmax.f32 %v2092_v53, %v2340_v54 }
 0x208   : > { %v2094_v56 = vpop.f32.mrf.mxu1  ;;  %v2342_v57 = vpop.f32.mrf.mxu0 }
 0x20a   : > { %v2095_v58 = vpop.f32.mrf.mxu1  ;;  %v2343_v59 = vpop.f32.mrf.mxu0 }
 0x20b   : > { %v2456_v60 = vmax.f32 %v2095_v58, %v2343_v59 }
 0x20c   : > { %v2097_v61 = vpop.f32.mrf.mxu1  ;;  %v2345_v62 = vpop.f32.mrf.mxu0 }
 0x20d   : > { %v8157_v63 = vpack.c.bf16 %v2456_v60, %v2455_v55 }
 0x20e   : > { %v2100_v1 = vpop.f32.mrf.mxu1  ;;  %v2348_v2 = vpop.f32.mrf.mxu0 }
 0x20f   : > { %v2457_v3 = vmax.f32 %v2100_v1, %v2348_v2 }
 0x210   : > { %v2102_v4 = vpop.f32.mrf.mxu1  ;;  %v2350_v5 = vpop.f32.mrf.mxu0 }
 0x212   : > { %v2103_v6 = vpop.f32.mrf.mxu1  ;;  %v2351_v7 = vpop.f32.mrf.mxu0 }
 0x213   : > { %v2458_v8 = vmax.f32 %v2103_v6, %v2351_v7 }
 0x214   : > { %v2105_v9 = vpop.f32.mrf.mxu1  ;;  %v2353_v10 = vpop.f32.mrf.mxu0 }
 0x215   : > { %v8162_v12 = vpack.c.bf16 %v2458_v8, %v2457_v3 }
 0x216   : > { %v2108_v14 = vpop.f32.mrf.mxu1  ;;  %v2356_v15 = vpop.f32.mrf.mxu0 }
 0x217   : > { %v2459_v16 = vmax.f32 %v2108_v14, %v2356_v15 }
 0x218   : > { %v2110_v17 = vpop.f32.mrf.mxu1  ;;  %v2358_v18 = vpop.f32.mrf.mxu0 }
 0x21a   : > { %v2111_v19 = vpop.f32.mrf.mxu1  ;;  %v2359_v20 = vpop.f32.mrf.mxu0 }
 0x21b   : > { %v2460_v21 = vmax.f32 %v2111_v19, %v2359_v20 }
 0x21c   : > { %v2113_v22 = vpop.f32.mrf.mxu1  ;;  %v2361_v24 = vpop.f32.mrf.mxu0 }
 0x21d   : > { %v8167_v27 = vpack.c.bf16 %v2460_v21, %v2459_v16 }
 0x21e   : > { %v2116_v28 = vpop.f32.mrf.mxu1  ;;  %v2364_v31 = vpop.f32.mrf.mxu0 }
 0x21f   : > { %v2461_v29 = vmax.f32 %v2116_v28, %v2364_v31 }
 0x220   : > { %v2118_v30 = vpop.f32.mrf.mxu1  ;;  %v2366_v32 = vpop.f32.mrf.mxu0 }
 0x222   : > { %v2119_v33 = vpop.f32.mrf.mxu1  ;;  %v2367_v34 = vpop.f32.mrf.mxu0 }
 0x223   : > { %v2462_v35 = vmax.f32 %v2119_v33, %v2367_v34 }
 0x224   : > { %v2121_v36 = vpop.f32.mrf.mxu1  ;;  %v2369_v37 = vpop.f32.mrf.mxu0 }
 0x225   : > { %v8169_v38 = vpack.c.bf16 %v2462_v35, %v2461_v29 }
 0x226   : > { %v2124_v39 = vpop.f32.mrf.mxu1  ;;  %v2372_v40 = vpop.f32.mrf.mxu0 }
 0x227   : > { %v2463_v42 = vmax.f32 %v2124_v39, %v2372_v40 }
 0x228   : > { %v2126_v43 = vpop.f32.mrf.mxu1  ;;  %v2374_v44 = vpop.f32.mrf.mxu0 }
 0x22a   : > { %v2127_v45 = vpop.f32.mrf.mxu1  ;;  %v2375_v46 = vpop.f32.mrf.mxu0 }
 0x22b   : > { %v2464_v47 = vmax.f32 %v2127_v45, %v2375_v46 }
 0x22c   : > { %v2129_v48 = vpop.f32.mrf.mxu1  ;;  %v2377_v49 = vpop.f32.mrf.mxu0 }
 0x22d   : > { %v8171_v50 = vpack.c.bf16 %v2464_v47, %v2463_v42 }
 0x22e   : > { %v2132_v51 = vpop.f32.mrf.mxu1  ;;  %v2380_v53 = vpop.f32.mrf.mxu0 }
 0x22f   : > { %v2465_v54 = vmax.f32 %v2132_v51, %v2380_v53 }
 0x230   : > { %v2134_v55 = vpop.f32.mrf.mxu1  ;;  %v2382_v56 = vpop.f32.mrf.mxu0 }
 0x232   : > { %v2135_v57 = vpop.f32.mrf.mxu1  ;;  %v2383_v58 = vpop.f32.mrf.mxu0 }
 0x233   : > { %v2466_v59 = vmax.f32 %v2135_v57, %v2383_v58 }
 0x234   : > { %v2137_v60 = vpop.f32.mrf.mxu1  ;;  %v2385_v61 = vpop.f32.mrf.mxu0 }
 0x235   : > { %v8173_v62 = vpack.c.bf16 %v2466_v59, %v2465_v54 }
 0x236   : > { %v2140_v1 = vpop.f32.mrf.mxu1  ;;  %v2388_v2 = vpop.f32.mrf.mxu0 }
 0x237   : > { %v2467_v3 = vmax.f32 %v2140_v1, %v2388_v2 }
 0x238   : > { %v2142_v4 = vpop.f32.mrf.mxu1  ;;  %v2390_v5 = vpop.f32.mrf.mxu0 }
 0x23a   : > { %v2143_v6 = vpop.f32.mrf.mxu1  ;;  %v2391_v7 = vpop.f32.mrf.mxu0 }
 0x23b   : > { %v2468_v8 = vmax.f32 %v2143_v6, %v2391_v7 }
 0x23c   : > { %v2145_v9 = vpop.f32.mrf.mxu1  ;;  %v2393_v10 = vpop.f32.mrf.mxu0 }
 0x23d   : > { %v8175_v11 = vpack.c.bf16 %v2468_v8, %v2467_v3 }
 0x23e   : > { %v2148_v13 = vpop.f32.mrf.mxu1  ;;  %v2396_v14 = vpop.f32.mrf.mxu0 }
 0x23f   : > { %v2469_v15 = vmax.f32 %v2148_v13, %v2396_v14 }
 0x240   : > { %v2150_v16 = vpop.f32.mrf.mxu1  ;;  %v2398_v17 = vpop.f32.mrf.mxu0 }
 0x242   : > { %v2151_v18 = vpop.f32.mrf.mxu1  ;;  %v2399_v19 = vpop.f32.mrf.mxu0 }
 0x243   : > { %v2470_v20 = vmax.f32 %v2151_v18, %v2399_v19 }
 0x244   : > { %v2153_v21 = vpop.f32.mrf.mxu1  ;;  %v2401_v22 = vpop.f32.mrf.mxu0 }
 0x245   : > { %v8177_v24 = vpack.c.bf16 %v2470_v20, %v2469_v15 }
 0x246   : > { %v8179_v28 = vpop.f32.mrf.mxu1  ;;  %v8181_v31 = vpop.f32.mrf.mxu0 }
 0x248   : > { %v2158_v29 = vpop.f32.mrf.mxu1  ;;  %v2406_v30 = vpop.f32.mrf.mxu0 }
 0x24a   : > { %v8183_v32 = vpop.f32.mrf.mxu1  ;;  %v8185_v33 = vpop.f32.mrf.mxu0 }
 0x24c   : > { %v2161_v34 = vpop.f32.mrf.mxu1  ;;  %v2409_v35 = vpop.f32.mrf.mxu0 }
 0x24e   : > { %v8187_v36 = vpop.f32.mrf.mxu1  ;;  %v8189_v37 = vpop.f32.mrf.mxu0 }
 0x250   : > { %v2166_v39 = vpop.f32.mrf.mxu1  ;;  %v2414_v40 = vpop.f32.mrf.mxu0 }
 0x252   : > { %v8191_v42 = vpop.f32.mrf.mxu1  ;;  %v8193_v43 = vpop.f32.mrf.mxu0 }
 0x254   : > { %v2169_v44 = vpop.f32.mrf.mxu1  ;;  %v2417_v45 = vpop.f32.mrf.mxu0 }
 0x256   : > { %v2172_v46 = vpop.f32.mrf.mxu1  ;;  %v2420_v47 = vpop.f32.mrf.mxu0 }
 0x258   : > { %v2174_v48 = vpop.f32.mrf.mxu1  ;;  %v2422_v49 = vpop.f32.mrf.mxu0 }
 0x259   : > { %v2475_v48 = vmax.f32 %v2172_v46, %v2420_v47  ;;  %v2474_v49 = vmax.f32 %v8191_v42, %v8193_v43  ;;  %v2471_v42 = vmax.f32 %v8179_v28, %v8181_v31  ;;  %v7317_v31 = vld [vmem:[%s9631_s7 + $0x44] ss:$8 sps:$4 sm:$0xff]   ;;  %v7318_v47 = vld [vmem:[%s9631_s7 + $0x30] ss:$8 sps:$4 sm:$0xff]  }
 0x25a   : > { %v2175_v51 = vpop.f32.mrf.mxu1  ;;  %v2423_v53 = vpop.f32.mrf.mxu0  ;;  %v7278_v46 = vld [vmem:[%s9630_s6 + $0x24] ss:$8 sps:$4 sm:$0xff]  }
 0x25b   : > { %v2476_v44 = vmax.f32 %v2175_v51, %v2423_v53  ;;  %v2472_v51 = vmax.f32 %v8183_v32, %v8185_v33  ;;  %v7320_v32 = vld [vmem:[%s9631_s7 + $0x34] ss:$8 sps:$4 sm:$0xff]   ;;  %v7267_v33 = vld [vmem:[%s9677_s5 + $0x10] ss:$8 sps:$4 sm:$0xff]   ;;  %v7273_v53 = vld [vmem:[%s9677_s5 + $0x20] ss:$8 sps:$4 sm:$0xff]  }
 0x25c   : > { %v2177_v54 = vpop.f32.mrf.mxu1  ;;  %v2425_v55 = vpop.f32.mrf.mxu0 }
 0x25d   : > { %v2512_v54 = vpack.c.bf16 %v2476_v44, %v2475_v48  ;;  %v2510_v43 = vpack.c.bf16 %v2472_v51, %v2471_v42  ;;  %v7276_v55 = vld [vmem:[%s9630_s6 + $0x20] ss:$8 sps:$4 sm:$0xff]   ;;  %v7328_v44 = vld [vmem:[%s9631_s7 + $0x14] ss:$8 sps:$4 sm:$0xff]  }
 0x25e   : > { %v2180_v56 = vpop.f32.mrf.mxu1  ;;  %v2428_v57 = vpop.f32.mrf.mxu0  ;;  %v7331_v48 = vld [vmem:[%s9631_s7 + $0x9c] ss:$8 sps:$4 sm:$0xff]   ;;  %v7337_v51 = vld [vmem:[%s9631_s7 + $0x8c] ss:$8 sps:$4 sm:$0xff]  }
 0x25f   : > { %v2477_v40 = vmax.f32 %v2180_v56, %v2428_v57  ;;  %v7281_v56 = vld [vmem:[%s9677_s5 + $0x34] ss:$8 sps:$4 sm:$0xff]  }
 0x260   : > { %v2182_v58 = vpop.f32.mrf.mxu1  ;;  %v2430_v59 = vpop.f32.mrf.mxu0  ;;  %v7284_v57 = vld [vmem:[%s9630_s6 + $0x34] ss:$8 sps:$4 sm:$0xff]  }
 0x261   : > { %v7279_v58 = vld [vmem:[%s9677_s5 + $0x30] ss:$8 sps:$4 sm:$0xff]   ;;  %v7340_v42 = vld [vmem:[%s9631_s7 + $0x7c] ss:$8 sps:$4 sm:$0xff]  }
 0x262   : > { %v2183_v60 = vpop.f32.mrf.mxu1  ;;  %v2431_v61 = vpop.f32.mrf.mxu0  ;;  %v7282_v59 = vld [vmem:[%s9630_s6 + $0x30] ss:$8 sps:$4 sm:$0xff]  }
 0x263   : > { %v2478_v35 = vmax.f32 %v2183_v60, %v2431_v61  ;;  %v7287_v60 = vld [vmem:[%s9677_s5 + $0x44] ss:$8 sps:$4 sm:$0xff]  }
 0x264   : > { %v2185_v1 = vpop.f32.mrf.mxu1  ;;  %v2433_v2 = vpop.f32.mrf.mxu0  ;;  %v7290_v61 = vld [vmem:[%s9630_s6 + $0x44] ss:$8 sps:$4 sm:$0xff]  }
 0x265   : > { %v2513_v45 = vpack.c.bf16 %v2478_v35, %v2477_v40  ;;  %v7285_v1 = vld [vmem:[%s9677_s5 + $0x40] ss:$8 sps:$4 sm:$0xff]  }
 0x266   : > { %v2188_v3 = vpop.f32.mrf.mxu1  ;;  %v2436_v4 = vpop.f32.mrf.mxu0  ;;  %v7288_v2 = vld [vmem:[%s9630_s6 + $0x40] ss:$8 sps:$4 sm:$0xff]  }
 0x267   : > { %v2479_v30 = vmax.f32 %v2188_v3, %v2436_v4  ;;  %v7293_v3 = vld [vmem:[%s9677_s5 + $0x54] ss:$8 sps:$4 sm:$0xff]  }
 0x268   : > { %v2190_v5 = vpop.f32.mrf.mxu1  ;;  %v2438_v6 = vpop.f32.mrf.mxu0  ;;  %v7296_v4 = vld [vmem:[%s9630_s6 + $0x54] ss:$8 sps:$4 sm:$0xff]  }
 0x269   : > { %v7291_v5 = vld [vmem:[%s9677_s5 + $0x50] ss:$8 sps:$4 sm:$0xff]  }
 0x26a   : > { %v2191_v7 = vpop.f32.mrf.mxu1  ;;  %v2439_v8 = vpop.f32.mrf.mxu0  ;;  %v7294_v6 = vld [vmem:[%s9630_s6 + $0x50] ss:$8 sps:$4 sm:$0xff]  }
 0x26b   : > { %v2480_v19 = vmax.f32 %v2191_v7, %v2439_v8  ;;  %v7299_v7 = vld [vmem:[%s9677_s5 + $0x64] ss:$8 sps:$4 sm:$0xff]  }
 0x26c   : > { %v2193_v9 = vpop.f32.mrf.mxu1  ;;  %v2441_v10 = vpop.f32.mrf.mxu0  ;;  %v7302_v8 = vld [vmem:[%s9630_s6 + $0x64] ss:$8 sps:$4 sm:$0xff]  }
 0x26d   : > { %v2514_v39 = vpack.c.bf16 %v2480_v19, %v2479_v30  ;;  %v7297_v9 = vld [vmem:[%s9677_s5 + $0x60] ss:$8 sps:$4 sm:$0xff]  }
 0x26e   : > { %v2196_v13 = vpop.f32.mrf.mxu1  ;;  %v2444_v14 = vpop.f32.mrf.mxu0  ;;  %v7300_v10 = vld [vmem:[%s9630_s6 + $0x60] ss:$8 sps:$4 sm:$0xff]  }
 0x26f   : > { %v2481_v20 = vmax.f32 %v2196_v13, %v2444_v14  ;;  %v7305_v13 = vld [vmem:[%s9677_s5 + $0x74] ss:$8 sps:$4 sm:$0xff]   ;;  %v6295_v30 = vld [vmem:[%s9631_s7 + $0xa8] sm:$0x33] }
 0x270   : > { %v2198_v15 = vpop.f32.mrf.mxu1  ;;  %v2446_v16 = vpop.f32.mrf.mxu0  ;;  %v7308_v14 = vld [vmem:[%s9630_s6 + $0x74] ss:$8 sps:$4 sm:$0xff]   ;;  %v6307_v35 = vcombine.high %v6295_v30, %v6295_v30 }
 0x271   : > { %v2499_v15 = vld [vmem:[%s9677_s5 + $0x80] sm:$0xff] }
 0x272   : > { %v2199_v17 = vpop.f32.mrf.mxu1  ;;  %v2447_v18 = vpop.f32.mrf.mxu0  ;;  %v2723_v16 = vld [vmem:[%s9630_s6 + $0x80] sm:$0xff]  ;;  %v6245_v19 = vcombine.high %v2499_v15, %v2499_v15 }
 0x273   : > { %v2482_v21 = vmax.f32 %v2199_v17, %v2447_v18  ;;  %v7303_v17 = vld [vmem:[%s9677_s5 + $0x70] ss:$8 sps:$4 sm:$0xff]  }
 0x274   : > { %v2201_v22 = vpop.f32.mrf.mxu1  ;;  %v2449_v29 = vpop.f32.mrf.mxu0  ;;  %v7306_v18 = vld [vmem:[%s9630_s6 + $0x70] ss:$8 sps:$4 sm:$0xff]  }
 0x275   : > { %v2515_v34 = vpack.c.bf16 %v2482_v21, %v2481_v20  ;;  %v6263_v20 = vcombine.high %v2723_v16, %v2723_v16  ;;  %v6244_v21 = vcombine.low %v2499_v15, %v2499_v15  ;;  %v6262_v22 = vcombine.low %v2723_v16, %v2723_v16  ;;  %v7323_v29 = vld [vmem:[%s9631_s7 + $0x24] ss:$8 sps:$4 sm:$0xff]   ;;  %v7349_v15 = vld [vmem:[%s9631_s7 + $0xf0] ss:$8 sps:$4 sm:$0xff]  }
 0x277   : > { %6569 = vmatprep.subr.bf16.mxu1 %v2515_v34  ;;  %6639 = vmatprep.subr.bf16.mxu0 %v2515_v34  ;;  %v7321_v34 = vld [vmem:[%s9631_s7 + $0x20] ss:$8 sps:$4 sm:$0xff]  }
 0x278   : > { %6570 = vmatpush3.bf16.msra.mxu1 %v8173_v62  ;;  %6640 = vmatpush3.bf16.msra.mxu0 %v8173_v62  ;;  %v2473_v62 = vmax.f32 %v8187_v36, %v8189_v37  ;;  %v7270_v36 = vld [vmem:[%s9630_s6 + $0x10] ss:$8 sps:$4 sm:$0xff]   ;;  %v7275_v37 = vld [vmem:[%s9677_s5 + $0x24] ss:$8 sps:$4 sm:$0xff]  }
 0x279   : > { %6571 = vmatprep.subr.bf16.mxu1 %v2514_v39  ;;  %6641 = vmatprep.subr.bf16.mxu0 %v2514_v39  ;;  %v6306_v39 = vcombine.low %v6295_v30, %v6295_v30 }
 0x27b   : > { %v3349_v40 = vsel %vm3032_vm3, %v6306_v39, 0 }
 0x27c   : > { %6572 = vmatpush3.bf16.msra.mxu1 %v8171_v50  ;;  %6642 = vmatpush3.bf16.msra.mxu0 %v8171_v50  ;;  %v2511_v50 = vpack.c.bf16 %v2474_v49, %v2473_v62  ;;  %v7329_v49 = vld [vmem:[%s9631_s7 + $0x98] ss:$8 sps:$4 sm:$0xff]  }
 0x27d   : > { %6573 = vmatprep.subr.bf16.mxu1 %v2513_v45  ;;  %6643 = vmatprep.subr.bf16.mxu0 %v2513_v45  ;;  %v7326_v45 = vld [vmem:[%s9631_s7 + $0x10] ss:$8 sps:$4 sm:$0xff]   ;;  %v7332_v62 = vld [vmem:[%s9631_s7] ss:$8 sps:$4 sm:$0xff]  }
 0x280   : > { %6574 = vmatpush3.bf16.msra.mxu1 %v8169_v38  ;;  %6644 = vmatpush3.bf16.msra.mxu0 %v8169_v38 }
 0x281   : > { %6575 = vmatprep.subr.bf16.mxu1 %v2512_v54  ;;  %6645 = vmatprep.subr.bf16.mxu0 %v2512_v54  ;;  %v7334_v54 = vld [vmem:[%s9631_s7 + $0x4] ss:$8 sps:$4 sm:$0xff]  }
 0x284   : > { %6576 = vmatpush3.bf16.msra.mxu1 %v8167_v27  ;;  %6646 = vmatpush3.bf16.msra.mxu0 %v8167_v27  ;;  %v2943_v27 = vld [vmem:[%s9631_s7 + $0x50] sm:$0x33] }
 0x285   : > { %6577 = vmatprep.subr.bf16.mxu1 %v2511_v50  ;;  %6647 = vmatprep.subr.bf16.mxu0 %v2511_v50  ;;  %v6274_v38 = vcombine.low %v2943_v27, %v2943_v27  ;;  %v7335_v50 = vld [vmem:[%s9631_s7 + $0x88] ss:$8 sps:$4 sm:$0xff]  }
 0x287   : > { %v3034_v28 = vsel %vm3032_vm3, %v6274_v38, 0  ;;  %v7346_v38 = vld [vmem:[%s9631_s7 + $0x5c] ss:$8 sps:$4 sm:$0xff]  }
 0x288   : > { %6578 = vmatpush3.bf16.msra.mxu1 %v8162_v12  ;;  %6648 = vmatpush3.bf16.msra.mxu0 %v8162_v12  ;;  %v6275_v12 = vcombine.high %v2943_v27, %v2943_v27  ;;  %v7343_v27 = vld [vmem:[%s9631_s7 + $0x6c] ss:$8 sps:$4 sm:$0xff]  }
 0x289   : > { %6579 = vmatprep.subr.bf16.mxu1 %v2510_v43  ;;  %6649 = vmatprep.subr.bf16.mxu0 %v2510_v43  ;;  %v7338_v43 = vld [vmem:[%s9631_s7 + $0x78] ss:$8 sps:$4 sm:$0xff]  }
 0x28c   : > { %6580 = vmatpush3.bf16.msra.mxu1 %v8157_v63  ;;  %6650 = vmatpush3.bf16.msra.mxu0 %v8157_v63  ;;  %v7261_v63 = vld [vmem:[%s9677_s5] ss:$8 sps:$4 sm:$0xff]  }
 0x28d   : > { %6581 = vmatprep.subr.bf16.mxu1 %v8177_v24  ;;  %6651 = vmatprep.subr.bf16.mxu0 %v8177_v24  ;;  %v7264_v24 = vld [vmem:[%s9630_s6] ss:$8 sps:$4 sm:$0xff]  }
 0x290   : > { %6582 = vmatpush3.bf16.msra.mxu1 %v8155_v52  ;;  %6652 = vmatpush3.bf16.msra.mxu0 %v8155_v52  ;;  %v7269_v52 = vld [vmem:[%s9677_s5 + $0x14] ss:$8 sps:$4 sm:$0xff]  }
 0x291   : > { %6583 = vmatprep.subr.bf16.mxu1 %v8175_v11  ;;  %6653 = vmatprep.subr.bf16.mxu0 %v8175_v11  ;;  %v7272_v11 = vld [vmem:[%s9630_s6 + $0x14] ss:$8 sps:$4 sm:$0xff]  }
 0x294   : > { %6584 = vmatpush3.bf16.msra.mxu1 %v8153_v41  ;;  %6654 = vmatpush3.bf16.msra.mxu0 %v8153_v41  ;;  %v7315_v41 = vld [vmem:[%s9631_s7 + $0x40] ss:$8 sps:$4 sm:$0xff]  }
 0x295   : > { %6276 = vmatprep.subr.msk.bf16.mxu1 %vm3032_vm3, %v6275_v12  ;;  %6308 = vmatprep.subr.msk.bf16.mxu0 %vm3032_vm3, %v6307_v35  ;;  %v7341_v12 = vld [vmem:[%s9631_s7 + $0x68] ss:$8 sps:$4 sm:$0xff]  }
 0x296   : > { %v7352_v35 = vld [vmem:[%s9631_s7 + $0xe0] ss:$8 sps:$4 sm:$0xff]  }
 0x297   : > { %2636 = vmatmul.mubr.bf16.vlgmr.msra.gmra.mxu1 %v7261_v63  ;;  %2844 = vmatmul.mubr.bf16.vlgmr.msra.gmra.mxu0 %v7264_v24  ;;  %v7344_v63 = vld [vmem:[%s9631_s7 + $0x58] ss:$8 sps:$4 sm:$0xff]  }
 0x298   : > { %2643 = vmatprep.mubr.bf16.mxu1 %v7269_v52  ;;  %2851 = vmatprep.mubr.bf16.mxu0 %v7272_v11  ;;  %v6327_v24 = vld [vmem:[%s9631_s7 + $0x100] sm:$0x33]  ;;  %v8398_v11 = vld [vmem:[%s9631_s7 + $0x158] sm:$0x33] }
 0x299   : > { %3044 = vmatpush1.bf16.msra.mxu1 %v3034_v28  ;;  %3359 = vmatpush1.bf16.msra.mxu0 %v3349_v40  ;;  %v6339_v52 = vcombine.high %v6327_v24, %v6327_v24  ;;  %v6371_v28 = vcombine.high %v8398_v11, %v8398_v11 }
 0x29a   : > { %3045 = vmatprep.subr.bf16.mxu1 %v7317_v31  ;;  %3360 = vmatprep.subr.bf16.mxu0 %v7331_v48 }
 0x29d   : > { %3046 = vmatpush1.bf16.msra.mxu1 %v7315_v41  ;;  %3361 = vmatpush1.bf16.msra.mxu0 %v7329_v49  ;;  %v6370_v49 = vcombine.low %v8398_v11, %v8398_v11 }
 0x29e   : > { %3047 = vmatprep.subr.bf16.mxu1 %v7320_v32  ;;  %3362 = vmatprep.subr.bf16.mxu0 %v7337_v51 }
 0x29f   : > { %2644 = vmatmul.mubr.bf16.gmra.mxu1 %v7267_v33  ;;  %2852 = vmatmul.mubr.bf16.gmra.mxu0 %v7270_v36 }
 0x2a0   : > { %2651 = vmatprep.mubr.bf16.mxu1 %v7275_v37  ;;  %2859 = vmatprep.mubr.bf16.mxu0 %v7278_v46 }
 0x2a1   : > { %3048 = vmatpush1.bf16.msra.mxu1 %v7318_v47  ;;  %3363 = vmatpush1.bf16.msra.mxu0 %v7335_v50 }
 0x2a2   : > { %3049 = vmatprep.subr.bf16.mxu1 %v7323_v29  ;;  %3364 = vmatprep.subr.bf16.mxu0 %v7340_v42 }
 0x2a5   : > { %3050 = vmatpush1.bf16.msra.mxu1 %v7321_v34  ;;  %3365 = vmatpush1.bf16.msra.mxu0 %v7338_v43 }
 0x2a6   : > { %3051 = vmatprep.subr.bf16.mxu1 %v7328_v44  ;;  %3366 = vmatprep.subr.bf16.mxu0 %v7343_v27  ;;  %v7357_v44 = vld [vmem:[%s9631_s7 + $0xd4] ss:$8 sps:$4 sm:$0xff]   ;;  %v7355_v27 = vld [vmem:[%s9631_s7 + $0xd0] ss:$8 sps:$4 sm:$0xff]  }
 0x2a7   : > { %2652 = vmatmul.mubr.bf16.gmra.mxu1 %v7273_v53  ;;  %2860 = vmatmul.mubr.bf16.gmra.mxu0 %v7276_v55 }
 0x2a8   : > { %2659 = vmatprep.mubr.bf16.mxu1 %v7281_v56  ;;  %2867 = vmatprep.mubr.bf16.mxu0 %v7284_v57 }
 0x2a9   : > { %3052 = vmatpush1.bf16.msra.mxu1 %v7326_v45  ;;  %3367 = vmatpush1.bf16.msra.mxu0 %v7341_v12 }
 0x2aa   : > { %3053 = vmatprep.subr.bf16.mxu1 %v7334_v54  ;;  %3368 = vmatprep.subr.bf16.mxu0 %v7346_v38 }
 0x2ad   : > { %3054 = vmatpush1.bf16.msra.mxu1 %v7332_v62  ;;  %3369 = vmatpush1.bf16.msra.mxu0 %v7344_v63 }
 0x2ae   : > { %6340 = vmatprep.subr.msk.bf16.mxu1 %vm3032_vm3, %v6339_v52  ;;  %6372 = vmatprep.subr.msk.bf16.mxu0 %vm3032_vm3, %v6371_v28 }
 0x2af   : > { %2660 = vmatmul.mubr.bf16.gmra.mxu1 %v7279_v58  ;;  %2868 = vmatmul.mubr.bf16.gmra.mxu0 %v7282_v59  ;;  %v6338_v58 = vcombine.low %v6327_v24, %v6327_v24 }
 0x2b0   : > { %2667 = vmatprep.mubr.bf16.mxu1 %v7287_v60  ;;  %2875 = vmatprep.mubr.bf16.mxu0 %v7290_v61 }
 0x2b7   : > { %2668 = vmatmul.mubr.bf16.gmra.mxu1 %v7285_v1  ;;  %2876 = vmatmul.mubr.bf16.gmra.mxu0 %v7288_v2 }
 0x2b8   : > { %2675 = vmatprep.mubr.bf16.mxu1 %v7293_v3  ;;  %2883 = vmatprep.mubr.bf16.mxu0 %v7296_v4 }
 0x2bf   : > { %2676 = vmatmul.mubr.bf16.gmra.mxu1 %v7291_v5  ;;  %2884 = vmatmul.mubr.bf16.gmra.mxu0 %v7294_v6  ;;  %v3618_v5 = vsel %vm3032_vm3, %v6338_v58, 0  ;;  %v7351_v6 = vld [vmem:[%s9631_s7 + $0xf4] ss:$8 sps:$4 sm:$0xff]   ;;  %v7363_v58 = vld [vmem:[%s9631_s7 + $0x148] ss:$8 sps:$4 sm:$0xff]  }
 0x2c0   : > { %2683 = vmatprep.mubr.bf16.mxu1 %v7299_v7  ;;  %2891 = vmatprep.mubr.bf16.mxu0 %v7302_v8 }
 0x2c7   : > { %2684 = vmatmul.mubr.bf16.gmra.mxu1 %v7297_v9  ;;  %2892 = vmatmul.mubr.bf16.gmra.mxu0 %v7300_v10 }
 0x2c8   : > { %2691 = vmatprep.mubr.bf16.mxu1 %v7305_v13  ;;  %2899 = vmatprep.mubr.bf16.mxu0 %v7308_v14 }
 0x2cf   : > { %2692 = vmatmul.mubr.bf16.gmra.mxu1 %v7303_v17  ;;  %2900 = vmatmul.mubr.bf16.gmra.mxu0 %v7306_v18 }
 0x2d0   : > { %2699 = vmatprep.mubr.bf16.mxu1 %v6245_v19  ;;  %2907 = vmatprep.mubr.bf16.mxu0 %v6263_v20  ;;  %v7354_v19 = vld [vmem:[%s9631_s7 + $0xe4] ss:$8 sps:$4 sm:$0xff]  }
 0x2d7   : > { %2700 = vmatmul.mubr.bf16.gmra.mxu1 %v6244_v21  ;;  %2908 = vmatmul.mubr.bf16.gmra.mxu0 %v6262_v22 }
 0x2d8   : > { %3071 = vmatprep.mubr.bf16.mxu1 %v7529_v0  ;;  %3386 = vmatprep.mubr.bf16.mxu0 %v7529_v0 }
 0x357   : > { %v6585_v31 = vpop.f32.mrf.mxu1  ;;  %v6655_v41 = vpop.f32.mrf.mxu0 }
 0x359   : > { %v6586_v32 = vpop.f32.mrf.mxu1  ;;  %v6656_v33 = vpop.f32.mrf.mxu0 }
 0x35a   : > { %v6587_v46 = vadd.f32 %v6586_v32, %v6585_v31  ;;  %v6657_v47 = vadd.f32 %v6656_v33, %v6655_v41  ;;  %v3898_v41 = vsel %vm3032_vm3, %v6370_v49, 0  ;;  %v7362_v32 = vld [vmem:[%s9631_s7 + $0xc4] ss:$8 sps:$4 sm:$0xff]   ;;  %v7372_v49 = vld [vmem:[%s9631_s7 + $0x128] ss:$8 sps:$4 sm:$0xff]  }
 0x35b   : > { %v6588_v36 = vpop.f32.mrf.mxu1  ;;  %v6658_v37 = vpop.f32.mrf.mxu0  ;;  %v7365_v33 = vld [vmem:[%s9631_s7 + $0x14c] ss:$8 sps:$4 sm:$0xff]  }
 0x35c   : > { %v2915_v61 = vmax.f32 %v6587_v46, %v6657_v47 }
 0x35d   : > { %v6589_v53 = vpop.f32.mrf.mxu1  ;;  %v6659_v55 = vpop.f32.mrf.mxu0 }
 0x35e   : > { %v6590_v56 = vadd.f32 %v6589_v53, %v6588_v36  ;;  %v6660_v57 = vadd.f32 %v6659_v55, %v6658_v37 }
 0x35f   : > { %v6591_v59 = vpop.f32.mrf.mxu1  ;;  %v6661_v60 = vpop.f32.mrf.mxu0 }
 0x360   : > { %v2916_v1 = vmax.f32 %v6590_v56, %v6660_v57  ;;  %v7360_v56 = vld [vmem:[%s9631_s7 + $0xc0] ss:$8 sps:$4 sm:$0xff]  }
 0x361   : > { %v6592_v2 = vpop.f32.mrf.mxu1  ;;  %v6662_v3 = vpop.f32.mrf.mxu0 }
 0x362   : > { %v8403_v4 = vpack.c.bf16 %v2916_v1, %v2915_v61  ;;  %v6593_v9 = vadd.f32 %v6592_v2, %v6591_v59  ;;  %v6663_v10 = vadd.f32 %v6662_v3, %v6661_v60  ;;  %v7368_v59 = vld [vmem:[%s9631_s7 + $0xb4] ss:$8 sps:$4 sm:$0xff]  }
 0x363   : > { %v6594_v7 = vpop.f32.mrf.mxu1  ;;  %v6664_v8 = vpop.f32.mrf.mxu0  ;;  %v7371_v1 = vld [vmem:[%s9631_s7 + $0x13c] ss:$8 sps:$4 sm:$0xff]  }
 0x364   : > { %6277 = vmatmul.mubr.msk.bf16.vlgmr.msra.gmra.mxu1 %vm3007_vm4, %v8403_v4  ;;  %v3211_v16 = vshll.u32 %v8403_v4, 16  ;;  %v2917_v22 = vmax.f32 %v6593_v9, %v6663_v10  ;;  %v3209_v51 = vshrl.u32 %v8403_v4, 16  ;;  %v4061_v12 = vrot.slane %v8403_v4, 2  ;;  %v7366_v10 = vld [vmem:[%s9631_s7 + $0xb0] ss:$8 sps:$4 sm:$0xff]  }
 0x365   : > { %v6595_v13 = vpop.f32.mrf.mxu1  ;;  %v6665_v14 = vpop.f32.mrf.mxu0  ;;  %3081 = vmatprep.mubr.bf16.mxu1 %v7529_v0  ;;  %3628 = vmatpush1.bf16.msra.mxu1 %v3618_v5 }
 0x366   : > { %v6596_v17 = vadd.f32 %v6595_v13, %v6594_v7  ;;  %v6666_v18 = vadd.f32 %v6665_v14, %v6664_v8  ;;  %3629 = vmatprep.subr.bf16.mxu1 %v7351_v6  ;;  %v3213_v40 = vrot.slane %v3211_v16, 1  ;;  %v8479_v7 = vld [vmem:[%s9631_s7 + $0x1b0] sm:$0x33] }
 0x367   : > { %v6597_v20 = vpop.f32.mrf.mxu1  ;;  %v6667_v21 = vpop.f32.mrf.mxu0 }
 0x368   : > { %v2918_v29 = vmax.f32 %v6596_v17, %v6666_v18  ;;  %v3214_v52 = vor.u32 %v3213_v40, %v3209_v51 }
 0x369   : > { %v6598_v30 = vpop.f32.mrf.mxu1  ;;  %v6668_v34 = vpop.f32.mrf.mxu0  ;;  %3630 = vmatpush1.bf16.msra.mxu1 %v7349_v15 }
 0x36a   : > { %v8422_v39 = vpack.c.bf16 %v2918_v29, %v2917_v22  ;;  %3631 = vmatprep.subr.bf16.mxu1 %v7354_v19  ;;  %v6599_v54 = vadd.f32 %v6598_v30, %v6597_v20  ;;  %v6669_v62 = vadd.f32 %v6668_v34, %v6667_v21  ;;  %v7369_v19 = vld [vmem:[%s9631_s7 + $0x138] ss:$8 sps:$4 sm:$0xff]   ;;  %v7374_v22 = vld [vmem:[%s9631_s7 + $0x12c] ss:$8 sps:$4 sm:$0xff]   ;;  %v6403_v29 = vcombine.high %v8479_v7, %v8479_v7 }
 0x36b   : > { %v6600_v45 = vpop.f32.mrf.mxu1  ;;  %v6670_v48 = vpop.f32.mrf.mxu0 }
 0x36c   : > { %6278 = vmatmul.mubr.msk.bf16.gmra.mxu1 %vm3007_vm4, %v8422_v39  ;;  %v3215_v50 = vshll.u32 %v8422_v39, 16  ;;  %v4062_v38 = vrot.slane %v8422_v39, 2  ;;  %v2919_v37 = vmax.f32 %v6599_v54, %v6669_v62  ;;  %v3219_v5 = vshrl.u32 %v8422_v39, 16 }
 0x36d   : > { %v6601_v42 = vpop.f32.mrf.mxu1  ;;  %v6671_v43 = vpop.f32.mrf.mxu0  ;;  %3091 = vmatprep.mubr.bf16.mxu1 %v7529_v0  ;;  %3632 = vmatpush1.bf16.msra.mxu1 %v7352_v35 }
 0x36e   : > { %v6602_v63 = vadd.f32 %v6601_v42, %v6600_v45  ;;  %v6672_v24 = vadd.f32 %v6671_v43, %v6670_v48  ;;  %v3217_v11 = vrot.slane %v3215_v50, 1  ;;  %3633 = vmatprep.subr.bf16.mxu1 %v7357_v44  ;;  %v8453_v36 = vsel %vm4060_vm5, %v4061_v12, %v4062_v38  ;;  %v7377_v42 = vld [vmem:[%s9631_s7 + $0x11c] ss:$8 sps:$4 sm:$0xff]  }
 0x36f   : > { %v6603_v28 = vpop.f32.mrf.mxu1  ;;  %v6673_v31 = vpop.f32.mrf.mxu0 }
 0x370   : > { %v2920_v46 = vmax.f32 %v6602_v63, %v6672_v24  ;;  %v3218_v47 = vsel %vm3208_vm6, %v3214_v52, %v3217_v11  ;;  %v3221_v17 = vor.u32 %v3219_v5, %v3217_v11 }
 0x371   : > { %v6604_v53 = vpop.f32.mrf.mxu1  ;;  %v6674_v55 = vpop.f32.mrf.mxu0  ;;  %6309 = vmatmul.mubr.msk.bf16.vlgmr.msra.gmra.mxu0 %vm3007_vm4, %v3218_v47  ;;  %3634 = vmatpush1.bf16.msra.mxu1 %v7355_v27 }
 0x372   : > { %v8460_v57 = vpack.c.bf16 %v2920_v46, %v2919_v37  ;;  %3396 = vmatprep.mubr.bf16.mxu0 %v7529_v0  ;;  %3908 = vmatpush1.bf16.msra.mxu0 %v3898_v41  ;;  %v6605_v2 = vadd.f32 %v6604_v53, %v6603_v28  ;;  %v6675_v3 = vadd.f32 %v6674_v55, %v6673_v31  ;;  %v7380_v46 = vld [vmem:[%s9631_s7 + $0x10c] ss:$8 sps:$4 sm:$0xff]  }
 0x373   : > { %v6606_v60 = vpop.f32.mrf.mxu1  ;;  %v6676_v61 = vpop.f32.mrf.mxu0  ;;  %3635 = vmatprep.subr.bf16.mxu1 %v7362_v32  ;;  %3909 = vmatprep.subr.bf16.mxu0 %v7365_v33  ;;  %v7375_v32 = vld [vmem:[%s9631_s7 + $0x118] ss:$8 sps:$4 sm:$0xff]  }
 0x374   : > { %6279 = vmatmul.mubr.msk.bf16.gmra.mxu1 %vm3007_vm4, %v8460_v57  ;;  %v3222_v6 = vshll.u32 %v8460_v57, 16  ;;  %v4064_v13 = vrot.slane %v8460_v57, 2  ;;  %v2921_v34 = vmax.f32 %v6605_v2, %v6675_v3  ;;  %v3226_v12 = vshrl.u32 %v8460_v57, 16 }
 0x375   : > { %v6607_v8 = vpop.f32.mrf.mxu1  ;;  %v6677_v9 = vpop.f32.mrf.mxu0  ;;  %3101 = vmatprep.mubr.bf16.mxu1 %v7529_v0  ;;  %3636 = vmatpush1.bf16.msra.mxu1 %v7360_v56 }
 0x376   : > { %v6608_v14 = vadd.f32 %v6607_v8, %v6606_v60  ;;  %v6678_v15 = vadd.f32 %v6677_v9, %v6676_v61  ;;  %v3224_v18 = vrot.slane %v3222_v6, 1  ;;  %3910 = vmatpush1.bf16.msra.mxu0 %v7363_v58  ;;  %3637 = vmatprep.subr.bf16.mxu1 %v7368_v59  ;;  %v8499_v30 = vsel %vm4060_vm5, %v4062_v38, %v4064_v13  ;;  %v7378_v61 = vld [vmem:[%s9631_s7 + $0x108] ss:$8 sps:$4 sm:$0xff]  }
 0x377   : > { %v6609_v20 = vpop.f32.mrf.mxu1  ;;  %v6679_v21 = vpop.f32.mrf.mxu0  ;;  %3911 = vmatprep.subr.bf16.mxu0 %v7371_v1 }
 0x378   : > { %v2922_v35 = vmax.f32 %v6608_v14, %v6678_v15  ;;  %v3225_v40 = vsel %vm3208_vm6, %v3221_v17, %v3224_v18  ;;  %v3228_v31 = vor.u32 %v3226_v12, %v3224_v18 }
 0x379   : > { %v6610_v44 = vpop.f32.mrf.mxu1  ;;  %v6680_v45 = vpop.f32.mrf.mxu0  ;;  %6310 = vmatmul.mubr.msk.bf16.gmra.mxu0 %vm3007_vm4, %v3225_v40  ;;  %3638 = vmatpush1.bf16.msra.mxu1 %v7366_v10 }
 0x37a   : > { %v8503_v48 = vpack.c.bf16 %v2922_v35, %v2921_v34  ;;  %3406 = vmatprep.mubr.bf16.mxu0 %v7529_v0  ;;  %3912 = vmatpush1.bf16.msra.mxu0 %v7369_v19  ;;  %v6611_v43 = vadd.f32 %v6610_v44, %v6609_v20  ;;  %v6681_v27 = vadd.f32 %v6680_v45, %v6679_v21 }
 0x37b   : > { %v6612_v54 = vpop.f32.mrf.mxu1  ;;  %v6682_v62 = vpop.f32.mrf.mxu0  ;;  %3913 = vmatprep.subr.bf16.mxu0 %v7374_v22  ;;  %6404 = vmatprep.subr.msk.bf16.mxu1 %vm3032_vm3, %v6403_v29 }
 0x37c   : > { %6280 = vmatmul.mubr.msk.bf16.gmra.mxu1 %vm3007_vm4, %v8503_v48  ;;  %v3229_v38 = vshll.u32 %v8503_v48, 16  ;;  %v4066_v52 = vrot.slane %v8503_v48, 2  ;;  %v2923_v53 = vmax.f32 %v6611_v43, %v6681_v27  ;;  %v3233_v9 = vshrl.u32 %v8503_v48, 16 }
 0x37d   : > { %v6613_v63 = vpop.f32.mrf.mxu1  ;;  %v6683_v24 = vpop.f32.mrf.mxu0  ;;  %3111 = vmatprep.mubr.bf16.mxu1 %v7529_v0 }
 0x37e   : > { %v6614_v11 = vadd.f32 %v6613_v63, %v6612_v54  ;;  %v6684_v28 = vadd.f32 %v6683_v24, %v6682_v62  ;;  %v3231_v41 = vrot.slane %v3229_v38, 1  ;;  %3914 = vmatpush1.bf16.msra.mxu0 %v7372_v49  ;;  %v8530_v47 = vsel %vm4060_vm5, %v4064_v13, %v4066_v52 }
 0x37f   : > { %v6615_v33 = vpop.f32.mrf.mxu1  ;;  %v6685_v37 = vpop.f32.mrf.mxu0  ;;  %3915 = vmatprep.subr.bf16.mxu0 %v7377_v42 }
 0x380   : > { %v2924_v55 = vmax.f32 %v6614_v11, %v6684_v28  ;;  %v3232_v56 = vsel %vm3208_vm6, %v3228_v31, %v3231_v41  ;;  %v3235_v19 = vor.u32 %v3233_v9, %v3231_v41 }
 0x381   : > { %v6616_v58 = vpop.f32.mrf.mxu1  ;;  %v6686_v59 = vpop.f32.mrf.mxu0  ;;  %6311 = vmatmul.mubr.msk.bf16.gmra.mxu0 %vm3007_vm4, %v3232_v56 }
 0x382   : > { %v8534_v60 = vpack.c.bf16 %v2924_v55, %v2923_v53  ;;  %3416 = vmatprep.mubr.bf16.mxu0 %v7529_v0  ;;  %3916 = vmatpush1.bf16.msra.mxu0 %v7375_v32  ;;  %v6617_v3 = vadd.f32 %v6616_v58, %v6615_v33  ;;  %v6687_v8 = vadd.f32 %v6686_v59, %v6685_v37 }
 0x383   : > { %v6618_v1 = vpop.f32.mrf.mxu1  ;;  %v6688_v2 = vpop.f32.mrf.mxu0  ;;  %3917 = vmatprep.subr.bf16.mxu0 %v7380_v46 }
 0x384   : > { %6281 = vmatmul.mubr.msk.bf16.gmra.mxu1 %vm3007_vm4, %v8534_v60  ;;  %v3236_v10 = vshll.u32 %v8534_v60, 16  ;;  %v4068_v15 = vrot.slane %v8534_v60, 2  ;;  %v2925_v34 = vmax.f32 %v6617_v3, %v6687_v8  ;;  %v3240_v27 = vshrl.u32 %v8534_v60, 16 }
 0x385   : > { %v6619_v13 = vpop.f32.mrf.mxu1  ;;  %v6689_v14 = vpop.f32.mrf.mxu0  ;;  %3121 = vmatprep.mubr.bf16.mxu1 %v7529_v0 }
 0x386   : > { %v6620_v17 = vadd.f32 %v6619_v13, %v6618_v1  ;;  %v6690_v18 = vadd.f32 %v6689_v14, %v6688_v2  ;;  %v3238_v20 = vrot.slane %v3236_v10, 1  ;;  %3918 = vmatpush1.bf16.msra.mxu0 %v7378_v61  ;;  %v8551_v29 = vsel %vm4060_vm5, %v4066_v52, %v4068_v15 }
 0x387   : > { %v6621_v21 = vpop.f32.mrf.mxu1  ;;  %v6691_v22 = vpop.f32.mrf.mxu0  ;;  %4461 = vmatprep.subr.bf16.mxu0 %v7529_v0 }
 0x388   : > { %v2926_v35 = vmax.f32 %v6620_v17, %v6690_v18  ;;  %v3239_v40 = vsel %vm3208_vm6, %v3235_v19, %v3238_v20  ;;  %v3242_v41 = vor.u32 %v3240_v27, %v3238_v20 }
 0x389   : > { %v6622_v44 = vpop.f32.mrf.mxu1  ;;  %v6692_v45 = vpop.f32.mrf.mxu0  ;;  %6312 = vmatmul.mubr.msk.bf16.gmra.mxu0 %vm3007_vm4, %v3239_v40 }
 0x38a   : > { %v8556_v49 = vpack.c.bf16 %v2926_v35, %v2925_v34  ;;  %3426 = vmatprep.mubr.bf16.mxu0 %v7529_v0  ;;  %v6623_v42 = vadd.f32 %v6622_v44, %v6621_v21  ;;  %v6693_v43 = vadd.f32 %v6692_v45, %v6691_v22 }
 0x38b   : > { %v6624_v54 = vpop.f32.mrf.mxu1  ;;  %v6694_v62 = vpop.f32.mrf.mxu0 }
 0x38c   : > { %6282 = vmatmul.mubr.msk.bf16.gmra.mxu1 %vm3007_vm4, %v8556_v49  ;;  %v3243_v63 = vshll.u32 %v8556_v49, 16  ;;  %v4070_v11 = vrot.slane %v8556_v49, 2  ;;  %v2927_v53 = vmax.f32 %v6623_v42, %v6693_v43  ;;  %v3247_v13 = vshrl.u32 %v8556_v49, 16 }
 0x38d   : > { %v6625_v24 = vpop.f32.mrf.mxu1  ;;  %v6695_v52 = vpop.f32.mrf.mxu0  ;;  %3131 = vmatprep.mubr.bf16.mxu1 %v7529_v0 }
 0x38e   : > { %v6626_v28 = vadd.f32 %v6625_v24, %v6624_v54  ;;  %v6696_v31 = vadd.f32 %v6695_v52, %v6694_v62  ;;  %v3245_v32 = vrot.slane %v3243_v63, 1  ;;  %v8570_v46 = vsel %vm4060_vm5, %v4068_v15, %v4070_v11 }
 0x38f   : > { %v6627_v33 = vpop.f32.mrf.mxu1  ;;  %v6697_v37 = vpop.f32.mrf.mxu0 }
 0x390   : > { %v2928_v55 = vmax.f32 %v6626_v28, %v6696_v31  ;;  %v3246_v56 = vsel %vm3208_vm6, %v3242_v41, %v3245_v32  ;;  %v3249_v21 = vor.u32 %v3247_v13, %v3245_v32 }
 0x391   : > { %v6628_v58 = vpop.f32.mrf.mxu1  ;;  %v6698_v59 = vpop.f32.mrf.mxu0  ;;  %6313 = vmatmul.mubr.msk.bf16.gmra.mxu0 %vm3007_vm4, %v3246_v56 }
 0x392   : > { %v8574_v61 = vpack.c.bf16 %v2928_v55, %v2927_v53  ;;  %3436 = vmatprep.mubr.bf16.mxu0 %v7529_v0  ;;  %v6629_v3 = vadd.f32 %v6628_v58, %v6627_v33  ;;  %v6699_v8 = vadd.f32 %v6698_v59, %v6697_v37  ;;  %v6402_v59 = vcombine.low %v8479_v7, %v8479_v7 }
 0x393   : > { %v6630_v1 = vpop.f32.mrf.mxu1  ;;  %v6700_v2 = vpop.f32.mrf.mxu0 }
 0x394   : > { %6283 = vmatmul.mubr.msk.bf16.gmra.mxu1 %vm3007_vm4, %v8574_v61  ;;  %v3250_v14 = vshll.u32 %v8574_v61, 16  ;;  %v4072_v18 = vrot.slane %v8574_v61, 2  ;;  %v2929_v44 = vmax.f32 %v6629_v3, %v6699_v8  ;;  %v3254_v41 = vshrl.u32 %v8574_v61, 16 }
 0x395   : > { %v6631_v15 = vpop.f32.mrf.mxu1  ;;  %v6701_v17 = vpop.f32.mrf.mxu0  ;;  %3141 = vmatprep.mubr.bf16.mxu1 %v7529_v0  ;;  %v4158_v7 = vsel %vm3032_vm3, %v6402_v59, 0 }
 0x396   : > { %v6632_v19 = vadd.f32 %v6631_v15, %v6630_v1  ;;  %v6702_v20 = vadd.f32 %v6701_v17, %v6700_v2  ;;  %v3252_v22 = vrot.slane %v3250_v14, 1  ;;  %v8588_v40 = vsel %vm4060_vm5, %v4070_v11, %v4072_v18 }
 0x397   : > { %v6633_v34 = vpop.f32.mrf.mxu1  ;;  %v6703_v35 = vpop.f32.mrf.mxu0  ;;  %v3522_v1 = vrot.slane %v8422_v39, 1  ;;  %v3521_v15 = vrot.slane %v8403_v4, 1  ;;  %v7391_v39 = vld [vmem:[%s9631_s7 + $0x184] ss:$8 sps:$4 sm:$0xff]  }
 0x398   : > { %v2930_v45 = vmax.f32 %v6632_v19, %v6702_v20  ;;  %v3253_v54 = vsel %vm3208_vm6, %v3249_v21, %v3252_v22  ;;  %v3256_v56 = vor.u32 %v3254_v41, %v3252_v22 }
 0x399   : > { %6314 = vmatmul.mubr.msk.bf16.gmra.mxu0 %vm3007_vm4, %v3253_v54  ;;  %v6634_v62 = vpop.f32.mrf.mxu1  ;;  %v6704_v42 = vpop.f32.mrf.mxu0  ;;  %v3523_v19 = vsel %vm3520_vm7, %v3521_v15, %v3522_v1  ;;  %v3784_v54 = vrot.slane %v3219_v5, 1  ;;  %v3782_v5 = vrot.slane %v3211_v16, 2  ;;  %v7394_v16 = vld [vmem:[%s9631_s7 + $0x174] ss:$8 sps:$4 sm:$0xff]  }
 0x39a   : > { %v8592_v43 = vpack.c.bf16 %v2930_v45, %v2929_v44  ;;  %v6635_v24 = vadd.f32 %v6634_v62, %v6633_v34  ;;  %v6705_v52 = vadd.f32 %v6704_v42, %v6703_v35  ;;  %3446 = vmatprep.mubr.bf16.mxu0 %v7529_v0  ;;  %v7383_v34 = vld [vmem:[%s9631_s7 + $0x1a0] ss:$8 sps:$4 sm:$0xff]   ;;  %v7388_v44 = vld [vmem:[%s9631_s7 + $0x194] ss:$8 sps:$4 sm:$0xff]   ;;  %v3524_v45 = vrot.slane %v8460_v57, 1 }
 0x39b   : > { %v6636_v28 = vpop.f32.mrf.mxu1  ;;  %v6706_v31 = vpop.f32.mrf.mxu0  ;;  %v3785_v42 = vrot.slane %v3215_v50, 2 }
 0x39c   : > { %6284 = vmatmul.mubr.msk.bf16.gmra.mxu1 %vm3007_vm4, %v8592_v43  ;;  %v2931_v11 = vmax.f32 %v6635_v24, %v6705_v52  ;;  %v3257_v32 = vshll.u32 %v8592_v43, 16  ;;  %v4074_v53 = vrot.slane %v8592_v43, 2  ;;  %v3261_v21 = vshrl.u32 %v8592_v43, 16  ;;  %v7386_v24 = vld [vmem:[%s9631_s7 + $0x190] ss:$8 sps:$4 sm:$0xff]  }
 0x39d   : > { %3655 = vmatprep.mubr.bf16.mxu1 %v7529_v0  ;;  %v6637_v33 = vpop.f32.mrf.mxu1  ;;  %v6707_v37 = vpop.f32.mrf.mxu0  ;;  %v3781_v52 = vrot.slane %v3209_v51, 1  ;;  %v3525_v50 = vsel %vm3520_vm7, %v3522_v1, %v3524_v45  ;;  %v3786_v28 = vor.u32 %v3785_v42, %v3784_v54  ;;  %v7389_v51 = vld [vmem:[%s9631_s7 + $0x180] ss:$8 sps:$4 sm:$0xff]   ;;  %v3526_v31 = vrot.slane %v8503_v48, 1 }
 0x39e   : > { %v8601_v55 = vpack.c.bf16 %v2931_v11, %v2931_v11  ;;  %v3259_v58 = vrot.slane %v3257_v32, 1  ;;  %v8611_v2 = vsel %vm4060_vm5, %v4072_v18, %v4074_v53  ;;  %v7385_v18 = vld [vmem:[%s9631_s7 + $0x1a4] ss:$8 sps:$4 sm:$0xff]   ;;  %v3788_v33 = vrot.slane %v3226_v12, 1 }
 0x39f   : > { %v3783_v4 = vor.u32 %v3782_v5, %v3781_v52  ;;  %v3789_v37 = vrot.slane %v3222_v6, 2  ;;  %v7395_v6 = vld [vmem:[%s9631_s7 + $0x160] ss:$8 sps:$4 sm:$0xff]   ;;  %v3528_v12 = vrot.slane %v8534_v60, 1  ;;  %v3792_v1 = vrot.slane %v3233_v9, 1 }
 0x3a0   : > { %v3265_v3 = vshll.u32 %v8601_v55, 16  ;;  %v3260_v8 = vsel %vm3208_vm6, %v3256_v56, %v3259_v58  ;;  %v4076_v17 = vrot.slane %v8601_v55, 2  ;;  %v3263_v35 = vor.u32 %v3261_v21, %v3259_v58  ;;  %v7397_v56 = vld [vmem:[%s9631_s7 + $0x164] ss:$8 sps:$4 sm:$0xff]  }
 0x3a1   : > { %6315 = vmatmul.mubr.msk.bf16.gmra.mxu0 %vm3007_vm4, %v3260_v8  ;;  %v3787_v11 = vsel %vm3780_vm8, %v3783_v4, %v3786_v28  ;;  %v3527_v58 = vsel %vm3520_vm7, %v3524_v45, %v3526_v31  ;;  %v3790_v57 = vor.u32 %v3789_v37, %v3788_v33  ;;  %v3793_v8 = vrot.slane %v3229_v38, 2  ;;  %v7411_v4 = vld [vmem:[%s9634_s10 + $0x8] sm:$0xff]   ;;  %v7413_v33 = vld [vmem:[%s9634_s10] sm:$0xff]  }
 0x3a2   : > { %3456 = vmatprep.mubr.bf16.mxu0 %v7529_v0  ;;  %v8625_v20 = vsel %vm4060_vm5, %v4074_v53, %v4076_v17  ;;  %v3267_v22 = vrot.slane %v3265_v3, 1  ;;  %v7392_v53 = vld [vmem:[%s9631_s7 + $0x170] ss:$8 sps:$4 sm:$0xff]   ;;  %v3529_v15 = vsel %vm3520_vm7, %v3526_v31, %v3528_v12  ;;  %v3796_v48 = vrot.slane %v3240_v27, 1 }
 0x3a3   : > { %v3791_v59 = vsel %vm3780_vm8, %v3786_v28, %v3790_v57  ;;  %v3794_v17 = vor.u32 %v3793_v8, %v3792_v1  ;;  %v3797_v38 = vrot.slane %v3236_v10, 2  ;;  %v3800_v27 = vrot.slane %v3247_v13, 1  ;;  %v7408_v28 = vld [vmem:[%s9633_s9 + $0x10] sm:$0xff]   ;;  %v7416_v8 = vld [vmem:[%s9633_s9 + $0x40] sm:$0xff]  }
 0x3a4   : > { %6341 = vmatmul.mubr.msk.bf16.vlgmr.msra.gmra.mxu1 %vm3007_vm4, %v3523_v19  ;;  %v3268_v62 = vsel %vm3208_vm6, %v3263_v35, %v3267_v22  ;;  %v3532_v22 = vrot.slane %v8574_v61, 1  ;;  %v3801_v60 = vrot.slane %v3243_v63, 2  ;;  %v3804_v13 = vrot.slane %v3254_v41, 1 }
 0x3a5   : > { %3665 = vmatprep.mubr.bf16.mxu1 %v7529_v0  ;;  %4168 = vmatpush1.bf16.msra.mxu1 %v4158_v7  ;;  %v3530_v7 = vrot.slane %v8556_v49, 1  ;;  %v3795_v9 = vsel %vm3780_vm8, %v3790_v57, %v3794_v17  ;;  %v3798_v19 = vor.u32 %v3797_v38, %v3796_v48  ;;  %v3805_v49 = vrot.slane %v3250_v14, 2  ;;  %v7415_v57 = vld [vmem:[%s9634_s10 + $0x48] sm:$0xff]  }
 0x3a6   : > { %4169 = vmatprep.subr.bf16.mxu1 %v7385_v18  ;;  %v3802_v35 = vor.u32 %v3801_v60, %v3800_v27  ;;  %v3808_v41 = vrot.slane %v3261_v21, 1  ;;  %v3809_v61 = vrot.slane %v3257_v32, 2 }
 0x3a7   : > { %v3531_v18 = vsel %vm3520_vm7, %v3528_v12, %v3530_v7  ;;  %v3533_v10 = vsel %vm3520_vm7, %v3530_v7, %v3532_v22  ;;  %v3806_v54 = vor.u32 %v3805_v49, %v3804_v13 }
 0x3a8   : > { %v3803_v45 = vsel %vm3780_vm8, %v3798_v19, %v3802_v35  ;;  %v3810_v52 = vor.u32 %v3809_v61, %v3808_v41 }
 0x3a9   : > { %6316 = vmatmul.mubr.msk.bf16.gmra.mxu0 %vm3007_vm4, %v3268_v62  ;;  %4170 = vmatpush1.bf16.msra.mxu1 %v7383_v34  ;;  %v3799_v34 = vsel %vm3780_vm8, %v3794_v17, %v3798_v19  ;;  %v3536_v62 = vrot.slane %v8601_v55, 1  ;;  %v3807_v42 = vsel %vm3780_vm8, %v3802_v35, %v3806_v54 }
 0x3aa   : > { %3935 = vmatprep.mubr.bf16.mxu0 %v7529_v0  ;;  %4171 = vmatprep.subr.bf16.mxu1 %v7388_v44  ;;  %v3534_v44 = vrot.slane %v8592_v43, 1  ;;  %v3815_v43 = vrot.slane %v3265_v3, 2  ;;  %v7405_v3 = vld [vmem:[%s9634_s10 + $0x20] sm:$0xff]  }
 0x3ac   : > { %6342 = vmatmul.mubr.msk.bf16.gmra.mxu1 %vm3007_vm4, %v3525_v50  ;;  %v3535_v63 = vsel %vm3520_vm7, %v3532_v22, %v3534_v44  ;;  %v3537_v14 = vsel %vm3520_vm7, %v3534_v44, %v3536_v62  ;;  %v7407_v50 = vld [vmem:[%s9634_s10 + $0x18] sm:$0xff]  }
 0x3ad   : > { %3675 = vmatprep.mubr.bf16.mxu1 %v7529_v0  ;;  %4172 = vmatpush1.bf16.msra.mxu1 %v7386_v24  ;;  %v3812_v24 = vshrl.u32 %v8601_v55, 16  ;;  %v7404_v55 = vld [vmem:[%s9633_s9 + $0x20] sm:$0xff]  }
 0x3ae   : > { %4173 = vmatprep.subr.bf16.mxu1 %v7391_v39  ;;  %v3811_v39 = vsel %vm3780_vm8, %v3806_v54, %v3810_v52 }
 0x3af   : > { %v3814_v5 = vrot.slane %v3812_v24, 1 }
 0x3b1   : > { %6373 = vmatmul.mubr.msk.bf16.vlgmr.msra.gmra.mxu0 %vm3007_vm4, %v3787_v11  ;;  %4174 = vmatpush1.bf16.msra.mxu1 %v7389_v51  ;;  %v3816_v32 = vor.u32 %v3815_v43, %v3814_v5  ;;  %v7409_v51 = vld [vmem:[%s9634_s10 + $0x10] sm:$0xff]   ;;  %v7412_v11 = vld [vmem:[%s9633_s9] sm:$0xff]  }
 0x3b2   : > { %3945 = vmatprep.mubr.bf16.mxu0 %v7529_v0  ;;  %4175 = vmatprep.subr.bf16.mxu1 %v7394_v16 }
 0x3b3   : > { %v3817_v21 = vsel %vm3780_vm8, %v3810_v52, %v3816_v32 }
 0x3b4   : > { %6343 = vmatmul.mubr.msk.bf16.gmra.mxu1 %vm3007_vm4, %v3527_v58  ;;  %v7414_v58 = vld [vmem:[%s9633_s9 + $0x48] sm:$0xff]  }
 0x3b5   : > { %3685 = vmatprep.mubr.bf16.mxu1 %v7529_v0  ;;  %4176 = vmatpush1.bf16.msra.mxu1 %v7392_v53  ;;  %v2932_v53 = vld [vmem:[%s9632_s8] sm:$0x3] }
 0x3b6   : > { %4177 = vmatprep.subr.bf16.mxu1 %v7397_v56 }
 0x3b9   : > { %6374 = vmatmul.mubr.msk.bf16.gmra.mxu0 %vm3007_vm4, %v3791_v59  ;;  %4178 = vmatpush1.bf16.msra.mxu1 %v7395_v6  ;;  %v8853_v6 = vrot.slane %v2932_v53, %v762_v26  ;;  %v8858_v59 = vrot.slane %v2932_v53, %v766_v25  ;;  %v7417_v26 = vld [vmem:[%s9634_s10 + $0x40] sm:$0xff]  }
 0x3ba   : > { %3955 = vmatprep.mubr.bf16.mxu0 %v7529_v0  ;;  %4638 = vmatprep.subr.bf16.mxu1 %v7529_v0 }
 0x3bc   : > { %6344 = vmatmul.mubr.msk.bf16.gmra.mxu1 %vm3007_vm4, %v3529_v15 }
 0x3bd   : > { %3695 = vmatprep.mubr.bf16.mxu1 %v7529_v0 }
 0x3c1   : > { %6375 = vmatmul.mubr.msk.bf16.gmra.mxu0 %vm3007_vm4, %v3795_v9 }
 0x3c2   : > { %3965 = vmatprep.mubr.bf16.mxu0 %v7529_v0 }
 0x3c4   : > { %6345 = vmatmul.mubr.msk.bf16.gmra.mxu1 %vm3007_vm4, %v3531_v18 }
 0x3c5   : > { %3705 = vmatprep.mubr.bf16.mxu1 %v7529_v0 }
 0x3c9   : > { %6376 = vmatmul.mubr.msk.bf16.gmra.mxu0 %vm3007_vm4, %v3799_v34 }
 0x3ca   : > { %3975 = vmatprep.mubr.bf16.mxu0 %v7529_v0 }
 0x3cc   : > { %6346 = vmatmul.mubr.msk.bf16.gmra.mxu1 %vm3007_vm4, %v3533_v10 }
 0x3cd   : > { %3715 = vmatprep.mubr.bf16.mxu1 %v7529_v0 }
 0x3d1   : > { %6377 = vmatmul.mubr.msk.bf16.gmra.mxu0 %vm3007_vm4, %v3803_v45 }
 0x3d2   : > { %3985 = vmatprep.mubr.bf16.mxu0 %v7529_v0 }
 0x3d4   : > { %6347 = vmatmul.mubr.msk.bf16.gmra.mxu1 %vm3007_vm4, %v3535_v63 }
 0x3d5   : > { %3725 = vmatprep.mubr.bf16.mxu1 %v7529_v0 }
 0x3d9   : > { %6378 = vmatmul.mubr.msk.bf16.gmra.mxu0 %vm3007_vm4, %v3807_v42 }
 0x3da   : > { %3995 = vmatprep.mubr.bf16.mxu0 %v7529_v0 }
 0x3dc   : > { %6348 = vmatmul.mubr.msk.bf16.gmra.mxu1 %vm3007_vm4, %v3537_v14 }
 0x3dd   : > { %4195 = vmatprep.mubr.bf16.mxu1 %v7529_v0 }
 0x3e1   : > { %6379 = vmatmul.mubr.msk.bf16.gmra.mxu0 %vm3007_vm4, %v3811_v39 }
 0x3e2   : > { %4005 = vmatprep.mubr.bf16.mxu0 %v7529_v0 }
 0x3e4   : > { %6405 = vmatmul.mubr.msk.bf16.vlgmr.msra.gmra.mxu1 %vm3007_vm4, %v8453_v36  ;;  %v7398_v36 = vld [vmem:[%s9633_s9 + $0x38] sm:$0xff]  }
 0x3e5   : > { %4205 = vmatprep.mubr.bf16.mxu1 %v7529_v0  ;;  %4462 = vmatpush1.bf16.msra.mxu0 %v7398_v36 }
 0x3e6   : > { %4463 = vmatprep.subr.bf16.mxu0 %v7529_v0 }
 0x3e9   : > { %6380 = vmatmul.mubr.msk.bf16.gmra.mxu0 %vm3007_vm4, %v3817_v21 }
 0x3ec   : > { %6406 = vmatmul.mubr.msk.bf16.gmra.mxu1 %vm3007_vm4, %v8499_v30  ;;  %v7399_v30 = vld [vmem:[%s9634_s10 + $0x38] sm:$0xff]  }
 0x3ed   : > { %4215 = vmatprep.mubr.bf16.mxu1 %v7529_v0  ;;  %4639 = vmatpush1.bf16.msra.mxu1 %v7399_v30 }
 0x3ee   : > { %4640 = vmatprep.subr.bf16.mxu1 %v7529_v0 }
 0x3f4   : > { %6407 = vmatmul.mubr.msk.bf16.gmra.mxu1 %vm3007_vm4, %v8530_v47  ;;  %v7400_v47 = vld [vmem:[%s9633_s9 + $0x30] sm:$0xff]  }
 0x3f5   : > { %4225 = vmatprep.mubr.bf16.mxu1 %v7529_v0  ;;  %4464 = vmatpush1.bf16.msra.mxu0 %v7400_v47 }
 0x3f6   : > { %4465 = vmatprep.subr.bf16.mxu0 %v7529_v0 }
 0x3fc   : > { %6408 = vmatmul.mubr.msk.bf16.gmra.mxu1 %vm3007_vm4, %v8551_v29  ;;  %v7401_v29 = vld [vmem:[%s9634_s10 + $0x30] sm:$0xff]  }
 0x3fd   : > { %4235 = vmatprep.mubr.bf16.mxu1 %v7529_v0  ;;  %4641 = vmatpush1.bf16.msra.mxu1 %v7401_v29 }
 0x3fe   : > { %4642 = vmatprep.subr.bf16.mxu1 %v7529_v0 }
 0x404   : > { %6409 = vmatmul.mubr.msk.bf16.gmra.mxu1 %vm3007_vm4, %v8570_v46  ;;  %v7402_v46 = vld [vmem:[%s9633_s9 + $0x28] sm:$0xff]  }
 0x405   : > { %4245 = vmatprep.mubr.bf16.mxu1 %v7529_v0  ;;  %4466 = vmatpush1.bf16.msra.mxu0 %v7402_v46 }
 0x406   : > { %4467 = vmatprep.subr.bf16.mxu0 %v7529_v0 }
 0x409   : > { %4468 = vmatpush1.bf16.msra.mxu0 %v7404_v55 }
 0x40a   : > { %4469 = vmatprep.subr.bf16.mxu0 %v7529_v0 }
 0x40c   : > { %6410 = vmatmul.mubr.msk.bf16.gmra.mxu1 %vm3007_vm4, %v8588_v40  ;;  %v7403_v40 = vld [vmem:[%s9634_s10 + $0x28] sm:$0xff]  }
 0x40d   : > { %4255 = vmatprep.mubr.bf16.mxu1 %v7529_v0  ;;  %4643 = vmatpush1.bf16.msra.mxu1 %v7403_v40 }
 0x40e   : > { %4644 = vmatprep.subr.bf16.mxu1 %v7529_v0 }
 0x411   : > { %4645 = vmatpush1.bf16.msra.mxu1 %v7405_v3 }
 0x412   : > { %4646 = vmatprep.subr.bf16.mxu1 %v7529_v0 }
 0x414   : > { %6411 = vmatmul.mubr.msk.bf16.gmra.mxu1 %vm3007_vm4, %v8611_v2  ;;  %v7406_v2 = vld [vmem:[%s9633_s9 + $0x18] sm:$0xff]  }
 0x415   : > { %4265 = vmatprep.mubr.bf16.mxu1 %v7529_v0  ;;  %4470 = vmatpush1.bf16.msra.mxu0 %v7406_v2 }
 0x416   : > { %4647 = vmatpush1.bf16.msra.mxu1 %v7407_v50  ;;  %4471 = vmatprep.subr.bf16.mxu0 %v7529_v0 }
 0x417   : > { %4648 = vmatprep.subr.bf16.mxu1 %v7529_v0 }
 0x419   : > { %4472 = vmatpush1.bf16.msra.mxu0 %v7408_v28 }
 0x41a   : > { %4649 = vmatpush1.bf16.msra.mxu1 %v7409_v51  ;;  %4473 = vmatprep.subr.bf16.mxu0 %v7529_v0 }
 0x41b   : > { %4650 = vmatprep.subr.bf16.mxu1 %v7529_v0 }
 0x41c   : > { %6412 = vmatmul.mubr.msk.bf16.gmra.mxu1 %vm3007_vm4, %v8625_v20  ;;  %v7410_v20 = vld [vmem:[%s9633_s9 + $0x8] sm:$0xff]  }
 0x41d   : > { %4474 = vmatpush1.bf16.msra.mxu0 %v7410_v20 }
 0x41e   : > { %4651 = vmatpush1.bf16.msra.mxu1 %v7411_v4  ;;  %4475 = vmatprep.subr.bf16.mxu0 %v7529_v0 }
 0x41f   : > { %4652 = vmatprep.subr.bf16.mxu1 %v7529_v0 }
 0x421   : > { %4476 = vmatpush1.bf16.msra.mxu0 %v7412_v11 }
 0x422   : > { %4653 = vmatpush1.bf16.msra.mxu1 %v7413_v33  ;;  %4489 = vmatprep.subr.bf16.mxu0 %v7529_v0 }
 0x423   : > { %4666 = vmatprep.subr.bf16.mxu1 %v7529_v0 }
 0x424   : > { %v3073_v16 = vpop.f32.mrf.mxu1 }
 0x425   : > { %4490 = vmatpush2.bf16.msra.mxu0 %v7414_v58  ;;  %v3163_v15 = vadd.f32 %v8853_v6, %v3073_v16 }
 0x426   : > { %v3075_v31 = vpop.f32.mrf.mxu1  ;;  %4667 = vmatpush2.bf16.msra.mxu1 %v7415_v57  ;;  %4491 = vmatprep.subr.bf16.mxu0 %v7529_v0 }
 0x427   : > { %4668 = vmatprep.subr.bf16.mxu1 %v7529_v0  ;;  %v3164_v23 = vadd.f32 %v8858_v59, %v3075_v31 }
 0x428   : > { %v8836_v37 = vpop.f32.mrf.mxu1 }
 0x429   : > { %4492 = vmatpush2.bf16.msra.mxu0 %v7416_v8 }
 0x42a   : > { %v8842_v56 = vpop.f32.mrf.mxu1  ;;  %4669 = vmatpush2.bf16.msra.mxu1 %v7417_v26 }
 0x42c   : > { %v3083_v12 = vpop.f32.mrf.mxu1 }
 0x42d   : > { %v3167_v34 = vadd.f32 %v8853_v6, %v3083_v12 }
 0x42e   : > { %v3085_v1 = vpop.f32.mrf.mxu1 }
 0x42f   : > { %v3168_v10 = vadd.f32 %v8858_v59, %v3085_v1 }
 0x430   : > { %v8868_v17 = vpop.f32.mrf.mxu1 }
 0x431   : > { %v3388_v7 = vpop.f32.mrf.mxu0 }
 0x432   : > { %v8871_v25 = vadd.f32 %v3388_v7, %v3163_v15  ;;  %v8873_v0 = vpop.f32.mrf.mxu1 }
 0x433   : > { %v3390_v9 = vpop.f32.mrf.mxu0 }
 0x434   : > { %v8875_v48 = vadd.f32 %v3390_v9, %v3164_v23  ;;  %v3093_v38 = vpop.f32.mrf.mxu1 }
 0x435   : > { %v8877_v18 = vpop.f32.mrf.mxu0  ;;  %v3171_v42 = vadd.f32 %v8853_v6, %v3093_v38 }
 0x436   : > { %v3095_v19 = vpop.f32.mrf.mxu1 }
 0x437   : > { %v8879_v22 = vpop.f32.mrf.mxu0  ;;  %v3172_v14 = vadd.f32 %v8858_v59, %v3095_v19 }
 0x438   : > { %v8882_v27 = vpop.f32.mrf.mxu1 }
 0x439   : > { %v3398_v60 = vpop.f32.mrf.mxu0 }
 0x43a   : > { %v8885_v35 = vadd.f32 %v3398_v60, %v3167_v34  ;;  %v8887_v44 = vpop.f32.mrf.mxu1 }
 0x43b   : > { %v3400_v45 = vpop.f32.mrf.mxu0 }
 0x43c   : > { %v8889_v13 = vadd.f32 %v3400_v45, %v3168_v10  ;;  %v3103_v49 = vpop.f32.mrf.mxu1 }
 0x43d   : > { %v8891_v63 = vpop.f32.mrf.mxu0  ;;  %v3175_v30 = vadd.f32 %v8853_v6, %v3103_v49 }
 0x43e   : > { %v3105_v54 = vpop.f32.mrf.mxu1 }
 0x43f   : > { %v8893_v62 = vpop.f32.mrf.mxu0  ;;  %v3176_v46 = vadd.f32 %v8858_v59, %v3105_v54 }
 0x440   : > { %v8896_v41 = vpop.f32.mrf.mxu1 }
 0x441   : > { %v3408_v61 = vpop.f32.mrf.mxu0 }
 0x442   : > { %v8899_v24 = vadd.f32 %v3408_v61, %v3171_v42  ;;  %v8901_v52 = vpop.f32.mrf.mxu1 }
 0x443   : > { %v3410_v5 = vpop.f32.mrf.mxu0 }
 0x444   : > { %v8903_v39 = vadd.f32 %v3410_v5, %v3172_v14  ;;  %v3113_v43 = vpop.f32.mrf.mxu1 }
 0x445   : > { %v8905_v32 = vpop.f32.mrf.mxu0  ;;  %v3179_v4 = vadd.f32 %v8853_v6, %v3113_v43 }
 0x446   : > { %v3115_v21 = vpop.f32.mrf.mxu1 }
 0x447   : > { %v8907_v36 = vpop.f32.mrf.mxu0  ;;  %v3180_v11 = vadd.f32 %v8858_v59, %v3115_v21 }
 0x448   : > { %v8910_v47 = vpop.f32.mrf.mxu1 }
 0x449   : > { %v3418_v29 = vpop.f32.mrf.mxu0 }
 0x44a   : > { %v8913_v40 = vadd.f32 %v3418_v29, %v3175_v30  ;;  %v8915_v55 = vpop.f32.mrf.mxu1 }
 0x44b   : > { %9678 = vst [vmem:[#allocation11_spill] sm:$0xff] %v8915_v55  ;;  %v3420_v3 = vpop.f32.mrf.mxu0 }
 0x44c   : > { %v8917_v2 = vadd.f32 %v3420_v3, %v3176_v46  ;;  %v3123_v50 = vpop.f32.mrf.mxu1 }
 0x44d   : > { %v8919_v28 = vpop.f32.mrf.mxu0  ;;  %v3183_v15 = vadd.f32 %v8853_v6, %v3123_v50 }
 0x44e   : > { %v3125_v51 = vpop.f32.mrf.mxu1 }
 0x44f   : > { %v8921_v20 = vpop.f32.mrf.mxu0  ;;  %v3184_v9 = vadd.f32 %v8858_v59, %v3125_v51 }
 0x450   : > { %v8924_v16 = vpop.f32.mrf.mxu1 }
 0x451   : > { %9679 = vst [vmem:[#allocation12_spill] sm:$0xff] %v8924_v16  ;;  %v3428_v31 = vpop.f32.mrf.mxu0 }
 0x452   : > { %v8927_v33 = vadd.f32 %v3428_v31, %v3179_v4  ;;  %v8929_v53 = vpop.f32.mrf.mxu1 }
 0x453   : > { %9680 = vst [vmem:[#allocation13_spill] sm:$0xff] %v8929_v53  ;;  %v3430_v58 = vpop.f32.mrf.mxu0 }
 0x454   : > { %v8931_v57 = vadd.f32 %v3430_v58, %v3180_v11  ;;  %v3133_v12 = vpop.f32.mrf.mxu1 }
 0x455   : > { %v8933_v1 = vpop.f32.mrf.mxu0  ;;  %v3187_v42 = vadd.f32 %v8853_v6, %v3133_v12 }
 0x456   : > { %9681 = vst [vmem:[#allocation14_spill] sm:$0xff] %v8933_v1  ;;  %v3135_v8 = vpop.f32.mrf.mxu1 }
 0x457   : > { %v8935_v26 = vpop.f32.mrf.mxu0  ;;  %v3188_v5 = vadd.f32 %v8858_v59, %v3135_v8 }
 0x458   : > { %9682 = vst [vmem:[#allocation15_spill] sm:$0xff] %v8935_v26  ;;  %v8938_v7 = vpop.f32.mrf.mxu1 }
 0x459   : > { %9683 = vst [vmem:[#allocation16_spill] sm:$0xff] %v8938_v7  ;;  %v3438_v23 = vpop.f32.mrf.mxu0 }
 0x45a   : > { %v8941_v38 = vadd.f32 %v3438_v23, %v3183_v15  ;;  %v8943_v19 = vpop.f32.mrf.mxu1 }
 0x45b   : > { %9684 = vst [vmem:[#allocation17_spill] sm:$0xff] %v8943_v19  ;;  %v3440_v34 = vpop.f32.mrf.mxu0 }
 0x45c   : > { %v8945_v60 = vadd.f32 %v3440_v34, %v3184_v9  ;;  %v3143_v10 = vpop.f32.mrf.mxu1 }
 0x45d   : > { %v8947_v45 = vpop.f32.mrf.mxu0  ;;  %v3191_v11 = vadd.f32 %v8853_v6, %v3143_v10 }
 0x45e   : > { %9685 = vst [vmem:[#allocation18_spill] sm:$0xff] %v8947_v45  ;;  %v3145_v49 = vpop.f32.mrf.mxu1 }
 0x45f   : > { %v8949_v54 = vpop.f32.mrf.mxu0  ;;  %v3192_v8 = vadd.f32 %v8858_v59, %v3145_v49 }
 0x460   : > { %9686 = vst [vmem:[#allocation19_spill] sm:$0xff] %v8949_v54  ;;  %v8952_v61 = vpop.f32.mrf.mxu1 }
 0x461   : > { %9687 = vst [vmem:[#allocation20_spill] sm:$0xff] %v8952_v61  ;;  %v3448_v14 = vpop.f32.mrf.mxu0 }
 0x462   : > { %v8955_v43 = vadd.f32 %v3448_v14, %v3187_v42  ;;  %v8957_v21 = vpop.f32.mrf.mxu1 }
 0x463   : > { %9688 = vst [vmem:[#allocation21_spill] sm:$0xff] %v8957_v21  ;;  %v3450_v30 = vpop.f32.mrf.mxu0 }
 0x464   : > { %v8959_v29 = vadd.f32 %v3450_v30, %v3188_v5  ;;  %v3657_v46 = vpop.f32.mrf.mxu1 }
 0x465   : > { %v8962_v3 = vadd.f32 %v3657_v46, %v8871_v25  ;;  %v8964_v50 = vpop.f32.mrf.mxu0 }
 0x466   : > { %9689 = vst [vmem:[#allocation22_spill] sm:$0xff] %v8964_v50  ;;  %v3659_v51 = vpop.f32.mrf.mxu1 }
 0x467   : > { %v8967_v4 = vadd.f32 %v3659_v51, %v8875_v48  ;;  %v8969_v31 = vpop.f32.mrf.mxu0 }
 0x468   : > { %9690 = vst [vmem:[#allocation23_spill] sm:$0xff] %v8969_v31  ;;  %v8972_v58 = vpop.f32.mrf.mxu1 }
 0x469   : > { %v3458_v12 = vpop.f32.mrf.mxu0 }
 0x46a   : > { %v3495_v15 = vadd.f32 %v3458_v12, %v3191_v11  ;;  %v8975_v23 = vpop.f32.mrf.mxu1 }
 0x46b   : > { %v3460_v25 = vpop.f32.mrf.mxu0 }
 0x46c   : > { %v3496_v9 = vadd.f32 %v3460_v25, %v3192_v8  ;;  %v3667_v34 = vpop.f32.mrf.mxu1 }
 0x46d   : > { %v8978_v42 = vadd.f32 %v3667_v34, %v8885_v35  ;;  %v8980_v48 = vpop.f32.mrf.mxu0 }
 0x46e   : > { %9691 = vst [vmem:[#allocation24_spill] sm:$0xff] %v8980_v48  ;;  %v3669_v14 = vpop.f32.mrf.mxu1 }
 0x46f   : > { %v8983_v5 = vadd.f32 %v3669_v14, %v8889_v13  ;;  %v8985_v10 = vpop.f32.mrf.mxu0 }
 0x470   : > { %9692 = vst [vmem:[#allocation25_spill] sm:$0xff] %v8985_v10  ;;  %v8987_v30 = vpop.f32.mrf.mxu1 }
 0x471   : > { %v3937_v49 = vpop.f32.mrf.mxu0 }
 0x472   : > { %v8989_v46 = vpop.f32.mrf.mxu1 }
 0x473   : > { %v3939_v51 = vpop.f32.mrf.mxu0 }
 0x474   : > { %v3677_v11 = vpop.f32.mrf.mxu1 }
 0x475   : > { %v8992_v12 = vadd.f32 %v3677_v11, %v8899_v24  ;;  %v3941_v35 = vpop.f32.mrf.mxu0 }
 0x476   : > { %v3679_v8 = vpop.f32.mrf.mxu1 }
 0x477   : > { %v8995_v25 = vadd.f32 %v3679_v8, %v8903_v39  ;;  %v3943_v34 = vpop.f32.mrf.mxu0 }
 0x478   : > { %v8997_v13 = vpop.f32.mrf.mxu1 }
 0x479   : > { %v8999_v14 = vpop.f32.mrf.mxu0 }
 0x47a   : > { %v9001_v10 = vpop.f32.mrf.mxu1 }
 0x47b   : > { %v9003_v48 = vpop.f32.mrf.mxu0 }
 0x47c   : > { %v3687_v21 = vpop.f32.mrf.mxu1 }
 0x47d   : > { %v9006_v61 = vadd.f32 %v3687_v21, %v8913_v40  ;;  %v9008_v24 = vpop.f32.mrf.mxu0 }
 0x47e   : > { %v3689_v11 = vpop.f32.mrf.mxu1 }
 0x47f   : > { %v9011_v31 = vadd.f32 %v3689_v11, %v8917_v2  ;;  %v9013_v39 = vpop.f32.mrf.mxu0 }
 0x480   : > { %v9015_v8 = vpop.f32.mrf.mxu1 }
 0x481   : > { %v9017_v50 = vpop.f32.mrf.mxu0 }
 0x482   : > { %v9019_v19 = vpop.f32.mrf.mxu1 }
 0x483   : > { %v9024_v40 = vpop.f32.mrf.mxu0 }
 0x484   : > { %v3697_v7 = vpop.f32.mrf.mxu1 }
 0x485   : > { %v9022_v54 = vadd.f32 %v3697_v7, %v8927_v33  ;;  %v9031_v11 = vpop.f32.mrf.mxu0 }
 0x486   : > { %v3699_v21 = vpop.f32.mrf.mxu1 }
 0x487   : > { %9693 = vst [vmem:[#allocation26_spill] sm:$0xff] %v9022_v54  ;;  %v9027_v45 = vadd.f32 %v3699_v21, %v8931_v57  ;;  %v9038_v1 = vpop.f32.mrf.mxu0 }
 0x488   : > { %v9029_v2 = vpop.f32.mrf.mxu1 }
 0x489   : > { %9694 = vst [vmem:[#allocation27_spill] sm:$0xff] %v9027_v45  ;;  %9695 = vst [vmem:[#allocation28_spill] sm:$0xff] %v9029_v2  ;;  %v9045_v57 = vpop.f32.mrf.mxu0 }
 0x48a   : > { %v9033_v53 = vpop.f32.mrf.mxu1 }
 0x48b   : > { %9696 = vst [vmem:[#allocation29_spill] sm:$0xff] %v9033_v53  ;;  %v9052_v53 = vpop.f32.mrf.mxu0 }
 0x48c   : > { %v3707_v16 = vpop.f32.mrf.mxu1 }
 0x48d   : > { %v9036_v26 = vadd.f32 %v3707_v16, %v8941_v38 }
 0x48e   : > { %v3709_v33 = vpop.f32.mrf.mxu1 }
 0x48f   : > { %9697 = vst [vmem:[#allocation30_spill] sm:$0xff] %v9036_v26  ;;  %v9041_v7 = vadd.f32 %v3709_v33, %v8945_v60  ;;  %v9059_v60 = vpop.f32.mrf.mxu0 }
 0x490   : > { %v9043_v54 = vpop.f32.mrf.mxu1 }
 0x491   : > { %9698 = vst [vmem:[#allocation31_spill] sm:$0xff] %v9041_v7  ;;  %9699 = vst [vmem:[#allocation32_spill] sm:$0xff] %v9043_v54 }
 0x492   : > { %v9047_v21 = vpop.f32.mrf.mxu1 }
 0x493   : > { %9700 = vst [vmem:[#allocation33_spill] sm:$0xff] %v9047_v21  ;;  %v9065_v21 = vpop.f32.mrf.mxu0 }
 0x494   : > { %v3717_v45 = vpop.f32.mrf.mxu1 }
 0x495   : > { %v9050_v2 = vadd.f32 %v3717_v45, %v8955_v43 }
 0x496   : > { %v3719_v16 = vpop.f32.mrf.mxu1 }
 0x497   : > { %9701 = vst [vmem:[#allocation34_spill] sm:$0xff] %v9050_v2  ;;  %v9055_v38 = vadd.f32 %v3719_v16, %v8959_v29  ;;  %v3165_v29 = vadd.f32 %v8853_v6, %v8836_v37  ;;  %v9073_v16 = vpop.f32.mrf.mxu0  ;;  %v4017_v2 = vadd.f32 %v3939_v51, %v8967_v4 }
 0x498   : > { %v9057_v26 = vpop.f32.mrf.mxu1  ;;  %9708 = vst [vmem:[#allocation41_spill] sm:$0xff] %v9073_v16 }
 0x499   : > { %9702 = vst [vmem:[#allocation35_spill] sm:$0xff] %v9055_v38  ;;  %9703 = vst [vmem:[#allocation36_spill] sm:$0xff] %v9057_v26 }
 0x49a   : > { %v9061_v33 = vpop.f32.mrf.mxu1 }
 0x49b   : > { %9704 = vst [vmem:[#allocation37_spill] sm:$0xff] %v9061_v33  ;;  %v3166_v33 = vadd.f32 %v8858_v59, %v8842_v56  ;;  %v3169_v56 = vadd.f32 %v8853_v6, %v8868_v17 }
 0x49c   : > { %v3727_v7 = vpop.f32.mrf.mxu1 }
 0x49d   : > { %v9063_v54 = vadd.f32 %v3727_v7, %v3495_v15  ;;  %v3469_v15 = vadd.f32 %v8877_v18, %v3165_v29 }
 0x49e   : > { %v3729_v55 = vpop.f32.mrf.mxu1 }
 0x49f   : > { %9705 = vst [vmem:[#allocation38_spill] sm:$0xff] %v9063_v54  ;;  %v9067_v45 = vadd.f32 %v3729_v55, %v3496_v9  ;;  %v3470_v54 = vadd.f32 %v8879_v22, %v3166_v33  ;;  %v3738_v55 = vadd.f32 %v8972_v58, %v3469_v15  ;;  %v4016_v9 = vadd.f32 %v3937_v49, %v8962_v3 }
 0x4a0   : > { %v9069_v43 = vpop.f32.mrf.mxu1  ;;  %v3170_v58 = vadd.f32 %v8858_v59, %v8873_v0  ;;  %v3473_v3 = vadd.f32 %v8891_v63, %v3169_v56 }
 0x4a1   : > { %9706 = vst [vmem:[#allocation39_spill] sm:$0xff] %v9067_v45  ;;  %9707 = vst [vmem:[#allocation40_spill] sm:$0xff] %v9069_v43  ;;  %v9083_v45 = vpop.f32.mrf.mxu0  ;;  %v3739_v37 = vadd.f32 %v8975_v23, %v3470_v54 }
 0x4a2   : > { %v9075_v38 = vpop.f32.mrf.mxu1  ;;  %v3474_v51 = vadd.f32 %v8893_v62, %v3170_v58 }
 0x4a3   : > { %9709 = vst [vmem:[#allocation42_spill] sm:$0xff] %v9075_v38  ;;  %v4018_v38 = vadd.f32 %v3941_v35, %v3738_v55  ;;  %v4019_v29 = vadd.f32 %v3943_v34, %v3739_v37  ;;  %v9092_v49 = vpop.f32.mrf.mxu0  ;;  %v3742_v35 = vadd.f32 %v8987_v30, %v3473_v3  ;;  %v4020_v34 = vadd.f32 %v8999_v14, %v8978_v42 }
 0x4a4   : > { %v4197_v7 = vpop.f32.mrf.mxu1  ;;  %v3743_v0 = vadd.f32 %v8989_v46, %v3474_v51  ;;  %v3173_v55 = vadd.f32 %v8853_v6, %v8882_v27  ;;  %v3174_v46 = vadd.f32 %v8858_v59, %v8887_v44 }
 0x4a5   : > { %v4276_v26 = vadd.f32 %v4197_v7, %v4016_v9  ;;  %v9099_v63 = vpop.f32.mrf.mxu0  ;;  %v4022_v62 = vadd.f32 %v9008_v24, %v3742_v35 }
 0x4a6   : > { %v4199_v43 = vpop.f32.mrf.mxu1  ;;  %v4023_v14 = vadd.f32 %v9013_v39, %v3743_v0  ;;  %v3478_v39 = vadd.f32 %v8907_v36, %v3174_v46  ;;  %v4028_v0 = vadd.f32 %v9045_v57, %v9006_v61 }
 0x4a7   : > { %v4277_v16 = vadd.f32 %v4199_v43, %v4017_v2  ;;  %v4308_v54 = vmax.f32 %v4276_v26, 0.0  ;;  %v4021_v26 = vadd.f32 %v9003_v48, %v8983_v5  ;;  %v3477_v48 = vadd.f32 %v8905_v32, %v3173_v55  ;;  %v9112_v5 = vpop.f32.mrf.mxu0 }
 0x4a8   : > { %v4201_v18 = vpop.f32.mrf.mxu1  ;;  %v3747_v32 = vadd.f32 %v9001_v10, %v3478_v39  ;;  %v3178_v10 = vadd.f32 %v8858_v59, %v8901_v52 }
 0x4a9   : > { %v4278_v22 = vadd.f32 %v4201_v18, %v4018_v38  ;;  %v4309_v2 = vmax.f32 %v4277_v16, 0.0  ;;  %v3746_v18 = vadd.f32 %v8997_v13, %v3477_v48  ;;  %v3177_v13 = vadd.f32 %v8853_v6, %v8896_v41 }
 0x4aa   : > { %v4203_v33 = vpop.f32.mrf.mxu1 }
 0x4ab   : > { %v4310_v23 = vmax.f32 %v4278_v22, 0.0  ;;  %v4279_v4 = vadd.f32 %v4203_v33, %v4019_v29  ;;  %v4024_v22 = vadd.f32 %v9017_v50, %v8992_v12  ;;  %v9119_v33 = vpop.f32.mrf.mxu0  ;;  %v4027_v50 = vadd.f32 %v9038_v1, %v3747_v32  ;;  %v9716_v32 = vld [vmem:[#allocation29_spill] sm:$0xff] }
 0x4ac   : > { %v4207_v17 = vpop.f32.mrf.mxu1  ;;  %v3482_v1 = vadd.f32 %v8921_v20, %v3178_v10 }
 0x4ad   : > { %v4360_v38 = vpack.c.bf16 %v4310_v23, %v4308_v54  ;;  %v4311_v43 = vmax.f32 %v4279_v4, 0.0  ;;  %v4280_v30 = vadd.f32 %v4207_v17, %v4020_v34  ;;  %v4025_v23 = vadd.f32 %v9024_v40, %v8995_v25  ;;  %v9132_v40 = vpop.f32.mrf.mxu0 }
 0x4ae   : > { %v4209_v15 = vpop.f32.mrf.mxu1  ;;  %v4026_v4 = vadd.f32 %v9031_v11, %v3746_v18  ;;  %v3481_v25 = vadd.f32 %v8919_v28, %v3177_v13  ;;  %v3751_v28 = vadd.f32 %v9019_v19, %v3482_v1  ;;  %v9710_v19 = vld [vmem:[#allocation11_spill] sm:$0xff]  ;;  %v9714_v18 = vld [vmem:[#allocation26_spill] sm:$0xff] }
 0x4af   : > { %v4361_v7 = vpack.c.bf16 %v4311_v43, %v4309_v2  ;;  %v4281_v16 = vadd.f32 %v4209_v15, %v4021_v26  ;;  %v4312_v27 = vmax.f32 %v4280_v30, 0.0  ;;  %v4029_v30 = vadd.f32 %v9052_v53, %v9011_v31  ;;  %v9711_v53 = vld [vmem:[#allocation14_spill] sm:$0xff] }
 0x4b0   : > { %v4211_v42 = vpop.f32.mrf.mxu1  ;;  %v4031_v61 = vadd.f32 %v9065_v21, %v3751_v28  ;;  %v9712_v21 = vld [vmem:[#allocation15_spill] sm:$0xff] }
 0x4b1   : > { %v4282_v9 = vadd.f32 %v4211_v42, %v4022_v62  ;;  %6423 = vmatprep.mubr.msk.bf16.mxu0 %vm4436_vm9, %v4361_v7  ;;  %6441 = vmatprep.mubr.msk.bf16.mxu1 %vm4436_vm9, %v4361_v7  ;;  %v4313_v58 = vmax.f32 %v4281_v16, 0.0  ;;  %v9139_v62 = vpop.f32.mrf.mxu0 }
 0x4b2   : > { %v4213_v24 = vpop.f32.mrf.mxu1  ;;  %4494 = vmatmul.mubr.bf16.vlgmr.msra.gmra.mxu0 %v4360_v38  ;;  %4671 = vmatmul.mubr.bf16.vlgmr.msra.gmra.mxu1 %v4360_v38  ;;  %v3750_v38 = vadd.f32 %v9015_v8, %v3481_v25  ;;  %v3181_v8 = vadd.f32 %v8853_v6, %v8910_v47 }
 0x4b3   : > { %v4314_v37 = vmax.f32 %v4282_v9, 0.0  ;;  %v4283_v56 = vadd.f32 %v4213_v24, %v4023_v14  ;;  %v3182_v9 = vadd.f32 %v8858_v59, %v9710_v19  ;;  %v9725_v19 = vld [vmem:[#allocation31_spill] sm:$0xff] }
 0x4b4   : > { %v4217_v29 = vpop.f32.mrf.mxu1  ;;  %v4030_v55 = vadd.f32 %v9059_v60, %v3750_v38  ;;  %v3485_v31 = vadd.f32 %v9711_v53, %v3181_v8  ;;  %v9152_v60 = vpop.f32.mrf.mxu0 }
 0x4b5   : > { %v4362_v44 = vpack.c.bf16 %v4314_v37, %v4312_v27  ;;  %v4315_v3 = vmax.f32 %v4283_v56, 0.0  ;;  %v4284_v51 = vadd.f32 %v4217_v29, %v4024_v22  ;;  %v3486_v27 = vadd.f32 %v9712_v21, %v3182_v9  ;;  %v9713_v37 = vld [vmem:[#allocation28_spill] sm:$0xff]  ;;  %v9715_v29 = vld [vmem:[#allocation41_spill] sm:$0xff] }
 0x4b6   : > { %v4219_v54 = vpop.f32.mrf.mxu1  ;;  %v3754_v56 = vadd.f32 %v9713_v37, %v3485_v31  ;;  %v4032_v22 = vadd.f32 %v9715_v29, %v9714_v18  ;;  %v4037_v9 = vadd.f32 %v9119_v33, %v9725_v19  ;;  %v9727_v37 = vld [vmem:[#allocation17_spill] sm:$0xff]  ;;  %v9728_v33 = vld [vmem:[#allocation22_spill] sm:$0xff] }
 0x4b7   : > { %v4363_v36 = vpack.c.bf16 %v4315_v3, %v4313_v58  ;;  %v4285_v12 = vadd.f32 %v4219_v54, %v4025_v23  ;;  %v4316_v41 = vmax.f32 %v4284_v51, 0.0  ;;  %v3755_v54 = vadd.f32 %v9716_v32, %v3486_v27  ;;  %v3999_v23 = vpop.f32.mrf.mxu0 }
 0x4b8   : > { %v4221_v35 = vpop.f32.mrf.mxu1  ;;  %v4034_v13 = vadd.f32 %v9092_v49, %v3754_v56  ;;  %v3190_v56 = vadd.f32 %v8858_v59, %v9727_v37 }
 0x4b9   : > { %v4286_v17 = vadd.f32 %v4221_v35, %v4026_v4  ;;  %6424 = vmatprep.mubr.msk.bf16.mxu0 %vm4436_vm9, %v4363_v36  ;;  %6442 = vmatprep.mubr.msk.bf16.mxu1 %vm4436_vm9, %v4363_v36  ;;  %v4317_v15 = vmax.f32 %v4285_v12, 0.0  ;;  %v9717_v36 = vld [vmem:[#allocation27_spill] sm:$0xff]  ;;  %v9718_v12 = vld [vmem:[#allocation12_spill] sm:$0xff]  ;;  %v4035_v25 = vadd.f32 %v9099_v63, %v3755_v54  ;;  %v4001_v49 = vpop.f32.mrf.mxu0 }
 0x4ba   : > { %v4223_v11 = vpop.f32.mrf.mxu1  ;;  %4502 = vmatmul.mubr.bf16.gmra.mxu0 %v4362_v44  ;;  %4679 = vmatmul.mubr.bf16.gmra.mxu1 %v4362_v44  ;;  %v4033_v51 = vadd.f32 %v9083_v45, %v9717_v36  ;;  %v9720_v45 = vld [vmem:[#allocation18_spill] sm:$0xff] }
 0x4bb   : > { %v4318_v34 = vmax.f32 %v4286_v17, 0.0  ;;  %v4287_v2 = vadd.f32 %v4223_v11, %v4027_v50  ;;  %v3185_v17 = vadd.f32 %v8853_v6, %v9718_v12 }
 0x4bc   : > { %v4227_v43 = vpop.f32.mrf.mxu1 }
 0x4bd   : > { %v4364_v52 = vpack.c.bf16 %v4318_v34, %v4316_v41  ;;  %v4319_v26 = vmax.f32 %v4287_v2, 0.0  ;;  %v4288_v42 = vadd.f32 %v4227_v43, %v4028_v0  ;;  %v9719_v34 = vld [vmem:[#allocation13_spill] sm:$0xff]  ;;  %v3489_v1 = vadd.f32 %v9720_v45, %v3185_v17  ;;  %v9734_v45 = vld [vmem:[#allocation20_spill] sm:$0xff] }
 0x4be   : > { %v4229_v7 = vpop.f32.mrf.mxu1  ;;  %v3186_v2 = vadd.f32 %v8858_v59, %v9719_v34 }
 0x4bf   : > { %v4365_v20 = vpack.c.bf16 %v4319_v26, %v4317_v15  ;;  %v4289_v57 = vadd.f32 %v4229_v7, %v4029_v30  ;;  %v4320_v47 = vmax.f32 %v4288_v42, 0.0  ;;  %v9722_v26 = vld [vmem:[#allocation32_spill] sm:$0xff]  ;;  %v9723_v30 = vld [vmem:[#allocation30_spill] sm:$0xff] }
 0x4c0   : > { %v4231_v14 = vpop.f32.mrf.mxu1  ;;  %v3758_v28 = vadd.f32 %v9722_v26, %v3489_v1  ;;  %v3193_v1 = vadd.f32 %v8853_v6, %v9734_v45 }
 0x4c1   : > { %v4290_v16 = vadd.f32 %v4231_v14, %v4030_v55  ;;  %6425 = vmatprep.mubr.msk.bf16.mxu0 %vm4436_vm9, %v4365_v20  ;;  %6443 = vmatprep.mubr.msk.bf16.mxu1 %vm4436_vm9, %v4365_v20  ;;  %v4321_v58 = vmax.f32 %v4289_v57, 0.0  ;;  %v4036_v55 = vadd.f32 %v9112_v5, %v9723_v30  ;;  %v9724_v14 = vld [vmem:[#allocation33_spill] sm:$0xff]  ;;  %v4003_v57 = vpop.f32.mrf.mxu0 }
 0x4c2   : > { %v4233_v46 = vpop.f32.mrf.mxu1  ;;  %4510 = vmatmul.mubr.bf16.gmra.mxu0 %v4364_v52  ;;  %4687 = vmatmul.mubr.bf16.gmra.mxu1 %v4364_v52  ;;  %v9721_v52 = vld [vmem:[#allocation19_spill] sm:$0xff]  ;;  %v4038_v53 = vadd.f32 %v9132_v40, %v3758_v28  ;;  %v9737_v30 = vld [vmem:[#allocation25_spill] sm:$0xff] }
 0x4c3   : > { %v4322_v48 = vmax.f32 %v4290_v16, 0.0  ;;  %v4291_v24 = vadd.f32 %v4233_v46, %v4031_v61  ;;  %v3490_v63 = vadd.f32 %v9721_v52, %v3186_v2  ;;  %v4007_v40 = vpop.f32.mrf.mxu0 }
 0x4c4   : > { %v4237_v39 = vpop.f32.mrf.mxu1 }
 0x4c5   : > { %v4366_v44 = vpack.c.bf16 %v4322_v48, %v4320_v47  ;;  %v4323_v3 = vmax.f32 %v4291_v24, 0.0  ;;  %v4292_v50 = vadd.f32 %v4237_v39, %v4032_v22  ;;  %v3759_v61 = vadd.f32 %v9724_v14, %v3490_v63  ;;  %v9726_v47 = vld [vmem:[#allocation16_spill] sm:$0xff]  ;;  %v4009_v17 = vpop.f32.mrf.mxu0  ;;  %v9739_v14 = vld [vmem:[#allocation38_spill] sm:$0xff] }
 0x4c6   : > { %v4239_v4 = vpop.f32.mrf.mxu1  ;;  %v3189_v48 = vadd.f32 %v8853_v6, %v9726_v47  ;;  %v9736_v63 = vld [vmem:[#allocation24_spill] sm:$0xff] }
 0x4c7   : > { %v4367_v35 = vpack.c.bf16 %v4323_v3, %v4321_v58  ;;  %v4293_v11 = vadd.f32 %v4239_v4, %v4033_v51  ;;  %v4324_v43 = vmax.f32 %v4292_v50, 0.0  ;;  %v4039_v5 = vadd.f32 %v9139_v62, %v3759_v61  ;;  %v9730_v3 = vld [vmem:[#allocation36_spill] sm:$0xff]  ;;  %v9731_v4 = vld [vmem:[#allocation34_spill] sm:$0xff]  ;;  %v9732_v50 = vld [vmem:[#allocation37_spill] sm:$0xff] }
 0x4c8   : > { %v4241_v10 = vpop.f32.mrf.mxu1  ;;  %v3493_v39 = vadd.f32 %v9728_v33, %v3189_v48  ;;  %v4040_v36 = vadd.f32 %v9152_v60, %v9731_v4  ;;  %v9735_v60 = vld [vmem:[#allocation21_spill] sm:$0xff]  ;;  %v3497_v26 = vadd.f32 %v9736_v63, %v3193_v1  ;;  %v4044_v61 = vadd.f32 %v4007_v40, %v9739_v14 }
 0x4c9   : > { %v4294_v41 = vadd.f32 %v4241_v10, %v4034_v13  ;;  %6426 = vmatprep.mubr.msk.bf16.mxu0 %vm4436_vm9, %v4367_v35  ;;  %6444 = vmatprep.mubr.msk.bf16.mxu1 %vm4436_vm9, %v4367_v35  ;;  %v4325_v20 = vmax.f32 %v4293_v11, 0.0  ;;  %v3194_v52 = vadd.f32 %v8858_v59, %v9735_v60  ;;  %v9740_v59 = vld [vmem:[#allocation42_spill] sm:$0xff] }
 0x4ca   : > { %v4243_v38 = vpop.f32.mrf.mxu1  ;;  %4518 = vmatmul.mubr.bf16.gmra.mxu0 %v4366_v44  ;;  %4695 = vmatmul.mubr.bf16.gmra.mxu1 %v4366_v44  ;;  %v9729_v44 = vld [vmem:[#allocation23_spill] sm:$0xff]  ;;  %v3762_v32 = vadd.f32 %v9730_v3, %v3493_v39 }
 0x4cb   : > { %v4326_v0 = vmax.f32 %v4294_v41, 0.0  ;;  %v4295_v15 = vadd.f32 %v4243_v38, %v4035_v25  ;;  %v3494_v62 = vadd.f32 %v9729_v44, %v3190_v56  ;;  %v9733_v25 = vld [vmem:[#allocation35_spill] sm:$0xff] }
 0x4cc   : > { %v4247_v7 = vpop.f32.mrf.mxu1  ;;  %v4041_v11 = vadd.f32 %v3999_v23, %v9733_v25  ;;  %v4042_v41 = vadd.f32 %v4001_v49, %v3762_v32  ;;  %v4011_v23 = vpop.f32.mrf.mxu0 }
 0x4cd   : > { %v4368_v42 = vpack.c.bf16 %v4326_v0, %v4324_v43  ;;  %v4327_v8 = vmax.f32 %v4295_v15, 0.0  ;;  %v4296_v46 = vadd.f32 %v4247_v7, %v4036_v55  ;;  %v3763_v12 = vadd.f32 %v9732_v50, %v3494_v62 }
 0x4ce   : > { %v4249_v16 = vpop.f32.mrf.mxu1  ;;  %v3498_v55 = vadd.f32 %v9737_v30, %v3194_v52  ;;  %v7530_v62 = vmov 0.0  }
 0x4cf   : > { %v4369_v31 = vpack.c.bf16 %v4327_v8, %v4325_v20  ;;  %v4297_v21 = vadd.f32 %v4249_v16, %v4037_v9  ;;  %v4328_v29 = vmax.f32 %v4296_v46, 0.0  ;;  %v4043_v43 = vadd.f32 %v4003_v57, %v3763_v12  ;;  %v9738_v20 = vld [vmem:[#allocation40_spill] sm:$0xff]  ;;  %v9741_v46 = vld [vmem:[#allocation39_spill] sm:$0xff]  ;;  %6801 = vmatprep.subr.bf16.mxu0 %v7530_v62 }
 0x4d0   : > { %v4251_v24 = vpop.f32.mrf.mxu1  ;;  %v3767_v9 = vadd.f32 %v9740_v59, %v3498_v55  ;;  %v4045_v47 = vadd.f32 %v4009_v17, %v9741_v46 }
 0x4d1   : > { %v4298_v27 = vadd.f32 %v4251_v24, %v4038_v53  ;;  %6427 = vmatprep.mubr.msk.bf16.mxu0 %vm4436_vm9, %v4369_v31  ;;  %6445 = vmatprep.mubr.msk.bf16.mxu1 %vm4436_vm9, %v4369_v31  ;;  %v4329_v51 = vmax.f32 %v4297_v21, 0.0  ;;  %v4013_v53 = vpop.f32.mrf.mxu0 }
 0x4d2   : > { %v4253_v18 = vpop.f32.mrf.mxu1  ;;  %4526 = vmatmul.mubr.bf16.gmra.mxu0 %v4368_v42  ;;  %4703 = vmatmul.mubr.bf16.gmra.mxu1 %v4368_v42  ;;  %v3766_v42 = vadd.f32 %v9738_v20, %v3497_v26 }
 0x4d3   : > { %v4330_v22 = vmax.f32 %v4298_v27, 0.0  ;;  %v4299_v58 = vadd.f32 %v4253_v18, %v4039_v5  ;;  %v4047_v27 = vadd.f32 %v4013_v53, %v3767_v9 }
 0x4d4   : > { %v4257_v54 = vpop.f32.mrf.mxu1  ;;  %v4046_v48 = vadd.f32 %v4011_v23, %v3766_v42 }
 0x4d5   : > { %v4370_v13 = vpack.c.bf16 %v4330_v22, %v4328_v29  ;;  %v4331_v35 = vmax.f32 %v4299_v58, 0.0  ;;  %v4300_v2 = vadd.f32 %v4257_v54, %v4040_v36 }
 0x4d6   : > { %v4259_v10 = vpop.f32.mrf.mxu1 }
 0x4d7   : > { %v4371_v34 = vpack.c.bf16 %v4331_v35, %v4329_v51  ;;  %v4301_v0 = vadd.f32 %v4259_v10, %v4041_v11  ;;  %v4332_v28 = vmax.f32 %v4300_v2, 0.0 }
 0x4d8   : > { %v4261_v38 = vpop.f32.mrf.mxu1 }
 0x4d9   : > { %v4302_v15 = vadd.f32 %v4261_v38, %v4042_v41  ;;  %6428 = vmatprep.mubr.msk.bf16.mxu0 %vm4436_vm9, %v4371_v34  ;;  %6446 = vmatprep.mubr.msk.bf16.mxu1 %vm4436_vm9, %v4371_v34  ;;  %v4333_v57 = vmax.f32 %v4301_v0, 0.0 }
 0x4da   : > { %v4263_v49 = vpop.f32.mrf.mxu1  ;;  %4534 = vmatmul.mubr.bf16.gmra.mxu0 %v4370_v13  ;;  %4711 = vmatmul.mubr.bf16.gmra.mxu1 %v4370_v13 }
 0x4db   : > { %v4334_v7 = vmax.f32 %v4302_v15, 0.0  ;;  %v4303_v6 = vadd.f32 %v4263_v49, %v4043_v43 }
 0x4dc   : > { %v4267_v8 = vpop.f32.mrf.mxu1 }
 0x4dd   : > { %v4372_v16 = vpack.c.bf16 %v4334_v7, %v4332_v28  ;;  %v4335_v19 = vmax.f32 %v4303_v6, 0.0  ;;  %v4304_v5 = vadd.f32 %v4267_v8, %v4044_v61 }
 0x4de   : > { %v4269_v31 = vpop.f32.mrf.mxu1 }
 0x4df   : > { %v4373_v24 = vpack.c.bf16 %v4335_v19, %v4333_v57  ;;  %v4305_v37 = vadd.f32 %v4269_v31, %v4045_v47  ;;  %v4336_v39 = vmax.f32 %v4304_v5, 0.0 }
 0x4e0   : > { %v4271_v21 = vpop.f32.mrf.mxu1 }
 0x4e1   : > { %v4306_v56 = vadd.f32 %v4271_v21, %v4046_v48  ;;  %6429 = vmatprep.mubr.msk.bf16.mxu0 %vm4436_vm9, %v4373_v24  ;;  %6447 = vmatprep.mubr.msk.bf16.mxu1 %vm4436_vm9, %v4373_v24  ;;  %v4337_v29 = vmax.f32 %v4305_v37, 0.0 }
 0x4e2   : > { %v4273_v33 = vpop.f32.mrf.mxu1  ;;  %4542 = vmatmul.mubr.bf16.gmra.mxu0 %v4372_v16  ;;  %4719 = vmatmul.mubr.bf16.gmra.mxu1 %v4372_v16 }
 0x4e3   : > { %v4338_v40 = vmax.f32 %v4306_v56, 0.0  ;;  %v4307_v18 = vadd.f32 %v4273_v33, %v4047_v27 }
 0x4e5   : > { %v4374_v22 = vpack.c.bf16 %v4338_v40, %v4336_v39  ;;  %v4339_v58 = vmax.f32 %v4307_v18, 0.0 }
 0x4e7   : > { %v4375_v44 = vpack.c.bf16 %v4339_v58, %v4337_v29 }
 0x4e9   : > { %6430 = vmatprep.mubr.msk.bf16.mxu0 %vm4436_vm9, %v4375_v44  ;;  %6448 = vmatprep.mubr.msk.bf16.mxu1 %vm4436_vm9, %v4375_v44 }
 0x4ea   : > { %4550 = vmatmul.mubr.bf16.gmra.mxu0 %v4374_v22  ;;  %4727 = vmatmul.mubr.bf16.gmra.mxu1 %v4374_v22 }
 0x4eb   : > { %6817 = vmatprep.mubr.msk.bf16.mxu0 %vm7531_vm10, %v7530_v62 }
 0x572   : > { %v4495_v3 = vpop.f32.mrf.mxu0  ;;  %v4672_v32 = vpop.f32.mrf.mxu1 }
 0x573   : > { %v4735_v54 = vmax.f32 %v4495_v3, %v4672_v32 }
 0x574   : > { %v4497_v4 = vpop.f32.mrf.mxu0  ;;  %v4674_v36 = vpop.f32.mrf.mxu1 }
 0x576   : > { %v4498_v51 = vpop.f32.mrf.mxu0  ;;  %v4675_v13 = vpop.f32.mrf.mxu1 }
 0x577   : > { %v4736_v35 = vmax.f32 %v4498_v51, %v4675_v13 }
 0x578   : > { %v4500_v50 = vpop.f32.mrf.mxu0  ;;  %v4677_v12 = vpop.f32.mrf.mxu1 }
 0x579   : > { %v9211_v17 = vpack.c.bf16 %v4736_v35, %v4735_v54 }
 0x57a   : > { %v4503_v10 = vpop.f32.mrf.mxu0  ;;  %v4680_v25 = vpop.f32.mrf.mxu1 }
 0x57b   : > { %v4737_v11 = vmax.f32 %v4503_v10, %v4680_v25 }
 0x57c   : > { %v4505_v41 = vpop.f32.mrf.mxu0  ;;  %v4682_v34 = vpop.f32.mrf.mxu1 }
 0x57e   : > { %v4506_v2 = vpop.f32.mrf.mxu0  ;;  %v4683_v45 = vpop.f32.mrf.mxu1 }
 0x57f   : > { %v4738_v1 = vmax.f32 %v4506_v2, %v4683_v45 }
 0x580   : > { %v4508_v38 = vpop.f32.mrf.mxu0  ;;  %v4685_v43 = vpop.f32.mrf.mxu1 }
 0x581   : > { %v9213_v0 = vpack.c.bf16 %v4738_v1, %v4737_v11 }
 0x582   : > { %v9215_v15 = vpop.f32.mrf.mxu0  ;;  %v9217_v60 = vpop.f32.mrf.mxu1 }
 0x583   : > { %v4739_v52 = vmax.f32 %v9215_v15, %v9217_v60  ;;  %v7419_v15 = vld [vmem:[%s9635_s11 + $0x8] sm:$0xff]   ;;  %v7420_v60 = vld [vmem:[%s9635_s11 + $0x10] sm:$0xff]  }
 0x584   : > { %v4513_v63 = vpop.f32.mrf.mxu0  ;;  %v4690_v26 = vpop.f32.mrf.mxu1 }
 0x586   : > { %v9221_v23 = vpop.f32.mrf.mxu0  ;;  %v9223_v49 = vpop.f32.mrf.mxu1 }
 0x588   : > { %v4516_v28 = vpop.f32.mrf.mxu0  ;;  %v4693_v7 = vpop.f32.mrf.mxu1 }
 0x589   : > { %v4740_v28 = vmax.f32 %v9221_v23, %v9223_v49  ;;  %v7422_v23 = vld [vmem:[%s9635_s11 + $0x20] ss:$0 sps:$4 sm:$0xff]  }
 0x58a   : > { %v9225_v6 = vpop.f32.mrf.mxu0  ;;  %v9227_v30 = vpop.f32.mrf.mxu1  ;;  %v7423_v49 = vld [vmem:[%s9636_s12] sm:$0xff]  }
 0x58b   : > { %v4741_v26 = vmax.f32 %v9225_v6, %v9227_v30  ;;  %v7418_v6 = vld [vmem:[%s9635_s11] sm:$0xff]   ;;  %v7426_v30 = vld [vmem:[%s9636_s12 + $0x18] sm:$0xff]  }
 0x58c   : > { %v4521_v55 = vpop.f32.mrf.mxu0  ;;  %v4698_v20 = vpop.f32.mrf.mxu1 }
 0x58d   : > { %v4762_v55 = vpack.c.bf16 %v4740_v28, %v4739_v52  ;;  %v7421_v52 = vld [vmem:[%s9635_s11 + $0x18] sm:$0xff]   ;;  %v7427_v20 = vld [vmem:[%s9636_s12 + $0x20] ss:$0 sps:$4 sm:$0xff]  }
 0x58e   : > { %v4522_v42 = vpop.f32.mrf.mxu0  ;;  %v4699_v8 = vpop.f32.mrf.mxu1 }
 0x58f   : > { %v4742_v43 = vmax.f32 %v4522_v42, %v4699_v8  ;;  %v7433_v42 = vld [vmem:[%s9637_s13 + $0x70] sm:$0xff]   ;;  %v7428_v8 = vld [vmem:[%s9637_s13 + $0x48] sm:$0xff]  }
 0x590   : > { %v4524_v14 = vpop.f32.mrf.mxu0  ;;  %v4701_v61 = vpop.f32.mrf.mxu1  ;;  %6873 = vmatprep.subr.bf16.mxu1 %v7428_v8 }
 0x591   : > { %v4763_v7 = vpack.c.bf16 %v4742_v43, %v4741_v26  ;;  %6874 = vmatpush3.bf16.msra.mxu1 %v7428_v8  ;;  %v7435_v14 = vld [vmem:[%s9637_s13 + $0x68] sm:$0xff]   ;;  %v7429_v61 = vld [vmem:[%s9637_s13 + $0x40] sm:$0xff]  }
 0x592   : > { %v4527_v57 = vpop.f32.mrf.mxu0  ;;  %v4704_v16 = vpop.f32.mrf.mxu1  ;;  %6875 = vmatprep.subr.bf16.mxu1 %v7429_v61 }
 0x593   : > { %v4743_v38 = vmax.f32 %v4527_v57, %v4704_v16  ;;  %v7437_v57 = vld [vmem:[%s9637_s13 + $0x60] sm:$0xff]   ;;  %v7430_v16 = vld [vmem:[%s9637_s13 + $0x38] sm:$0xff]  }
 0x594   : > { %v4529_v19 = vpop.f32.mrf.mxu0  ;;  %v4706_v59 = vpop.f32.mrf.mxu1 }
 0x595   : > { %6876 = vmatpush3.bf16.msra.mxu1 %v7429_v61  ;;  %v7439_v19 = vld [vmem:[%s9637_s13 + $0x58] sm:$0xff]   ;;  %v7431_v59 = vld [vmem:[%s9637_s13 + $0x30] sm:$0xff]  }
 0x596   : > { %v4530_v9 = vpop.f32.mrf.mxu0  ;;  %v4707_v53 = vpop.f32.mrf.mxu1  ;;  %6877 = vmatprep.subr.bf16.mxu1 %v7430_v16 }
 0x597   : > { %v4744_v45 = vmax.f32 %v4530_v9, %v4707_v53  ;;  %v7441_v9 = vld [vmem:[%s9637_s13 + $0x50] sm:$0xff]   ;;  %v7432_v53 = vld [vmem:[%s9637_s13 + $0x28] sm:$0xff]  }
 0x598   : > { %v4532_v31 = vpop.f32.mrf.mxu0  ;;  %v4709_v46 = vpop.f32.mrf.mxu1 }
 0x599   : > { %v4764_v63 = vpack.c.bf16 %v4744_v45, %v4743_v38  ;;  %6878 = vmatpush3.bf16.msra.mxu1 %v7430_v16  ;;  %v9336_v31 = vld [vmem:[%s9637_s13 + $0xc0] sm:$0xff]   ;;  %v7445_v16 = vld [vmem:[%s9637_s13 + $0xb8] sm:$0xff]  }
 0x59a   : > { %v4535_v47 = vpop.f32.mrf.mxu0  ;;  %v4712_v48 = vpop.f32.mrf.mxu1  ;;  %6879 = vmatprep.subr.bf16.mxu1 %v7431_v59  ;;  %v9341_v46 = vld [vmem:[%s9637_s13 + $0x20] sm:$0xff]  }
 0x59b   : > { %v4745_v2 = vmax.f32 %v4535_v47, %v4712_v48 }
 0x59c   : > { %v4537_v24 = vpop.f32.mrf.mxu0  ;;  %v4714_v5 = vpop.f32.mrf.mxu1 }
 0x59d   : > { %6880 = vmatpush3.bf16.msra.mxu1 %v7431_v59 }
 0x59e   : > { %v4538_v21 = vpop.f32.mrf.mxu0  ;;  %v4715_v27 = vpop.f32.mrf.mxu1  ;;  %6881 = vmatprep.subr.bf16.mxu1 %v7432_v53 }
 0x59f   : > { %v4746_v41 = vmax.f32 %v4538_v21, %v4715_v27 }
 0x5a0   : > { %v4540_v37 = vpop.f32.mrf.mxu0  ;;  %v4717_v56 = vpop.f32.mrf.mxu1 }
 0x5a1   : > { %v4765_v1 = vpack.c.bf16 %v4746_v41, %v4745_v2  ;;  %6882 = vmatpush3.bf16.msra.mxu1 %v7432_v53 }
 0x5a2   : > { %v4543_v33 = vpop.f32.mrf.mxu0  ;;  %v4720_v39 = vpop.f32.mrf.mxu1  ;;  %6891 = vmatprep.subr.bf16.mxu1 %v9341_v46 }
 0x5a3   : > { %v4747_v11 = vmax.f32 %v4543_v33, %v4720_v39 }
 0x5a4   : > { %v4545_v40 = vpop.f32.mrf.mxu0  ;;  %v4722_v18 = vpop.f32.mrf.mxu1 }
 0x5a6   : > { %v4546_v29 = vpop.f32.mrf.mxu0  ;;  %v4723_v22 = vpop.f32.mrf.mxu1 }
 0x5a7   : > { %v4748_v10 = vmax.f32 %v4546_v29, %v4723_v22 }
 0x5a8   : > { %v4548_v58 = vpop.f32.mrf.mxu0  ;;  %v4725_v44 = vpop.f32.mrf.mxu1 }
 0x5a9   : > { %v4766_v34 = vpack.c.bf16 %v4748_v10, %v4747_v11 }
 0x5aa   : > { %v4551_v3 = vpop.f32.mrf.mxu0  ;;  %v4728_v32 = vpop.f32.mrf.mxu1 }
 0x5ab   : > { %v4749_v13 = vmax.f32 %v4551_v3, %v4728_v32 }
 0x5ac   : > { %v4553_v54 = vpop.f32.mrf.mxu0  ;;  %v4730_v4 = vpop.f32.mrf.mxu1 }
 0x5ae   : > { %v4554_v36 = vpop.f32.mrf.mxu0  ;;  %v4731_v51 = vpop.f32.mrf.mxu1 }
 0x5af   : > { %v4750_v35 = vmax.f32 %v4554_v36, %v4731_v51 }
 0x5b0   : > { %v4556_v50 = vpop.f32.mrf.mxu0  ;;  %v4733_v12 = vpop.f32.mrf.mxu1 }
 0x5b1   : > { %v4767_v25 = vpack.c.bf16 %v4750_v35, %v4749_v13 }
 0x5b3   : > { %6802 = vmatpush3.bf16.msra.mxu0 %v4767_v25 }
 0x5b4   : > { %6803 = vmatprep.subr.bf16.mxu0 %v7530_v62 }
 0x5b7   : > { %6804 = vmatpush3.bf16.msra.mxu0 %v4766_v34 }
 0x5b8   : > { %6805 = vmatprep.subr.bf16.mxu0 %v7530_v62 }
 0x5bb   : > { %6806 = vmatpush3.bf16.msra.mxu0 %v4765_v1 }
 0x5bc   : > { %6807 = vmatprep.subr.bf16.mxu0 %v7530_v62 }
 0x5bf   : > { %6808 = vmatpush3.bf16.msra.mxu0 %v4764_v63 }
 0x5c0   : > { %6809 = vmatprep.subr.bf16.mxu0 %v7530_v62 }
 0x5c3   : > { %6810 = vmatpush3.bf16.msra.mxu0 %v4763_v7 }
 0x5c4   : > { %6811 = vmatprep.subr.bf16.mxu0 %v7530_v62 }
 0x5c7   : > { %6812 = vmatpush3.bf16.msra.mxu0 %v4762_v55 }
 0x5c8   : > { %6813 = vmatprep.subr.bf16.mxu0 %v7530_v62 }
 0x5cb   : > { %6814 = vmatpush3.bf16.msra.mxu0 %v9213_v0 }
 0x5cc   : > { %6815 = vmatprep.subr.bf16.mxu0 %v7530_v62 }
 0x5cf   : > { %6816 = vmatpush3.bf16.msra.mxu0 %v9211_v17 }
 0x5d0   : > { %6837 = vmatprep.subr.bf16.mxu0 %v7530_v62 }
 0x5d2   : > { %6818 = vmatmul.mubr.bf16.vlgmr.msra.gmra.mxu0 %v7418_v6 }
 0x5d3   : > { %6838 = vmatpush3.bf16.msra.mxu0 %v4767_v25  ;;  %6821 = vmatprep.mubr.msk.bf16.mxu0 %vm7531_vm10, %v7530_v62 }
 0x5d4   : > { %6839 = vmatprep.subr.bf16.mxu0 %v7530_v62 }
 0x5d7   : > { %6840 = vmatpush3.bf16.msra.mxu0 %v4766_v34 }
 0x5d8   : > { %6841 = vmatprep.subr.bf16.mxu0 %v7530_v62 }
 0x5da   : > { %6822 = vmatmul.mubr.bf16.gmra.mxu0 %v7419_v15 }
 0x5db   : > { %6842 = vmatpush3.bf16.msra.mxu0 %v4765_v1  ;;  %6825 = vmatprep.mubr.msk.bf16.mxu0 %vm7531_vm10, %v7530_v62 }
 0x5dc   : > { %6843 = vmatprep.subr.bf16.mxu0 %v7530_v62 }
 0x5df   : > { %6844 = vmatpush3.bf16.msra.mxu0 %v4764_v63 }
 0x5e0   : > { %6845 = vmatprep.subr.bf16.mxu0 %v7530_v62 }
 0x5e2   : > { %6826 = vmatmul.mubr.bf16.gmra.mxu0 %v7420_v60 }
 0x5e3   : > { %6846 = vmatpush3.bf16.msra.mxu0 %v4763_v7  ;;  %6829 = vmatprep.mubr.msk.bf16.mxu0 %vm7531_vm10, %v7530_v62 }
 0x5e4   : > { %6847 = vmatprep.subr.bf16.mxu0 %v7530_v62 }
 0x5e7   : > { %6848 = vmatpush3.bf16.msra.mxu0 %v4762_v55 }
 0x5e8   : > { %6849 = vmatprep.subr.bf16.mxu0 %v7530_v62 }
 0x5ea   : > { %6830 = vmatmul.mubr.bf16.gmra.mxu0 %v7421_v52 }
 0x5eb   : > { %6850 = vmatpush3.bf16.msra.mxu0 %v9213_v0  ;;  %6833 = vmatprep.mubr.msk.bf16.mxu0 %vm7531_vm10, %v7530_v62  ;;  %v7424_v0 = vld [vmem:[%s9636_s12 + $0x8] sm:$0xff]  }
 0x5ec   : > { %6851 = vmatprep.subr.bf16.mxu0 %v7530_v62 }
 0x5ef   : > { %6852 = vmatpush3.bf16.msra.mxu0 %v9211_v17  ;;  %v7425_v17 = vld [vmem:[%s9636_s12 + $0x10] sm:$0xff]  }
 0x5f0   : > { %6909 = vmatprep.subr.bf16.mxu0 %v7433_v42 }
 0x5f2   : > { %6834 = vmatmul.mubr.bf16.gmra.mxu0 %v7422_v23 }
 0x5f3   : > { %6853 = vmatprep.mubr.msk.bf16.mxu0 %vm7531_vm10, %v7530_v62 }
 0x5fa   : > { %6854 = vmatmul.mubr.bf16.vlgmr.msra.gmra.mxu0 %v7423_v49 }
 0x5fb   : > { %6857 = vmatprep.mubr.msk.bf16.mxu0 %vm7531_vm10, %v7530_v62  ;;  %6910 = vmatpush3.bf16.msra.mxu0 %v7433_v42 }
 0x5fc   : > { %6911 = vmatprep.subr.bf16.mxu0 %v7435_v14 }
 0x5ff   : > { %6912 = vmatpush3.bf16.msra.mxu0 %v7435_v14 }
 0x600   : > { %6913 = vmatprep.subr.bf16.mxu0 %v7437_v57 }
 0x602   : > { %6858 = vmatmul.mubr.bf16.gmra.mxu0 %v7424_v0 }
 0x603   : > { %6861 = vmatprep.mubr.msk.bf16.mxu0 %vm7531_vm10, %v7530_v62  ;;  %6914 = vmatpush3.bf16.msra.mxu0 %v7437_v57 }
 0x604   : > { %6915 = vmatprep.subr.bf16.mxu0 %v7439_v19 }
 0x607   : > { %6916 = vmatpush3.bf16.msra.mxu0 %v7439_v19 }
 0x608   : > { %6917 = vmatprep.subr.bf16.mxu0 %v7441_v9 }
 0x60a   : > { %6862 = vmatmul.mubr.bf16.gmra.mxu0 %v7425_v17 }
 0x60b   : > { %6865 = vmatprep.mubr.msk.bf16.mxu0 %vm7531_vm10, %v7530_v62  ;;  %6918 = vmatpush3.bf16.msra.mxu0 %v7441_v9 }
 0x60c   : > { %6945 = vmatprep.subr.bf16.mxu0 %v9336_v31 }
 0x612   : > { %6866 = vmatmul.mubr.bf16.gmra.mxu0 %v7426_v30 }
 0x613   : > { %6869 = vmatprep.mubr.msk.bf16.mxu0 %vm7531_vm10, %v7530_v62 }
 0x61a   : > { %6870 = vmatmul.mubr.bf16.gmra.mxu0 %v7427_v20 }
 0x692   : > { %v4830_v47 = vpop.f32.mrf.mxu0 }
 0x694   : > { %v6819_v48 = vpop.f32.mrf.mxu0 }
 0x696   : > { %v4833_v24 = vpop.f32.mrf.mxu0 }
 0x698   : > { %v6820_v5 = vpop.f32.mrf.mxu0 }
 0x69a   : > { %v4838_v21 = vpop.f32.mrf.mxu0 }
 0x69c   : > { %v6823_v27 = vpop.f32.mrf.mxu0 }
 0x69d   : > { %v7447_v27 = vld [vmem:[%s9637_s13 + $0xb0] sm:$0xff]  }
 0x69e   : > { %v4841_v37 = vpop.f32.mrf.mxu0 }
 0x6a0   : > { %v6824_v56 = vpop.f32.mrf.mxu0 }
 0x6a2   : > { %v4846_v33 = vpop.f32.mrf.mxu0 }
 0x6a4   : > { %v6827_v39 = vpop.f32.mrf.mxu0 }
 0x6a6   : > { %v4849_v40 = vpop.f32.mrf.mxu0 }
 0x6a8   : > { %v6828_v18 = vpop.f32.mrf.mxu0 }
 0x6aa   : > { %v9345_v29 = vpop.f32.mrf.mxu0 }
 0x6ac   : > { %v6831_v22 = vpop.f32.mrf.mxu0 }
 0x6ae   : > { %v4857_v58 = vpop.f32.mrf.mxu0 }
 0x6b0   : > { %v6832_v44 = vpop.f32.mrf.mxu0 }
 0x6b2   : > { %v9347_v3 = vpop.f32.mrf.mxu0 }
 0x6b4   : > { %v6835_v32 = vpop.f32.mrf.mxu0 }
 0x6b5   : > { %v7440_v32 = vld [vmem:[%s9637_s13 + $0x8] sm:$0xff]  }
 0x6b6   : > { %v4865_v54 = vpop.f32.mrf.mxu0 }
 0x6b8   : > { %v6836_v4 = vpop.f32.mrf.mxu0 }
 0x6ba   : > { %v4939_v36 = vpop.f32.mrf.mxu0 }
 0x6bb   : > { %v4977_v35 = vmax.f32 %v4830_v47, %v4939_v36  ;;  %v7436_v47 = vld [vmem:[%s9637_s13 + $0x18] sm:$0xff]  }
 0x6bc   : > { %v6855_v51 = vpop.f32.mrf.mxu0 }
 0x6be   : > { %v4942_v13 = vpop.f32.mrf.mxu0 }
 0x6bf   : > { %v4978_v50 = vmax.f32 %v4833_v24, %v4942_v13 }
 0x6c0   : > { %v6856_v12 = vpop.f32.mrf.mxu0 }
 0x6c1   : > { %v9349_v10 = vpack.c.bf16 %v4978_v50, %v4977_v35  ;;  %v7451_v50 = vld [vmem:[%s9637_s13 + $0xa0] sm:$0xff]  }
 0x6c2   : > { %v4947_v25 = vpop.f32.mrf.mxu0 }
 0x6c3   : > { %v5015_v41 = vshll.u32 %v9349_v10, 16  ;;  %v4979_v2 = vmax.f32 %v4838_v21, %v4947_v25  ;;  %v5013_v26 = vshrl.u32 %v9349_v10, 16  ;;  %v5275_v7 = vrot.slane %v9349_v10, 1 }
 0x6c4   : > { %v6859_v11 = vpop.f32.mrf.mxu0  ;;  %v5557_v12 = vrot.slane %v9349_v10, 2 }
 0x6c5   : > { %v5017_v43 = vrot.slane %v5015_v41, 1 }
 0x6c6   : > { %v4950_v34 = vpop.f32.mrf.mxu0 }
 0x6c7   : > { %v4980_v45 = vmax.f32 %v4841_v37, %v4950_v34  ;;  %v5018_v15 = vor.u32 %v5017_v43, %v5013_v26 }
 0x6c8   : > { %v6860_v1 = vpop.f32.mrf.mxu0 }
 0x6c9   : > { %v9352_v38 = vpack.c.bf16 %v4980_v45, %v4979_v2  ;;  %v7442_v45 = vld [vmem:[%s9637_s13] sm:$0xff]  }
 0x6ca   : > { %v4955_v63 = vpop.f32.mrf.mxu0 }
 0x6cb   : > { %v5020_v28 = vshll.u32 %v9352_v38, 16  ;;  %v5276_v55 = vrot.slane %v9352_v38, 1  ;;  %v4981_v49 = vmax.f32 %v4846_v33, %v4955_v63  ;;  %v5024_v61 = vshrl.u32 %v9352_v38, 16  ;;  %v7438_v33 = vld [vmem:[%s9637_s13 + $0x10] sm:$0xff]  }
 0x6cc   : > { %v6863_v6 = vpop.f32.mrf.mxu0  ;;  %v5558_v54 = vrot.slane %v9352_v38, 2 }
 0x6cd   : > { %v5022_v60 = vrot.slane %v5020_v28, 1  ;;  %v5277_v52 = vsel %vm3520_vm7, %v5275_v7, %v5276_v55  ;;  %v7444_v7 = vld [vmem:[%s9637_s13 + $0x98] sm:$0xff]  }
 0x6ce   : > { %v4958_v23 = vpop.f32.mrf.mxu0  ;;  %6919 = vmatprep.mubr.msk.bf16.mxu0 %vm5078_vm11, %v5277_v52  ;;  %v5559_v1 = vsel %vm4060_vm5, %v5557_v12, %v5558_v54  ;;  %v5413_v52 = vrot.slane %v5024_v61, 1 }
 0x6cf   : > { %v4982_v0 = vmax.f32 %v4849_v40, %v4958_v23  ;;  %v5023_v17 = vsel %vm3208_vm6, %v5018_v15, %v5022_v60  ;;  %v5026_v19 = vor.u32 %v5024_v61, %v5022_v60  ;;  %v7446_v15 = vld [vmem:[%s9637_s13 + $0x90] sm:$0xff]   ;;  %v5414_v23 = vrot.slane %v5020_v28, 2  ;;  %v7450_v28 = vld [vmem:[%s9637_s13 + $0x80] sm:$0xff]  }
 0x6d0   : > { %v6864_v30 = vpop.f32.mrf.mxu0  ;;  %6883 = vmatprep.mubr.msk.bf16.mxu1 %vm5078_vm11, %v5023_v17  ;;  %v5410_v17 = vrot.slane %v5013_v26, 1 }
 0x6d1   : > { %v9368_v20 = vpack.c.bf16 %v4982_v0, %v4981_v49  ;;  %v7448_v0 = vld [vmem:[%s9637_s13 + $0x88] sm:$0xff]   ;;  %v5411_v30 = vrot.slane %v5015_v41, 2  ;;  %v7452_v41 = vld [vmem:[%s9637_s13 + $0x78] sm:$0xff]  }
 0x6d2   : > { %v4963_v42 = vpop.f32.mrf.mxu0 }
 0x6d3   : > { %v5028_v8 = vshll.u32 %v9368_v20, 16  ;;  %v5278_v14 = vrot.slane %v9368_v20, 1  ;;  %v4983_v48 = vmax.f32 %v9345_v29, %v4963_v42  ;;  %v5032_v18 = vshrl.u32 %v9368_v20, 16 }
 0x6d4   : > { %v6867_v57 = vpop.f32.mrf.mxu0  ;;  %v5560_v63 = vrot.slane %v9368_v20, 2  ;;  %v5415_v42 = vor.u32 %v5414_v23, %v5413_v52 }
 0x6d5   : > { %v5030_v59 = vrot.slane %v5028_v8, 1  ;;  %v5279_v9 = vsel %vm3520_vm7, %v5276_v55, %v5278_v14  ;;  %v5417_v26 = vrot.slane %v5032_v18, 1  ;;  %v5418_v61 = vrot.slane %v5028_v8, 2 }
 0x6d6   : > { %v4966_v53 = vpop.f32.mrf.mxu0  ;;  %6920 = vmatmul.mubr.msk.bf16.vlgmr.msra.gmra.mxu0 %vm5078_vm11, %v5279_v9  ;;  %v5561_v6 = vsel %vm4060_vm5, %v5558_v54, %v5560_v63 }
 0x6d7   : > { %v4984_v24 = vmax.f32 %v4857_v58, %v4966_v53  ;;  %v5031_v5 = vsel %vm3208_vm6, %v5026_v19, %v5030_v59  ;;  %6946 = vmatpush3.bf16.msra.mxu0 %v9336_v31 }
 0x6d8   : > { %v6868_v21 = vpop.f32.mrf.mxu0  ;;  %6884 = vmatmul.mubr.msk.bf16.vlgmr.msra.gmra.mxu1 %vm5078_vm11, %v5031_v5  ;;  %6947 = vmatprep.subr.bf16.mxu0 %v7445_v16  ;;  %v7453_v5 = vld [vmem:[%s9640_s16 + $0x38] ss:$0 sps:$4 sm:$0xff]  }
 0x6d9   : > { %v9392_v37 = vpack.c.bf16 %v4984_v24, %v4983_v48  ;;  %6892 = vmatpush3.bf16.msra.mxu1 %v9341_v46  ;;  %v7449_v46 = vld [vmem:[%s9637_s13 + $0xa8] sm:$0xff]   ;;  %v5811_v21 = vsel %vm2038_vm1, %v7453_v5, 0 }
 0x6da   : > { %v4971_v56 = vpop.f32.mrf.mxu0  ;;  %6893 = vmatprep.subr.bf16.mxu1 %v7436_v47 }
 0x6db   : > { %v4985_v31 = vmax.f32 %v9347_v3, %v4971_v56  ;;  %v5036_v39 = vshll.u32 %v9392_v37, 16  ;;  %6948 = vmatpush3.bf16.msra.mxu0 %v7445_v16  ;;  %v5280_v40 = vrot.slane %v9392_v37, 1  ;;  %v5034_v3 = vor.u32 %v5032_v18, %v5030_v59  ;;  %v7456_v56 = vld [vmem:[%s9640_s16 + $0x20] sm:$0xff]  }
 0x6dc   : > { %6949 = vmatprep.subr.bf16.mxu0 %v7447_v27  ;;  %v6871_v29 = vpop.f32.mrf.mxu0  ;;  %v5040_v13 = vshrl.u32 %v9392_v37, 16  ;;  %v5562_v55 = vrot.slane %v9392_v37, 2  ;;  %v5419_v59 = vor.u32 %v5418_v61, %v5417_v26 }
 0x6dd   : > { %v9405_v22 = vpack.c.bf16 %v4985_v31, %v4985_v31  ;;  %6894 = vmatpush3.bf16.msra.mxu1 %v7436_v47  ;;  %v5038_v58 = vrot.slane %v5036_v39, 1  ;;  %v5281_v44 = vsel %vm3520_vm7, %v5278_v14, %v5280_v40  ;;  %v5412_v14 = vor.u32 %v5411_v30, %v5410_v17  ;;  %v7458_v31 = vld [vmem:[%s9640_s16 + $0x10] sm:$0xff]  }
 0x6de   : > { %6895 = vmatprep.subr.bf16.mxu1 %v7438_v33  ;;  %6923 = vmatprep.mubr.msk.bf16.mxu0 %vm5078_vm11, %v5281_v44  ;;  %v4974_v4 = vpop.f32.mrf.mxu0  ;;  %v5563_v60 = vsel %vm4060_vm5, %v5560_v63, %v5562_v55  ;;  %v5421_v57 = vrot.slane %v5040_v13, 1  ;;  %v5422_v16 = vrot.slane %v5036_v39, 2 }
 0x6df   : > { %v5044_v36 = vshll.u32 %v9405_v22, 16  ;;  %v5282_v51 = vrot.slane %v9405_v22, 1  ;;  %6950 = vmatpush3.bf16.msra.mxu0 %v7447_v27  ;;  %v5039_v35 = vsel %vm3208_vm6, %v5034_v3, %v5038_v58  ;;  %v5042_v11 = vor.u32 %v5040_v13, %v5038_v58  ;;  %v7454_v27 = vld [vmem:[%s9640_s16 + $0x30] sm:$0xff]  }
 0x6e0   : > { %6951 = vmatprep.subr.bf16.mxu0 %v7449_v46  ;;  %v6872_v25 = vpop.f32.mrf.mxu0  ;;  %6887 = vmatprep.mubr.msk.bf16.mxu1 %vm5078_vm11, %v5039_v35  ;;  %v5564_v49 = vrot.slane %v9405_v22, 2  ;;  %v5425_v19 = vshrl.u32 %v9405_v22, 16  ;;  %v5423_v9 = vor.u32 %v5422_v16, %v5421_v57 }
 0x6e1   : > { %6896 = vmatpush3.bf16.msra.mxu1 %v7438_v33  ;;  %v5046_v34 = vrot.slane %v5044_v36, 1  ;;  %v5283_v2 = vsel %vm3520_vm7, %v5280_v40, %v5282_v51  ;;  %v5428_v47 = vrot.slane %v5044_v36, 2  ;;  %v7457_v33 = vld [vmem:[%s9640_s16 + $0x18] sm:$0xff]  }
 0x6e2   : > { %6897 = vmatprep.subr.bf16.mxu1 %v7440_v32  ;;  %6924 = vmatmul.mubr.msk.bf16.gmra.mxu0 %vm5078_vm11, %v5283_v2  ;;  %v5427_v53 = vrot.slane %v5425_v19, 1  ;;  %v5424_v8 = vsel %vm3780_vm8, %v5419_v59, %v5423_v9 }
 0x6e3   : > { %v5047_v43 = vsel %vm3208_vm6, %v5042_v11, %v5046_v34  ;;  %6952 = vmatpush3.bf16.msra.mxu0 %v7449_v46  ;;  %6955 = vmatprep.mubr.msk.bf16.mxu0 %vm5078_vm11, %v5559_v1 }
 0x6e4   : > { %6888 = vmatmul.mubr.msk.bf16.gmra.mxu1 %vm5078_vm11, %v5047_v43  ;;  %6953 = vmatprep.subr.bf16.mxu0 %v7451_v50  ;;  %v5429_v48 = vor.u32 %v5428_v47, %v5427_v53 }
 0x6e5   : > { %6898 = vmatpush3.bf16.msra.mxu1 %v7440_v32  ;;  %6901 = vmatprep.mubr.msk.bf16.mxu1 %vm5078_vm11, %v9349_v10  ;;  %v5416_v10 = vsel %vm3780_vm8, %v5412_v14, %v5415_v42 }
 0x6e6   : > { %6899 = vmatprep.subr.bf16.mxu1 %v7442_v45  ;;  %v5430_v24 = vsel %vm3780_vm8, %v5423_v9, %v5429_v48 }
 0x6e7   : > { %6954 = vmatpush3.bf16.msra.mxu0 %v7451_v50 }
 0x6e8   : > { %6975 = vmatprep.subr.bf16.mxu0 %v7530_v62 }
 0x6e9   : > { %6900 = vmatpush3.bf16.msra.mxu1 %v7442_v45 }
 0x6ea   : > { %6927 = vmatprep.subr.bf16.mxu1 %v7444_v7  ;;  %6956 = vmatmul.mubr.msk.bf16.vlgmr.msra.gmra.mxu0 %vm5078_vm11, %v5561_v6 }
 0x6eb   : > { %6959 = vmatprep.mubr.msk.bf16.mxu0 %vm5078_vm11, %v5563_v60  ;;  %6976 = vmatpush3.bf16.msra.mxu0 %v5811_v21 }
 0x6ec   : > { %6902 = vmatmul.mubr.msk.bf16.vlgmr.msra.gmra.mxu1 %vm5078_vm11, %v9352_v38  ;;  %v5565_v38 = vsel %vm4060_vm5, %v5562_v55, %v5564_v49  ;;  %6977 = vmatprep.subr.bf16.mxu0 %v7530_v62 }
 0x6ed   : > { %6928 = vmatpush3.bf16.msra.mxu1 %v7444_v7  ;;  %6905 = vmatprep.mubr.msk.bf16.mxu1 %vm5078_vm11, %v9368_v20  ;;  %v5420_v20 = vsel %vm3780_vm8, %v5415_v42, %v5419_v59 }
 0x6ee   : > { %6929 = vmatprep.subr.bf16.mxu1 %v7446_v15 }
 0x6ef   : > { %6978 = vmatpush3.bf16.msra.mxu0 %v7454_v27 }
 0x6f0   : > { %6979 = vmatprep.subr.bf16.mxu0 %v7530_v62 }
 0x6f1   : > { %6930 = vmatpush3.bf16.msra.mxu1 %v7446_v15 }
 0x6f2   : > { %6931 = vmatprep.subr.bf16.mxu1 %v7448_v0  ;;  %6960 = vmatmul.mubr.msk.bf16.gmra.mxu0 %vm5078_vm11, %v5565_v38 }
 0x6f3   : > { %6991 = vmatprep.mubr.msk.bf16.mxu0 %vm7531_vm10, %v7530_v62 }
 0x6f4   : > { %6906 = vmatmul.mubr.msk.bf16.gmra.mxu1 %vm5078_vm11, %v9392_v37  ;;  %v7455_v37 = vld [vmem:[%s9640_s16 + $0x28] sm:$0xff]  }
 0x6f5   : > { %6932 = vmatpush3.bf16.msra.mxu1 %v7448_v0  ;;  %6937 = vmatprep.mubr.msk.bf16.mxu1 %vm5078_vm11, %v5416_v10 }
 0x6f6   : > { %6933 = vmatprep.subr.bf16.mxu1 %v7450_v28  ;;  %6980 = vmatpush3.bf16.msra.mxu0 %v7455_v37 }
 0x6f7   : > { %6981 = vmatprep.subr.bf16.mxu0 %v7530_v62 }
 0x6f9   : > { %6934 = vmatpush3.bf16.msra.mxu1 %v7450_v28 }
 0x6fa   : > { %6935 = vmatprep.subr.bf16.mxu1 %v7452_v41  ;;  %6982 = vmatpush3.bf16.msra.mxu0 %v7456_v56 }
 0x6fb   : > { %6983 = vmatprep.subr.bf16.mxu0 %v7530_v62 }
 0x6fd   : > { %6936 = vmatpush3.bf16.msra.mxu1 %v7452_v41 }
 0x6fe   : > { %6963 = vmatprep.subr.bf16.mxu1 %v7530_v62  ;;  %6984 = vmatpush3.bf16.msra.mxu0 %v7457_v33 }
 0x6ff   : > { %6985 = vmatprep.subr.bf16.mxu0 %v7530_v62 }
 0x700   : > { %6938 = vmatmul.mubr.msk.bf16.vlgmr.msra.gmra.mxu1 %vm5078_vm11, %v5420_v20 }
 0x701   : > { %6941 = vmatprep.mubr.msk.bf16.mxu1 %vm5078_vm11, %v5424_v8 }
 0x702   : > { %6986 = vmatpush3.bf16.msra.mxu0 %v7458_v31 }
 0x703   : > { %6987 = vmatprep.subr.bf16.mxu0 %v7530_v62 }
 0x708   : > { %6942 = vmatmul.mubr.msk.bf16.gmra.mxu1 %vm5078_vm11, %v5430_v24 }
 0x709   : > { %6971 = vmatprep.mubr.msk.bf16.mxu1 %vm7531_vm10, %v7530_v62 }
 0x796   : > { %v6921_v39 = vpop.f32.mrf.mxu0 }
 0x798   : > { %v6885_v40 = vpop.f32.mrf.mxu1  ;;  %v9525_v46 = vpop.f32.mrf.mxu0 }
 0x79a   : > { %v5125_v18 = vpop.f32.mrf.mxu1  ;;  %v6922_v22 = vpop.f32.mrf.mxu0 }
 0x79c   : > { %v6886_v29 = vpop.f32.mrf.mxu1  ;;  %v5363_v44 = vpop.f32.mrf.mxu0 }
 0x79e   : > { %v5128_v58 = vpop.f32.mrf.mxu1 }
 0x7a2   : > { %v6925_v32 = vpop.f32.mrf.mxu0 }
 0x7a4   : > { %v6889_v3 = vpop.f32.mrf.mxu1  ;;  %v5376_v36 = vpop.f32.mrf.mxu0 }
 0x7a6   : > { %v5141_v54 = vpop.f32.mrf.mxu1  ;;  %v6926_v35 = vpop.f32.mrf.mxu0 }
 0x7a8   : > { %v6890_v4 = vpop.f32.mrf.mxu1  ;;  %v5379_v25 = vpop.f32.mrf.mxu0 }
 0x7aa   : > { %v5144_v51 = vpop.f32.mrf.mxu1  ;;  %v6957_v2 = vpop.f32.mrf.mxu0 }
 0x7ac   : > { %v6903_v13 = vpop.f32.mrf.mxu1  ;;  %v5642_v1 = vpop.f32.mrf.mxu0 }
 0x7ad   : > { %v5237_v16 = vadd.f32 %v6903_v13, %v6885_v40  ;;  %v7459_v13 = vld [vmem:[%s9640_s16 + $0x8] sm:$0xff]  }
 0x7ae   : > { %v5228_v50 = vpop.f32.mrf.mxu1  ;;  %v6958_v63 = vpop.f32.mrf.mxu0  ;;  %6988 = vmatpush3.bf16.msra.mxu0 %v7459_v13 }
 0x7af   : > { %v5229_v21 = vadd.f32 %v5228_v50, %v5125_v18  ;;  %v5393_v37 = vadd.f32 %v6921_v39, %v5237_v16  ;;  %6989 = vmatprep.subr.bf16.mxu0 %v7530_v62  ;;  %v7461_v50 = vld [vmem:[%s9642_s18 + $0x28] ss:$0 sps:$4 sm:$0x33]  }
 0x7b0   : > { %v6904_v12 = vpop.f32.mrf.mxu1  ;;  %v5645_v6 = vpop.f32.mrf.mxu0 }
 0x7b1   : > { %v5240_v14 = vadd.f32 %v6904_v12, %v6886_v29  ;;  %v5391_v40 = vadd.f32 %v9525_v46, %v5229_v21  ;;  %v5681_v46 = vld [vmem:[%s9639_s15] sm:$0xf]  ;;  %v5910_v12 = vsel %vm3032_vm3, %v7461_v50, 0 }
 0x7b2   : > { %v5231_v11 = vpop.f32.mrf.mxu1  ;;  %v6961_v52 = vpop.f32.mrf.mxu0 }
 0x7b3   : > { %v5232_v53 = vadd.f32 %v5231_v11, %v5128_v58  ;;  %v5394_v47 = vadd.f32 %v6922_v22, %v5240_v14  ;;  %v7463_v11 = vld [vmem:[%s9642_s18 + $0x18] sm:$0xff]  }
 0x7b4   : > { %v6907_v34 = vpop.f32.mrf.mxu1  ;;  %v5658_v30 = vpop.f32.mrf.mxu0 }
 0x7b5   : > { %v5253_v23 = vadd.f32 %v6907_v34, %v6889_v3  ;;  %v5392_v3 = vadd.f32 %v5363_v44, %v5232_v53  ;;  %v7464_v34 = vld [vmem:[%s9642_s18 + $0x10] sm:$0xff]  }
 0x7b6   : > { %v5244_v45 = vpop.f32.mrf.mxu1  ;;  %v6962_v57 = vpop.f32.mrf.mxu0 }
 0x7b7   : > { %v5245_v42 = vadd.f32 %v5244_v45, %v5141_v54  ;;  %v5397_v28 = vadd.f32 %v6925_v32, %v5253_v23 }
 0x7b8   : > { %v6908_v43 = vpop.f32.mrf.mxu1  ;;  %v5661_v27 = vpop.f32.mrf.mxu0 }
 0x7b9   : > { %v5256_v0 = vadd.f32 %v6908_v43, %v6890_v4  ;;  %v5395_v19 = vadd.f32 %v5376_v36, %v5245_v42 }
 0x7ba   : > { %v5247_v7 = vpop.f32.mrf.mxu1 }
 0x7bb   : > { %v5248_v38 = vadd.f32 %v5247_v7, %v5144_v51  ;;  %v5398_v26 = vadd.f32 %v6926_v35, %v5256_v0  ;;  %v7460_v35 = vld [vmem:[%s9640_s16] sm:$0xff]  }
 0x7bc   : > { %6990 = vmatpush3.bf16.msra.mxu0 %v7460_v35 }
 0x7bd   : > { %v5396_v9 = vadd.f32 %v5379_v25, %v5248_v38  ;;  %v7462_v25 = vld [vmem:[%s9642_s18 + $0x20] sm:$0xff]  }
 0x7c0   : > { %v6939_v55 = vpop.f32.mrf.mxu1 }
 0x7c1   : > { %v5540_v29 = vadd.f32 %v6939_v55, %v5393_v37 }
 0x7c2   : > { %v5507_v15 = vpop.f32.mrf.mxu1 }
 0x7c3   : > { %v5675_v4 = vadd.f32 %v6957_v2, %v5540_v29  ;;  %v5538_v36 = vadd.f32 %v5507_v15, %v5391_v40  ;;  %v6544_v2 = vld [vmem:[%s9638_s14] ss:$0 sm:$0xff]  ;;  %v7465_v15 = vld [vmem:[%s9642_s18 + $0x8] sm:$0xff]  }
 0x7c4   : > { %v6940_v60 = vpop.f32.mrf.mxu1 }
 0x7c5   : > { %v5541_v56 = vadd.f32 %v6940_v60, %v5394_v47  ;;  %v5673_v51 = vadd.f32 %v5642_v1, %v5538_v36  ;;  %v7466_v60 = vld [vmem:[%s9642_s18] sm:$0xff]  }
 0x7c6   : > { %v5510_v49 = vpop.f32.mrf.mxu1 }
 0x7c7   : > { %v5676_v22 = vadd.f32 %v6958_v63, %v5541_v56  ;;  %v5539_v58 = vadd.f32 %v5510_v49, %v5392_v3 }
 0x7c8   : > { %v6943_v17 = vpop.f32.mrf.mxu1 }
 0x7c9   : > { %v5544_v41 = vadd.f32 %v6943_v17, %v5397_v28  ;;  %v5683_v39 = vpack.c.bf16 %v5676_v22, %v5675_v4  ;;  %v5674_v18 = vadd.f32 %v5645_v6, %v5539_v58 }
 0x7ca   : > { %v5523_v10 = vpop.f32.mrf.mxu1 }
 0x7cb   : > { %v5542_v8 = vadd.f32 %v5523_v10, %v5395_v19  ;;  %v5679_v48 = vadd.f32 %v6961_v52, %v5544_v41  ;;  %v5682_v44 = vpack.c.bf16 %v5674_v18, %v5673_v51  ;;  %v6546_v52 = vld [vmem:[%s9641_s17] ss:$0 sm:$0xff] }
 0x7cc   : > { %v6944_v61 = vpop.f32.mrf.mxu1 }
 0x7cd   : > { %v5545_v59 = vadd.f32 %v6944_v61, %v5398_v26  ;;  %v5677_v32 = vadd.f32 %v5658_v30, %v5542_v8 }
 0x7ce   : > { %v5526_v20 = vpop.f32.mrf.mxu1 }
 0x7cf   : > { %v5680_v24 = vadd.f32 %v6962_v57, %v5545_v59  ;;  %v5543_v5 = vadd.f32 %v5526_v20, %v5396_v9 }
 0x7d1   : > { %v5685_v33 = vpack.c.bf16 %v5680_v24, %v5679_v48  ;;  %v5678_v31 = vadd.f32 %v5661_v27, %v5543_v5 }
 0x7d3   : > { %6964 = vmatpush3.bf16.msra.mxu1 %v5685_v33  ;;  %v5684_v54 = vpack.c.bf16 %v5678_v31, %v5677_v32 }
 0x7d4   : > { %6965 = vmatprep.subr.bf16.mxu1 %v7530_v62 }
 0x7d7   : > { %6966 = vmatpush3.bf16.msra.mxu1 %v5684_v54 }
 0x7d8   : > { %6967 = vmatprep.subr.bf16.mxu1 %v7530_v62 }
 0x7db   : > { %6968 = vmatpush3.bf16.msra.mxu1 %v5683_v39 }
 0x7dc   : > { %6969 = vmatprep.subr.bf16.mxu1 %v7530_v62 }
 0x7df   : > { %6970 = vmatpush3.bf16.msra.mxu1 %v5682_v44 }
 0x7e0   : > { %6995 = vmatprep.subr.bf16.mxu1 %v7530_v62 }
 0x7e2   : > { %6972 = vmatmul.mubr.msk.bf16.vlgmr.msra.gmra.mxu1 %vm5693_vm12, %v5681_v46 }
 0x7e3   : > { %7007 = vmatprep.mubr.msk.bf16.mxu1 %vm7531_vm10, %v7530_v62  ;;  %6996 = vmatpush3.bf16.msra.mxu1 %v5910_v12 }
 0x7e4   : > { %6997 = vmatprep.subr.bf16.mxu1 %v7530_v62 }
 0x7e7   : > { %6998 = vmatpush3.bf16.msra.mxu1 %v7462_v25 }
 0x7e8   : > { %6999 = vmatprep.subr.bf16.mxu1 %v7530_v62 }
 0x7eb   : > { %7000 = vmatpush3.bf16.msra.mxu1 %v7463_v11 }
 0x7ec   : > { %7001 = vmatprep.subr.bf16.mxu1 %v7530_v62 }
 0x7ef   : > { %7002 = vmatpush3.bf16.msra.mxu1 %v7464_v34 }
 0x7f0   : > { %7003 = vmatprep.subr.bf16.mxu1 %v7530_v62 }
 0x7f3   : > { %7004 = vmatpush3.bf16.msra.mxu1 %v7465_v15 }
 0x7f4   : > { %7005 = vmatprep.subr.bf16.mxu1 %v7530_v62  ;;  %v6556_v62 = vld [vmem:[%s9643_s19] ss:$0 sm:$0xff] }
 0x7f7   : > { %7006 = vmatpush3.bf16.msra.mxu1 %v7466_v60 }
 0x8a2   : > { %v5731_v45 = vpop.f32.mrf.mxu1 }
 0x8a3   : > { %v5732_v1 = vadd.f32 %v6544_v2, %v5731_v45 }
 0x8a4   : > { %v6973_v43 = vpop.f32.mrf.mxu1 }
 0x8a5   : > { %v5737_v63 = vmax.f32 %v5732_v1, 0.0 }
 0x8a6   : > { %v5734_v7 = vpop.f32.mrf.mxu1 }
 0x8a7   : > { %v5753_v55 = vpack.c.bf16 %v5737_v63, %v5737_v63 }
 0x8a8   : > { %v6974_v6 = vpop.f32.mrf.mxu1 }
 0x8a9   : > { %6992 = vmatmul.mubr.msk.bf16.vlgmr.msra.gmra.mxu0 %vm5806_vm13, %v5753_v55 }
 0x969   : > { %v5847_v23 = vpop.f32.mrf.mxu0 }
 0x96a   : > { %v5848_v49 = vadd.f32 %v6546_v52, %v5847_v23 }
 0x96b   : > { %v6993_v0 = vpop.f32.mrf.mxu0 }
 0x96c   : > { %v5853_v17 = vmax.f32 %v5848_v49, 0.0 }
 0x96d   : > { %v5850_v30 = vpop.f32.mrf.mxu0 }
 0x96e   : > { %v5865_v42 = vpack.c.bf16 %v5853_v17, %v5853_v17 }
 0x96f   : > { %v6994_v38 = vpop.f32.mrf.mxu0 }
 0x970   : > { %7008 = vmatmul.mubr.msk.bf16.vlgmr.msra.gmra.mxu1 %vm3007_vm4, %v5865_v42 }
 0xa30   : > { %v5946_v28 = vpop.f32.mrf.mxu1 }
 0xa31   : > { %v5947_v14 = vadd.f32 %v6556_v62, %v5946_v28 }
 0xa32   : > { %v7009_v10 = vpop.f32.mrf.mxu1 }
 0xa33   : > { %5952 = vst [vmem:[%s625_s23] sm:$0xff] %v5947_v14 }
 0xa34   : > { %v5949_v41 = vpop.f32.mrf.mxu1 }
 0xa35   : > { %7480 = shalt.err (!%p7477_p3)
}
 0xa36   : > { %s7481_s26 = scalar_lea.hbm %s9583_s30, 128  ;;  %s7485_s1 = scalar_lea.hbm %s9742_s29, 256 }
 0xa37   : > { %p7482_p4 = scmp.ne.s32.totalorder %s9583_s30, %s7481_s26  ;;  %p7486_p9 = scmp.lt.s32.totalorder %s9583_s30, %s9742_s29 }
 0xa38   : > { %p7487_p10 = scmp.lt.s32.totalorder %s7485_s1, %s7481_s26 }
 0xa39   : > { %p7483_p7 = pnand %p7482_p4, %p7676_p5 }
 0xa3a   : > { %p7488_p11 = por %p7487_p10, %p7486_p9 }
 0xa3b   : > { %p7484_p8 = pneg %p7483_p7 }
 0xa3d   : > { %p7489_p12 = pnand %p7488_p11, %p7484_p8 }
 0xa3f   : > { %7492 = shalt.err (!%p7489_p12)
}
 0xa40   : > { %7011 = dma.vmem_to_hbm [thread:$0]  (%p7676_p5), %s9585_s24, 128, %s9583_s30, %s5954_s0   ;;  %v7010_v26 = vpop.f32.mrf.mxu1 }
 0xa41 PF: > { %s9743_s25 = sld [smem:[#allocation7_spill]] }
 0xa42   : > { %s9744_s28 = sld [smem:[#allocation5_spill]] }
 0xa47   : > { %p7017_p13 = scmp.ge.s32.totalorder %s9743_s25, 2 }
 0xa48   : > { %s5979_s20 = sand.u32 1, %s9744_s28  }
 0xa49   : > { %p7014_p0 = pnand %p7017_p13, %p7680_p6  ;;  %s5980_s5 = scalar_lea.sflag [#allocation3], %s5979_s20 }
 0xa4b   : > { %p7015_p1 = pneg %p7014_p0 }
 0xa4d   : > { %7510 = dma.done.wait (%p7015_p1), %s5980_s5, 128  }
 0xa4e   : > { %7512 = vsyncadd (%p7015_p1), %s5980_s5, 4294967168  ;;  %s9746_s24 = sld [smem:[#allocation8_spill]]  ;;  %s9749_s1 = smov %s7519_s22 }
 0xa4f   : > { %s9747_s26 = sld [smem:[#allocation6_spill]] }
 0xa50   : > { %s9748_s23 = sld [smem:[#allocation9_spill]] }
 0xa54   : > { %p30_p2 = scmp.ge.s32.totalorder %s9746_s24, 4  }
 0xa55   : > { %s9750_s22 = smov %s9747_s26 }
 0xa56   :  { %32 = sbr.rel (!%p30_p2) target bundleno = 11 (0xb), region = 143 }
 0xa5b   :  { %5985 = vsyncpa [#allocation3], 1 }
 0xa5c   :  { %5987 = vsyncpa [#allocation3 + $0x1], 1 }

</bundles_post_ra>
